<compile_context>
chip_gen: v6e
topology: v6e:2x2x1
jax: 0.10.0
libtpu: 0.0.40
codegen_flags: <defaults>
</compile_context>

<pallas_src>
import jax
import jax.numpy as jnp
from jax import lax
from jax.experimental import pallas as pl
from jax.experimental.pallas import tpu as pltpu


# --------------------------------------------------------------------------- #
#  Kernel factory
# --------------------------------------------------------------------------- #
def _make_residual_kernel(W, Cin, Cout, B, TH, T, use_bf16):
    """One grid step processes B images x TH output rows (2-row halo recompute)."""
    R = (TH + 4) * W            # x raster rows per image tile (2-row halo each side)
    BR = B * R                  # rows of every big matmul (valid + small junk gaps)
    THW = TH * W                # valid output rows per image tile
    C3i = 3 * Cin
    C3o = 3 * Cout
    mm_dtype = jnp.bfloat16 if use_bf16 else jnp.float32

    def kernel(x_ref, w1_ref, b1_ref, w2_ref, b2_ref, wsk_ref, bsk_ref,
               out_ref, cat_ref):
        t = pl.program_id(1)
        SR = cat_ref.shape[0]

        # -------- conv1 (bn1 scale folded into w1): 3 taps, K = 3*Cin ---------
        # x_ref rows are a flat raster (im2col'd along w); tap dh is a pure
        # sublane-shifted slice feeding the MXU directly.
        def c1_tap(dh):
            return jnp.dot(x_ref[dh * W: dh * W + BR, :],
                           w1_ref[dh * C3i:(dh + 1) * C3i, :],
                           preferred_element_type=jnp.float32)

        acc1 = c1_tap(0) + c1_tap(1) + c1_tap(2)
        y1 = jnp.maximum(acc1 + b1_ref[...], 0.0)            # (BR, Cout) f32

        # -------- stage y1 as an im2col'd plane in VMEM -----------------------
        # cat_ref[r, :] == plane[r-1, :] where
        #   plane[m] = [ y1[m-1]*(w>0), y1[m], y1[m+1]*(w<W-1) ]   (w = m % W)
        rows = lax.broadcasted_iota(jnp.int32, (BR, 1), 0)
        w_of = rows % W
        zero = jnp.zeros_like(y1)
        left_src = jnp.where(w_of == (W - 1), zero, y1)      # kill w==W-1 pre-shift
        right_src = jnp.where(w_of == 0, zero, y1)           # kill w==0   pre-shift

        cat_ref[BR:SR, :] = jnp.zeros((SR - BR, C3o), jnp.float32)   # junk-only tail
        cat_ref[1:BR + 1, Cout:2 * Cout] = y1
        cat_ref[2:BR + 2, 0:Cout] = left_src
        cat_ref[0:BR, 2 * Cout:3 * Cout] = right_src
        cat_ref[1:2, 0:Cout] = jnp.zeros((1, Cout), jnp.float32)     # no left nbr

        # y1 rows that fall outside the image (tile edges) must be ZERO for
        # conv2's padding -- overwrite them only on the edge tiles.
        @pl.when(t == 0)
        def _():
            for b in range(B):
                base = b * R + 1
                cat_ref[base:base + W, :] = jnp.zeros((W, C3o), jnp.float32)

        @pl.when(t == T - 1)
        def _():
            for b in range(B):
                base = b * R + (TH + 1) * W + 1
                cat_ref[base:base + W, :] = jnp.zeros((W, C3o), jnp.float32)

        # -------- conv2 (bn2 scale folded into w2): 3 taps, K = 3*Cout --------
        def c2_tap(dh):
            lhs = cat_ref[1 + dh * W: 1 + dh * W + BR, :].astype(mm_dtype)
            return jnp.dot(lhs, w2_ref[dh * C3o:(dh + 1) * C3o, :],
                           preferred_element_type=jnp.float32)

        acc2 = c2_tap(0) + c2_tap(1) + c2_tap(2)

        # -------- skip path (1x1 conv + bn folded, or embedded identity) ------
        skip = jnp.dot(x_ref[2 * W: 2 * W + BR, :], wsk_ref[...],
                       preferred_element_type=jnp.float32)

        out_full = jnp.maximum(acc2 + b2_ref[...] + skip + bsk_ref[...], 0.0)

        # -------- store only the valid TH*W rows of each image ----------------
        for b in range(B):
            out_ref[b * THW:(b + 1) * THW, :] = (
                out_full[b * R: b * R + THW, :].astype(out_ref.dtype))

    return kernel


# --------------------------------------------------------------------------- #
#  Host-side helpers
# --------------------------------------------------------------------------- #
def fold_bn(gamma, beta, mean, var, eps=1e-5):
    scale = gamma / jnp.sqrt(var + eps)
    bias = beta - mean * scale
    return (scale.reshape(1, -1).astype(jnp.float32),
            bias.reshape(1, -1).astype(jnp.float32))


def residual_forward_pallas(x_nhwc, params, has_proj, stride=1,
                            block_batch=None, tile_h=None, use_bf16=False):
    """x_nhwc: (N, H, W, Cin) float32 -> (N, H, W, Cout) float32."""
    if stride != 1:
        # TODO(synk): stride > 1 (hg downsample layers) not implemented.
        raise NotImplementedError("residual Pallas kernel only supports stride == 1")

    N, H, W, Cin = x_nhwc.shape
    Cout = params["w1"].shape[-1]

    B = block_batch if block_batch is not None else (2 if N % 2 == 0 else 1)
    TH = tile_h if tile_h is not None else (8 if H % 8 == 0 else H)
    assert N % B == 0, "batch must be divisible by block_batch"
    assert H % TH == 0, "H must be divisible by tile_h"
    NB, T = N // B, H // TH
    R = (TH + 4) * W
    BR = B * R
    THW = TH * W
    SR = BR + 2 * W + 8                     # im2col'd y1 scratch rows

    mm_dtype = jnp.bfloat16 if use_bf16 else jnp.float32

    # ---- fold BN scales into the conv weights; only biases enter the kernel --
    s1, b1 = fold_bn(params["g1"], params["be1"], params["m1"], params["v1"])
    s2, b2 = fold_bn(params["g2"], params["be2"], params["m2"], params["v2"])
    w1 = (params["w1"] * s1[0]).reshape(9 * Cin, Cout).astype(mm_dtype)
    w2 = (params["w2"] * s2[0]).reshape(9 * Cout, Cout).astype(mm_dtype)
    if has_proj:
        ssk, bsk = fold_bn(params["gsk"], params["besk"], params["msk"], params["vsk"])
        wsk_core = params["wsk"].reshape(Cin, Cout) * ssk[0]
        bsk_eff = bsk
    else:
        assert Cin == Cout, "identity skip requires Cin == Cout"
        wsk_core = jnp.eye(Cin, dtype=jnp.float32)
        bsk_eff = jnp.zeros((1, Cout), jnp.float32)
    wsk = jnp.zeros((3 * Cin, Cout), jnp.float32).at[Cin:2 * Cin].set(wsk_core)
    wsk = wsk.astype(mm_dtype)

    # ---- host-side partial im2col (w-1, w, w+1 channels on lanes) ------------
    xw = jnp.pad(x_nhwc, ((0, 0), (0, 0), (1, 1), (0, 0)))          # (N, H, W+2, Cin)
    xcat = jnp.concatenate([xw[:, :, 0:W], xw[:, :, 1:W + 1], xw[:, :, 2:W + 2]],
                           axis=-1)                                 # (N, H, W, 3Cin)
    # 2-row halo for the fused conv1->conv2 receptive field.
    xcat = jnp.pad(xcat, ((0, 0), (2, 2), (0, 0), (0, 0)))          # (N, H+4, W, 3Cin)
    # Overlapping H tiles, then stack B images per grid step along sublanes.
    tiles = jnp.stack([xcat[:, t * TH: t * TH + TH + 4] for t in range(T)], axis=1)
    tiles = tiles.reshape(NB, B, T, TH + 4, W, 3 * Cin).transpose(0, 2, 1, 3, 4, 5)
    x_flat = tiles.reshape(NB, T, BR, 3 * Cin)
    x_flat = jnp.pad(x_flat, ((0, 0), (0, 0), (0, 2 * W), (0, 0))).astype(mm_dtype)
    # TODO(synk): keep this flat raster layout in HBM across chained residual
    #             blocks instead of re-building it per block.

    kernel = _make_residual_kernel(W, Cin, Cout, B, TH, T, use_bf16)

    out = pl.pallas_call(
        kernel,
        out_shape=jax.ShapeDtypeStruct((NB, T, B * THW, Cout), jnp.float32),
        grid=(NB, T),
        in_specs=[
            pl.BlockSpec((None, None, BR + 2 * W, 3 * Cin), lambda nb, t: (nb, t, 0, 0)),
            pl.BlockSpec((9 * Cin, Cout), lambda nb, t: (0, 0)),
            pl.BlockSpec((1, Cout), lambda nb, t: (0, 0)),
            pl.BlockSpec((9 * Cout, Cout), lambda nb, t: (0, 0)),
            pl.BlockSpec((1, Cout), lambda nb, t: (0, 0)),
            pl.BlockSpec((3 * Cin, Cout), lambda nb, t: (0, 0)),
            pl.BlockSpec((1, Cout), lambda nb, t: (0, 0)),
        ],
        out_specs=pl.BlockSpec((None, None, B * THW, Cout), lambda nb, t: (nb, t, 0, 0)),
        scratch_shapes=[pltpu.VMEM((SR, 3 * Cout), jnp.float32)],
        compiler_params=pltpu.CompilerParams(
            dimension_semantics=("parallel", "parallel"),
            vmem_limit_bytes=32 * 1024 * 1024),
    )(x_flat, w1, b1, w2, b2, wsk, bsk_eff)

    # Raw (rows, Cout) result -> (N, H, W, Cout); pure XLA reshape/transpose.
    out = out.reshape(NB, T, B, TH, W, Cout).transpose(0, 2, 1, 3, 4, 5)
    return out.reshape(N, H, W, Cout)


# ---------------- pure-JAX reference (eval-mode BN), for verification -------- #
def residual_forward_ref(x_nhwc, params, has_proj):
    def conv(x, w, pad):
        return lax.conv_general_dilated(
            x, w, window_strides=(1, 1), padding=pad,
            dimension_numbers=("NHWC", "HWIO", "NHWC"))

    s1, b1 = fold_bn(params["g1"], params["be1"], params["m1"], params["v1"])
    s2, b2 = fold_bn(params["g2"], params["be2"], params["m2"], params["v2"])

    y = conv(x_nhwc, params["w1"], ((1, 1), (1, 1)))
    y = jnp.maximum(y * s1[0] + b1[0], 0.0)
    y = conv(y, params["w2"], ((1, 1), (1, 1)))
    y = y * s2[0] + b2[0]
    if has_proj:
        ssk, bsk = fold_bn(params["gsk"], params["besk"], params["msk"], params["vsk"])
        skip = conv(x_nhwc, params["wsk"], ((0, 0), (0, 0)))
        skip = skip * ssk[0] + bsk[0]
    else:
        skip = x_nhwc
    return jnp.maximum(y + skip, 0.0)


def init_params(key, Cin, Cout):
    ks = jax.random.split(key, 16)
    u = lambda k, shape: jax.random.uniform(k, shape, jnp.float32, 0.5, 1.5)
    n = lambda k, shape, s=0.1: s * jax.random.normal(k, shape, jnp.float32)
    return dict(
        w1=n(ks[0], (3, 3, Cin, Cout)),          # HWIO
        g1=u(ks[1], (Cout,)), be1=n(ks[2], (Cout,)),
        m1=n(ks[3], (Cout,)), v1=u(ks[4], (Cout,)),
        w2=n(ks[5], (3, 3, Cout, Cout)),
        g2=u(ks[6], (Cout,)), be2=n(ks[7], (Cout,)),
        m2=n(ks[8], (Cout,)), v2=u(ks[9], (Cout,)),
        wsk=n(ks[10], (1, 1, Cin, Cout)),        # 1x1 projection
        gsk=u(ks[11], (Cout,)), besk=n(ks[12], (Cout,)),
        msk=n(ks[13], (Cout,)), vsk=u(ks[14], (Cout,)),
    )


if __name__ == "__main__":
    # residual(k=3, inp_dim=4, out_dim=8, stride=1): skip is 1x1 conv + BN.
    N, Cin, H, W = 2, 4, 16, 16
    Cout = 8
    has_proj = (Cin != Cout)  # stride == 1

    key = jax.random.PRNGKey(0)
    kx, kp = jax.random.split(key)
    x_nchw = jax.random.normal(kx, (N, Cin, H, W), jnp.float32)   # PyTorch layout
    x_nhwc = jnp.transpose(x_nchw, (0, 2, 3, 1))                  # kernel layout

    params = init_params(kp, Cin, Cout)

    out = residual_forward_pallas(x_nhwc, params, has_proj,
                                  block_batch=2, tile_h=8)
    out = jax.block_until_ready(out)

    ref = residual_forward_ref(x_nhwc, params, has_proj)
    assert out.shape == (N, H, W, Cout)
    err = float(jnp.max(jnp.abs(out - ref)))
    assert jnp.allclose(out, ref, atol=1e-4, rtol=1e-4), err

    print("KERNEL_OK")
</pallas_src>

<mosaic_0001>
module attributes {stable_mosaic.version = 11 : i64} {
  func.func @kernel(%arg0: i32, %arg1: i32, %arg2: memref<1x1x416x12xf32, #tpu.memory_space<vmem>>, %arg3: memref<36x8xf32, #tpu.memory_space<vmem>>, %arg4: memref<1x8xf32, #tpu.memory_space<vmem>>, %arg5: memref<72x8xf32, #tpu.memory_space<vmem>>, %arg6: memref<1x8xf32, #tpu.memory_space<vmem>>, %arg7: memref<12x8xf32, #tpu.memory_space<vmem>>, %arg8: memref<1x8xf32, #tpu.memory_space<vmem>>, %arg9: memref<1x1x256x8xf32, #tpu.memory_space<vmem>>, %arg10: memref<424x24xf32, #tpu.memory_space<vmem>>) attributes {dimension_semantics = [#tpu.dimension_semantics<parallel>, #tpu.dimension_semantics<parallel>], iteration_bounds = array<i64: 1, 2>, scalar_prefetch = 0 : i64, scratch_operands = 1 : i64, tpu.core_type = #tpu.core_type<tc>, window_params = [{transform_indices = @transform_0, window_bounds = array<i64: 1, 1, 416, 12>}, {pipeline_mode = #tpu.pipeline_mode<synchronous>, transform_indices = @transform_1, window_bounds = array<i64: 36, 8>}, {pipeline_mode = #tpu.pipeline_mode<synchronous>, transform_indices = @transform_2, window_bounds = array<i64: 1, 8>}, {pipeline_mode = #tpu.pipeline_mode<synchronous>, transform_indices = @transform_3, window_bounds = array<i64: 72, 8>}, {pipeline_mode = #tpu.pipeline_mode<synchronous>, transform_indices = @transform_4, window_bounds = array<i64: 1, 8>}, {pipeline_mode = #tpu.pipeline_mode<synchronous>, transform_indices = @transform_5, window_bounds = array<i64: 12, 8>}, {pipeline_mode = #tpu.pipeline_mode<synchronous>, transform_indices = @transform_6, window_bounds = array<i64: 1, 8>}, {transform_indices = @transform_7, window_bounds = array<i64: 1, 1, 256, 8>}]} {
    %c0 = arith.constant 0 : index
    %c0_0 = arith.constant 0 : index
    %c0_1 = arith.constant 0 : index
    %c0_2 = arith.constant 0 : index
    %0 = vector.load %arg2[%c0, %c0_0, %c0_1, %c0_2] : memref<1x1x416x12xf32, #tpu.memory_space<vmem>>, vector<1x1x384x12xf32>
    %1 = vector.shape_cast %0 : vector<1x1x384x12xf32> to vector<384x12xf32>
    %c0_3 = arith.constant 0 : index
    %c0_4 = arith.constant 0 : index
    %2 = vector.load %arg3[%c0_3, %c0_4] : memref<36x8xf32, #tpu.memory_space<vmem>>, vector<12x8xf32>
    %cst = arith.constant dense<0.000000e+00> : vector<384x8xf32>
    %3 = tpu.matmul %1, %2, %cst {dimension_numbers = #tpu.dot_dimension_numbers<[1], [0], [0], [1], [0, 0, 1, 1], [], []>} : vector<384x12xf32>, vector<12x8xf32>, vector<384x8xf32> -> vector<384x8xf32>
    %c0_5 = arith.constant 0 : index
    %c0_6 = arith.constant 0 : index
    %c16 = arith.constant 16 : index
    %c0_7 = arith.constant 0 : index
    %4 = vector.load %arg2[%c0_5, %c0_6, %c16, %c0_7] : memref<1x1x416x12xf32, #tpu.memory_space<vmem>>, vector<1x1x384x12xf32>
    %5 = vector.shape_cast %4 : vector<1x1x384x12xf32> to vector<384x12xf32>
    %c12 = arith.constant 12 : index
    %c0_8 = arith.constant 0 : index
    %6 = vector.load %arg3[%c12, %c0_8] : memref<36x8xf32, #tpu.memory_space<vmem>>, vector<12x8xf32>
    %cst_9 = arith.constant dense<0.000000e+00> : vector<384x8xf32>
    %7 = tpu.matmul %5, %6, %cst_9 {dimension_numbers = #tpu.dot_dimension_numbers<[1], [0], [0], [1], [0, 0, 1, 1], [], []>} : vector<384x12xf32>, vector<12x8xf32>, vector<384x8xf32> -> vector<384x8xf32>
    %8 = arith.addf %3, %7 : vector<384x8xf32>
    %c0_10 = arith.constant 0 : index
    %c0_11 = arith.constant 0 : index
    %c32 = arith.constant 32 : index
    %c0_12 = arith.constant 0 : index
    %9 = vector.load %arg2[%c0_10, %c0_11, %c32, %c0_12] : memref<1x1x416x12xf32, #tpu.memory_space<vmem>>, vector<1x1x384x12xf32>
    %10 = vector.shape_cast %9 : vector<1x1x384x12xf32> to vector<384x12xf32>
    %c24 = arith.constant 24 : index
    %c0_13 = arith.constant 0 : index
    %11 = vector.load %arg3[%c24, %c0_13] : memref<36x8xf32, #tpu.memory_space<vmem>>, vector<12x8xf32>
    %cst_14 = arith.constant dense<0.000000e+00> : vector<384x8xf32>
    %12 = tpu.matmul %10, %11, %cst_14 {dimension_numbers = #tpu.dot_dimension_numbers<[1], [0], [0], [1], [0, 0, 1, 1], [], []>} : vector<384x12xf32>, vector<12x8xf32>, vector<384x8xf32> -> vector<384x8xf32>
    %13 = arith.addf %8, %12 : vector<384x8xf32>
    %c0_15 = arith.constant 0 : index
    %c0_16 = arith.constant 0 : index
    %14 = vector.load %arg4[%c0_15, %c0_16] : memref<1x8xf32, #tpu.memory_space<vmem>>, vector<1x8xf32>
    %15 = vector.broadcast %14 : vector<1x8xf32> to vector<384x8xf32>
    %16 = arith.addf %13, %15 : vector<384x8xf32>
    %cst_17 = arith.constant 0.000000e+00 : f32
    %17 = vector.broadcast %cst_17 : f32 to vector<384x8xf32>
    %18 = arith.maximumf %16, %17 : vector<384x8xf32>
    %19 = tpu.iota {dimensions = array<i32: 0>} : vector<384x1xi32>
    %c16_i32 = arith.constant 16 : i32
    %c0_i32 = arith.constant 0 : i32
    %20 = arith.cmpi eq, %c16_i32, %c0_i32 : i32
    %c1_i32 = arith.constant 1 : i32
    %21 = arith.select %20, %c1_i32, %c16_i32 : i32
    %22 = vector.broadcast %21 : i32 to vector<384x1xi32>
    %23 = arith.remsi %19, %22 : vector<384x1xi32>
    %c0_i32_18 = arith.constant 0 : i32
    %24 = vector.broadcast %c0_i32_18 : i32 to vector<384x1xi32>
    %25 = arith.cmpi ne, %23, %24 : vector<384x1xi32>
    %c0_i32_19 = arith.constant 0 : i32
    %26 = vector.broadcast %c0_i32_19 : i32 to vector<384x1xi32>
    %27 = arith.cmpi slt, %23, %26 : vector<384x1xi32>
    %c0_i32_20 = arith.constant 0 : i32
    %28 = arith.cmpi slt, %21, %c0_i32_20 : i32
    %29 = vector.broadcast %28 : i1 to vector<384x1xi1>
    %30 = vector.broadcast %29 : vector<384x1xi1> to vector<384x1xi1>
    %31 = arith.xori %27, %30 : vector<384x1xi1>
    %32 = arith.andi %31, %25 : vector<384x1xi1>
    %33 = vector.broadcast %21 : i32 to vector<384x1xi32>
    %34 = arith.addi %23, %33 : vector<384x1xi32>
    %35 = arith.select %32, %34, %23 : vector<384x1xi1>, vector<384x1xi32>
    %cst_21 = arith.constant 0.000000e+00 : f32
    %36 = vector.broadcast %cst_21 : f32 to vector<384x8xf32>
    %c15_i32 = arith.constant 15 : i32
    %37 = vector.broadcast %c15_i32 : i32 to vector<384x1xi32>
    %38 = arith.cmpi eq, %35, %37 : vector<384x1xi32>
    %39 = vector.shape_cast %38 : vector<384x1xi1> to vector<384x1xi1>
    %40 = vector.broadcast %39 : vector<384x1xi1> to vector<384x8xi1>
    %41 = arith.select %40, %36, %18 : vector<384x8xi1>, vector<384x8xf32>
    %c0_i32_22 = arith.constant 0 : i32
    %42 = vector.broadcast %c0_i32_22 : i32 to vector<384x1xi32>
    %43 = arith.cmpi eq, %35, %42 : vector<384x1xi32>
    %44 = vector.shape_cast %43 : vector<384x1xi1> to vector<384x1xi1>
    %45 = vector.broadcast %44 : vector<384x1xi1> to vector<384x8xi1>
    %46 = arith.select %45, %36, %18 : vector<384x8xi1>, vector<384x8xf32>
    %cst_23 = arith.constant 0.000000e+00 : f32
    %47 = vector.broadcast %cst_23 : f32 to vector<40x24xf32>
    %c384 = arith.constant 384 : index
    %c0_24 = arith.constant 0 : index
    %48 = vector.load %arg10[%c384, %c0_24] : memref<424x24xf32, #tpu.memory_space<vmem>>, vector<40x24xf32>
    tpu.vector_store %arg10[%c384, %c0_24], %47 {strides = array<i32>} : memref<424x24xf32, #tpu.memory_space<vmem>>, vector<40x24xf32>,
    %c1 = arith.constant 1 : index
    %c8 = arith.constant 8 : index
    %49 = vector.load %arg10[%c1, %c8] : memref<424x24xf32, #tpu.memory_space<vmem>>, vector<384x8xf32>
    tpu.vector_store %arg10[%c1, %c8], %18 {strides = array<i32>} : memref<424x24xf32, #tpu.memory_space<vmem>>, vector<384x8xf32>,
    %c2 = arith.constant 2 : index
    %c0_25 = arith.constant 0 : index
    %50 = vector.load %arg10[%c2, %c0_25] : memref<424x24xf32, #tpu.memory_space<vmem>>, vector<384x8xf32>
    tpu.vector_store %arg10[%c2, %c0_25], %41 {strides = array<i32>} : memref<424x24xf32, #tpu.memory_space<vmem>>, vector<384x8xf32>,
    %c0_26 = arith.constant 0 : index
    %c16_27 = arith.constant 16 : index
    %51 = vector.load %arg10[%c0_26, %c16_27] : memref<424x24xf32, #tpu.memory_space<vmem>>, vector<384x8xf32>
    tpu.vector_store %arg10[%c0_26, %c16_27], %46 {strides = array<i32>} : memref<424x24xf32, #tpu.memory_space<vmem>>, vector<384x8xf32>,
    %cst_28 = arith.constant 0.000000e+00 : f32
    %52 = vector.broadcast %cst_28 : f32 to vector<1x8xf32>
    %c1_29 = arith.constant 1 : index
    %c0_30 = arith.constant 0 : index
    %53 = vector.load %arg10[%c1_29, %c0_30] : memref<424x24xf32, #tpu.memory_space<vmem>>, vector<1x8xf32>
    tpu.vector_store %arg10[%c1_29, %c0_30], %52 {strides = array<i32>} : memref<424x24xf32, #tpu.memory_space<vmem>>, vector<1x8xf32>,
    %c0_i32_31 = arith.constant 0 : i32
    %54 = arith.cmpi eq, %arg1, %c0_i32_31 : i32
    %55 = arith.extui %54 : i1 to i32
    %c0_i32_32 = arith.constant 0 : i32
    %56 = arith.cmpi ne, %55, %c0_i32_32 : i32
    scf.if %56 {
      %cst_66 = arith.constant 0.000000e+00 : f32
      %92 = vector.broadcast %cst_66 : f32 to vector<16x24xf32>
      %c1_67 = arith.constant 1 : index
      %c0_68 = arith.constant 0 : index
      %93 = vector.load %arg10[%c1_67, %c0_68] : memref<424x24xf32, #tpu.memory_space<vmem>>, vector<16x24xf32>
      tpu.vector_store %arg10[%c1_67, %c0_68], %92 {strides = array<i32>} : memref<424x24xf32, #tpu.memory_space<vmem>>, vector<16x24xf32>,
      %cst_69 = arith.constant 0.000000e+00 : f32
      %94 = vector.broadcast %cst_69 : f32 to vector<16x24xf32>
      %c193 = arith.constant 193 : index
      %c0_70 = arith.constant 0 : index
      %95 = vector.load %arg10[%c193, %c0_70] : memref<424x24xf32, #tpu.memory_space<vmem>>, vector<16x24xf32>
      tpu.vector_store %arg10[%c193, %c0_70], %94 {strides = array<i32>} : memref<424x24xf32, #tpu.memory_space<vmem>>, vector<16x24xf32>,
    } else {
    }
    %c1_i32_33 = arith.constant 1 : i32
    %57 = arith.cmpi eq, %arg1, %c1_i32_33 : i32
    %58 = arith.extui %57 : i1 to i32
    %c0_i32_34 = arith.constant 0 : i32
    %59 = arith.cmpi ne, %58, %c0_i32_34 : i32
    scf.if %59 {
      %cst_66 = arith.constant 0.000000e+00 : f32
      %92 = vector.broadcast %cst_66 : f32 to vector<16x24xf32>
      %c145 = arith.constant 145 : index
      %c0_67 = arith.constant 0 : index
      %93 = vector.load %arg10[%c145, %c0_67] : memref<424x24xf32, #tpu.memory_space<vmem>>, vector<16x24xf32>
      tpu.vector_store %arg10[%c145, %c0_67], %92 {strides = array<i32>} : memref<424x24xf32, #tpu.memory_space<vmem>>, vector<16x24xf32>,
      %cst_68 = arith.constant 0.000000e+00 : f32
      %94 = vector.broadcast %cst_68 : f32 to vector<16x24xf32>
      %c337 = arith.constant 337 : index
      %c0_69 = arith.constant 0 : index
      %95 = vector.load %arg10[%c337, %c0_69] : memref<424x24xf32, #tpu.memory_space<vmem>>, vector<16x24xf32>
      tpu.vector_store %arg10[%c337, %c0_69], %94 {strides = array<i32>} : memref<424x24xf32, #tpu.memory_space<vmem>>, vector<16x24xf32>,
    } else {
    }
    %c1_35 = arith.constant 1 : index
    %c0_36 = arith.constant 0 : index
    %60 = vector.load %arg10[%c1_35, %c0_36] : memref<424x24xf32, #tpu.memory_space<vmem>>, vector<384x24xf32>
    %c0_37 = arith.constant 0 : index
    %c0_38 = arith.constant 0 : index
    %61 = vector.load %arg5[%c0_37, %c0_38] : memref<72x8xf32, #tpu.memory_space<vmem>>, vector<24x8xf32>
    %cst_39 = arith.constant dense<0.000000e+00> : vector<384x8xf32>
    %62 = tpu.matmul %60, %61, %cst_39 {dimension_numbers = #tpu.dot_dimension_numbers<[1], [0], [0], [1], [0, 0, 1, 1], [], []>} : vector<384x24xf32>, vector<24x8xf32>, vector<384x8xf32> -> vector<384x8xf32>
    %c17 = arith.constant 17 : index
    %c0_40 = arith.constant 0 : index
    %63 = vector.load %arg10[%c17, %c0_40] : memref<424x24xf32, #tpu.memory_space<vmem>>, vector<384x24xf32>
    %c24_41 = arith.constant 24 : index
    %c0_42 = arith.constant 0 : index
    %64 = vector.load %arg5[%c24_41, %c0_42] : memref<72x8xf32, #tpu.memory_space<vmem>>, vector<24x8xf32>
    %cst_43 = arith.constant dense<0.000000e+00> : vector<384x8xf32>
    %65 = tpu.matmul %63, %64, %cst_43 {dimension_numbers = #tpu.dot_dimension_numbers<[1], [0], [0], [1], [0, 0, 1, 1], [], []>} : vector<384x24xf32>, vector<24x8xf32>, vector<384x8xf32> -> vector<384x8xf32>
    %66 = arith.addf %62, %65 : vector<384x8xf32>
    %c33 = arith.constant 33 : index
    %c0_44 = arith.constant 0 : index
    %67 = vector.load %arg10[%c33, %c0_44] : memref<424x24xf32, #tpu.memory_space<vmem>>, vector<384x24xf32>
    %c48 = arith.constant 48 : index
    %c0_45 = arith.constant 0 : index
    %68 = vector.load %arg5[%c48, %c0_45] : memref<72x8xf32, #tpu.memory_space<vmem>>, vector<24x8xf32>
    %cst_46 = arith.constant dense<0.000000e+00> : vector<384x8xf32>
    %69 = tpu.matmul %67, %68, %cst_46 {dimension_numbers = #tpu.dot_dimension_numbers<[1], [0], [0], [1], [0, 0, 1, 1], [], []>} : vector<384x24xf32>, vector<24x8xf32>, vector<384x8xf32> -> vector<384x8xf32>
    %70 = arith.addf %66, %69 : vector<384x8xf32>
    %c0_47 = arith.constant 0 : index
    %c0_48 = arith.constant 0 : index
    %c32_49 = arith.constant 32 : index
    %c0_50 = arith.constant 0 : index
    %71 = vector.load %arg2[%c0_47, %c0_48, %c32_49, %c0_50] : memref<1x1x416x12xf32, #tpu.memory_space<vmem>>, vector<1x1x384x12xf32>
    %72 = vector.shape_cast %71 : vector<1x1x384x12xf32> to vector<384x12xf32>
    %c0_51 = arith.constant 0 : index
    %c0_52 = arith.constant 0 : index
    %73 = vector.load %arg7[%c0_51, %c0_52] : memref<12x8xf32, #tpu.memory_space<vmem>>, vector<12x8xf32>
    %cst_53 = arith.constant dense<0.000000e+00> : vector<384x8xf32>
    %74 = tpu.matmul %72, %73, %cst_53 {dimension_numbers = #tpu.dot_dimension_numbers<[1], [0], [0], [1], [0, 0, 1, 1], [], []>} : vector<384x12xf32>, vector<12x8xf32>, vector<384x8xf32> -> vector<384x8xf32>
    %c0_54 = arith.constant 0 : index
    %c0_55 = arith.constant 0 : index
    %75 = vector.load %arg6[%c0_54, %c0_55] : memref<1x8xf32, #tpu.memory_space<vmem>>, vector<1x8xf32>
    %76 = vector.broadcast %75 : vector<1x8xf32> to vector<384x8xf32>
    %77 = arith.addf %70, %76 : vector<384x8xf32>
    %78 = arith.addf %77, %74 : vector<384x8xf32>
    %c0_56 = arith.constant 0 : index
    %c0_57 = arith.constant 0 : index
    %79 = vector.load %arg8[%c0_56, %c0_57] : memref<1x8xf32, #tpu.memory_space<vmem>>, vector<1x8xf32>
    %80 = vector.broadcast %79 : vector<1x8xf32> to vector<384x8xf32>
    %81 = arith.addf %78, %80 : vector<384x8xf32>
    %cst_58 = arith.constant 0.000000e+00 : f32
    %82 = vector.broadcast %cst_58 : f32 to vector<384x8xf32>
    %83 = arith.maximumf %81, %82 : vector<384x8xf32>
    %84 = vector.extract_strided_slice %83 {offsets = [0, 0], sizes = [128, 8], strides = [1, 1]} : vector<384x8xf32> to vector<128x8xf32>
    %c0_59 = arith.constant 0 : index
    %c0_60 = arith.constant 0 : index
    %c0_61 = arith.constant 0 : index
    %c0_62 = arith.constant 0 : index
    %85 = vector.load %arg9[%c0_59, %c0_60, %c0_61, %c0_62] : memref<1x1x256x8xf32, #tpu.memory_space<vmem>>, vector<1x1x128x8xf32>
    %86 = vector.shape_cast %85 : vector<1x1x128x8xf32> to vector<128x8xf32>
    %87 = vector.shape_cast %84 : vector<128x8xf32> to vector<1x1x128x8xf32>
    tpu.vector_store %arg9[%c0_59, %c0_60, %c0_61, %c0_62], %87 {strides = array<i32>} : memref<1x1x256x8xf32, #tpu.memory_space<vmem>>, vector<1x1x128x8xf32>,
    %88 = vector.extract_strided_slice %83 {offsets = [192, 0], sizes = [128, 8], strides = [1, 1]} : vector<384x8xf32> to vector<128x8xf32>
    %c0_63 = arith.constant 0 : index
    %c0_64 = arith.constant 0 : index
    %c128 = arith.constant 128 : index
    %c0_65 = arith.constant 0 : index
    %89 = vector.load %arg9[%c0_63, %c0_64, %c128, %c0_65] : memref<1x1x256x8xf32, #tpu.memory_space<vmem>>, vector<1x1x128x8xf32>
    %90 = vector.shape_cast %89 : vector<1x1x128x8xf32> to vector<128x8xf32>
    %91 = vector.shape_cast %88 : vector<128x8xf32> to vector<1x1x128x8xf32>
    tpu.vector_store %arg9[%c0_63, %c0_64, %c128, %c0_65], %91 {strides = array<i32>} : memref<1x1x256x8xf32, #tpu.memory_space<vmem>>, vector<1x1x128x8xf32>,
    return
  }
  func.func @transform_0(%arg0: i32, %arg1: i32) -> (i32, i32, i32, i32) {
    %c0_i32 = arith.constant 0 : i32
    %c0_i32_0 = arith.constant 0 : i32
    %c0_i32_1 = arith.constant 0 : i32
    return %arg0, %arg1, %c0_i32, %c0_i32_0 : i32, i32, i32, i32
  }
  func.func @transform_1(%arg0: i32, %arg1: i32) -> (i32, i32) {
    %c0_i32 = arith.constant 0 : i32
    %c0_i32_0 = arith.constant 0 : i32
    %c0_i32_1 = arith.constant 0 : i32
    return %c0_i32, %c0_i32_0 : i32, i32
  }
  func.func @transform_2(%arg0: i32, %arg1: i32) -> (i32, i32) {
    %c0_i32 = arith.constant 0 : i32
    %c0_i32_0 = arith.constant 0 : i32
    %c0_i32_1 = arith.constant 0 : i32
    return %c0_i32, %c0_i32_0 : i32, i32
  }
  func.func @transform_3(%arg0: i32, %arg1: i32) -> (i32, i32) {
    %c0_i32 = arith.constant 0 : i32
    %c0_i32_0 = arith.constant 0 : i32
    %c0_i32_1 = arith.constant 0 : i32
    return %c0_i32, %c0_i32_0 : i32, i32
  }
  func.func @transform_4(%arg0: i32, %arg1: i32) -> (i32, i32) {
    %c0_i32 = arith.constant 0 : i32
    %c0_i32_0 = arith.constant 0 : i32
    %c0_i32_1 = arith.constant 0 : i32
    return %c0_i32, %c0_i32_0 : i32, i32
  }
  func.func @transform_5(%arg0: i32, %arg1: i32) -> (i32, i32) {
    %c0_i32 = arith.constant 0 : i32
    %c0_i32_0 = arith.constant 0 : i32
    %c0_i32_1 = arith.constant 0 : i32
    return %c0_i32, %c0_i32_0 : i32, i32
  }
  func.func @transform_6(%arg0: i32, %arg1: i32) -> (i32, i32) {
    %c0_i32 = arith.constant 0 : i32
    %c0_i32_0 = arith.constant 0 : i32
    %c0_i32_1 = arith.constant 0 : i32
    return %c0_i32, %c0_i32_0 : i32, i32
  }
  func.func @transform_7(%arg0: i32, %arg1: i32) -> (i32, i32, i32, i32) {
    %c0_i32 = arith.constant 0 : i32
    %c0_i32_0 = arith.constant 0 : i32
    %c0_i32_1 = arith.constant 0 : i32
    return %arg0, %arg1, %c0_i32, %c0_i32_0 : i32, i32, i32, i32
  }
}

</mosaic_0001>

<bundles_post_ra>
// kernel: tpu_custom_call.1
= control target key start
LH: loop header
LB: loop body
LE: loop exit
PB: predicated region body
PF: predicated region fallthrough
CT: control target
= control target key end

     0   :  { %s6757_s24 = smov 0   ;;  %s6759_s25 = smov 0   ;;  %s8812_s0 = inlined_call_operand.vmem [shape: f32[1,2,416,12], index: 0, kind: input, shape index: {}]   ;;  %s8813_s1 = inlined_call_operand.vmem [shape: f32[36,8], index: 1, kind: input, shape index: {}]   ;;  %s8814_s2 = inlined_call_operand.vmem [shape: f32[1,8], index: 2, kind: input, shape index: {}]   ;;  %s8815_s3 = inlined_call_operand.vmem [shape: f32[72,8], index: 3, kind: input, shape index: {}]   ;;  %s8816_s4 = inlined_call_operand.vmem [shape: f32[1,8], index: 4, kind: input, shape index: {}]   ;;  %s8817_s5 = inlined_call_operand.vmem [shape: f32[12,8], index: 5, kind: input, shape index: {}]   ;;  %s8818_s6 = inlined_call_operand.vmem [shape: f32[1,8], index: 6, kind: input, shape index: {}]   ;;  %s8819_s7 = inlined_call_operand.vmem [shape: f32[1,2,256,8], index: 7, kind: output, shape index: {}]  }
   0x1   :  { %s6761_s26 = smov 0  }
   0x2 LB: > { %s26_s27 = sadd.s32 1, %s6706_s25  ;;  %p5410_p0 = scmp.ge.s32.totalorder %s6710_s26, 1  ;;  %s6710_s26 = sphi %s6761_s26, %s17_s26   ;;  %s6706_s25 = sphi %s6759_s25, %s8864_s25   ;;  %s6702_s24 = sphi %s6757_s24, %s8863_s24  }
   0x3   : > { %p27_p1 = scmp.ge.s32.totalorder %s26_s27, 2  ;;  %p257_p2 = scmp.lt.s32.totalorder %s6710_s26, 3 }
   0x5   : > { %s8866_s27 = smov (%p27_p1, %s26_s27), 0  ;;  %p258_p3 = pnand %p5410_p0, %p257_p2 }
   0x7   : > { %261 = sbr.rel (%p258_p3) target bundleno = 979 (0x3d3), region = 48 }
   0xc   : > { %v368_v0 = vld [vmem:[%s8813_s1 + $0x14] sm:$0xf]  ;;  %vm514_vm0 = vcmask 1043456   ;;  %v367_v1 = vld [vmem:[%s8813_s1 + $0xc] sm:$0xff]  ;;  %p299_p4 = scmp.lt.s32.totalorder %s6702_s24, 1  ;;  %vm369_vm1 = vcmask 97280  }
   0xd   : > { %6653 = vmatprep.subr.msk.mxu1 %vm514_vm0, %v368_v0  ;;  %6115 = vmatprep.subr.msk.mxu0 %vm514_vm0, %v368_v0  ;;  %v364_v2 = vld [vmem:[%s8813_s1 + $0x8] sm:$0xf]  ;;  %v1186_v3 = vld [vmem:[%s8813_s1 + $0x20] sm:$0xf]  ;;  %v1185_v11 = vld [vmem:[%s8813_s1 + $0x18] sm:$0xff]  ;;  %s6713_s10 = smov 8  }
   0xe   : > { %6655 = vmatpush3.msk.msra.mxu1 %vm514_vm0, %v368_v0  ;;  %6116 = vmatpush3.msk.msra.mxu0 %vm514_vm0, %v368_v0  ;;  %s300_s9 = scalar_select %p299_p4, %s6702_s24, 1  ;;  %v363_v10 = vld [vmem:[%s8813_s1] sm:$0xff] }
   0xf   : > { %6654 = vmatprep.subr.mxu1 %v367_v1  ;;  %6117 = vmatprep.subr.mxu0 %v367_v1  ;;  %p5562_p5 = scmp.ne.s32.totalorder %s6702_s24, 0 }
  0x10   : > { %6656 = vmatpush3.msra.mxu1 %v367_v1  ;;  %6118 = vmatpush3.msra.mxu0 %v367_v1  ;;  %s6657_s14 = smul.u32 416, %s300_s9  ;;  %s5761_s15 = sshll.u32 %s300_s9, 8 }
  0x11   : > { %s6798_s18 = scalar_lea.vmem %s8819_s7, %s5761_s15  ;;  %6191 = vmatprep.subr.msk.mxu1 %vm514_vm0, %v364_v2  ;;  %6267 = vmatprep.subr.msk.mxu0 %vm514_vm0, %v1186_v3  ;;  %s6712_s9 = smov 16  }
  0x12   : > { %s6805_s21 = scalar_lea.vmem %s8812_s0, %s6657_s14 }
  0x13   : > { %v6808_v4 = vld [vmem:[%s6805_s21 + $0x10] sm:$0xff]  ;;  %v6814_v6 = vld [vmem:[%s6805_s21 + $0x18] sm:$0xff]  ;;  %v6824_v8 = vld [vmem:[%s6805_s21 + $0x20] sm:$0xff] }
  0x14   : > { %v6811_v5 = vld [vmem:[%s6805_s21 + $0xd0] sm:$0xff]  ;;  %6119 = vmatprep.mubr.msk.f32.mxu0 %vm369_vm1, %v6808_v4  ;;  %v6821_v7 = vld [vmem:[%s6805_s21 + $0xd8] sm:$0xff]  ;;  %v6827_v9 = vld [vmem:[%s6805_s21 + $0xe0] sm:$0xff] }
  0x15   : > { %6155 = vmatprep.mubr.msk.f32.mxu1 %vm369_vm1, %v6811_v5  ;;  %6120 = vmatmul.mubr.msk.f32.vlgmr.msra.gmra.mxu0 %vm369_vm1, %v6814_v6  ;;  %v6842_v12 = vld [vmem:[%s6805_s21 + $0x28] sm:$0xff]  ;;  %v6852_v14 = vld [vmem:[%s6805_s21 + $0x30] sm:$0xff]  ;;  %v6866_v16 = vld [vmem:[%s6805_s21 + $0x38] sm:$0xff] }
  0x16   : > { %6156 = vmatmul.mubr.msk.f32.vlgmr.msra.gmra.mxu1 %vm369_vm1, %v6821_v7  ;;  %6268 = vmatpush3.msk.msra.mxu0 %vm514_vm0, %v1186_v3  ;;  %v6845_v13 = vld [vmem:[%s6805_s21 + $0xe8] sm:$0xff]  ;;  %v6855_v15 = vld [vmem:[%s6805_s21 + $0xf0] sm:$0xff]  ;;  %v6869_v17 = vld [vmem:[%s6805_s21 + $0xf8] sm:$0xff] }
  0x17   : > { %6192 = vmatpush3.msk.msra.mxu1 %vm514_vm0, %v364_v2  ;;  %6122 = vmatprep.mubr.msk.f32.mxu0 %vm369_vm1, %v6824_v8  ;;  %v6872_v18 = vld [vmem:[%s6805_s21 + $0x40] sm:$0xff]  ;;  %v6886_v20 = vld [vmem:[%s6805_s21 + $0x48] sm:$0xff]  ;;  %v6892_v22 = vld [vmem:[%s6805_s21 + $0x50] sm:$0xff] }
  0x18   : > { %6158 = vmatprep.mubr.msk.f32.mxu1 %vm369_vm1, %v6827_v9  ;;  %6193 = vmatprep.subr.mxu1 %v363_v10  ;;  %v6875_v19 = vld [vmem:[%s6805_s21 + $0x100] sm:$0xff]  ;;  %v6889_v21 = vld [vmem:[%s6805_s21 + $0x108] sm:$0xff]  ;;  %v6895_v23 = vld [vmem:[%s6805_s21 + $0x110] sm:$0xff] }
  0x19   : > { %6269 = vmatprep.subr.mxu0 %v1185_v11  ;;  %6123 = vmatmul.mubr.msk.f32.gmra.mxu0 %vm369_vm1, %v6842_v12  ;;  %v6906_v24 = vld [vmem:[%s6805_s21 + $0x58] sm:$0xff]  ;;  %v6912_v26 = vld [vmem:[%s6805_s21 + $0x60] sm:$0xff]  ;;  %v6926_v28 = vld [vmem:[%s6805_s21 + $0x68] sm:$0xff] }
  0x1a   : > { %6159 = vmatmul.mubr.msk.f32.gmra.mxu1 %vm369_vm1, %v6845_v13  ;;  %6125 = vmatprep.mubr.msk.f32.mxu0 %vm369_vm1, %v6852_v14  ;;  %v6909_v25 = vld [vmem:[%s6805_s21 + $0x118] sm:$0xff]  ;;  %v6915_v27 = vld [vmem:[%s6805_s21 + $0x120] sm:$0xff]  ;;  %v6929_v29 = vld [vmem:[%s6805_s21 + $0x128] sm:$0xff] }
  0x1b   : > { %6161 = vmatprep.mubr.msk.f32.mxu1 %vm369_vm1, %v6855_v15  ;;  %6194 = vmatpush3.msra.mxu1 %v363_v10  ;;  %v6932_v30 = vld [vmem:[%s6805_s21 + $0x70] sm:$0xff]  ;;  %v6946_v32 = vld [vmem:[%s6805_s21 + $0x78] sm:$0xff]  ;;  %v6952_v34 = vld [vmem:[%s6805_s21 + $0x80] sm:$0xff] }
  0x1c   : > { %6270 = vmatpush3.msra.mxu0 %v1185_v11  ;;  %v6935_v31 = vld [vmem:[%s6805_s21 + $0x130] sm:$0xff]  ;;  %v6949_v33 = vld [vmem:[%s6805_s21 + $0x138] sm:$0xff]  ;;  %v6955_v35 = vld [vmem:[%s6805_s21 + $0x140] sm:$0xff] }
  0x1d   : > { %6126 = vmatmul.mubr.msk.f32.gmra.mxu0 %vm369_vm1, %v6866_v16  ;;  %v6966_v36 = vld [vmem:[%s6805_s21 + $0x88] sm:$0xff]  ;;  %v6972_v38 = vld [vmem:[%s6805_s21 + $0x90] sm:$0xff]  ;;  %v6986_v40 = vld [vmem:[%s6805_s21 + $0x98] sm:$0xff] }
  0x1e   : > { %6162 = vmatmul.mubr.msk.f32.gmra.mxu1 %vm369_vm1, %v6869_v17  ;;  %6128 = vmatprep.mubr.msk.f32.mxu0 %vm369_vm1, %v6872_v18  ;;  %v6969_v37 = vld [vmem:[%s6805_s21 + $0x148] sm:$0xff]  ;;  %v6975_v39 = vld [vmem:[%s6805_s21 + $0x150] sm:$0xff]  ;;  %v6989_v41 = vld [vmem:[%s6805_s21 + $0x158] sm:$0xff] }
  0x1f   : > { %6164 = vmatprep.mubr.msk.f32.mxu1 %vm369_vm1, %v6875_v19  ;;  %v6992_v42 = vld [vmem:[%s6805_s21 + $0xa0] sm:$0xff]  ;;  %v7006_v44 = vld [vmem:[%s6805_s21 + $0xa8] sm:$0xff]  ;;  %v7012_v46 = vld [vmem:[%s6805_s21 + $0xb0] sm:$0xff] }
  0x20   : > { %v6995_v43 = vld [vmem:[%s6805_s21 + $0x160] sm:$0xff]  ;;  %v7009_v45 = vld [vmem:[%s6805_s21 + $0x168] sm:$0xff]  ;;  %v7015_v47 = vld [vmem:[%s6805_s21 + $0x170] sm:$0xff] }
  0x21   : > { %6129 = vmatmul.mubr.msk.f32.gmra.mxu0 %vm369_vm1, %v6886_v20  ;;  %v338_v48 = vld [vmem:[%s6805_s21 + $0xb8] sm:$0xff]  ;;  %v339_v50 = vld [vmem:[%s6805_s21 + $0xc0] sm:$0xff]  ;;  %v340_v52 = vld [vmem:[%s6805_s21 + $0xc8] sm:$0xff] }
  0x22   : > { %6165 = vmatmul.mubr.msk.f32.gmra.mxu1 %vm369_vm1, %v6889_v21  ;;  %6131 = vmatprep.mubr.msk.f32.mxu0 %vm369_vm1, %v6892_v22  ;;  %v7027_v49 = vld [vmem:[%s6805_s21 + $0x178] sm:$0xff]  ;;  %v7031_v51 = vld [vmem:[%s6805_s21 + $0x180] sm:$0xff]  ;;  %v7041_v53 = vld [vmem:[%s6805_s21 + $0x188] sm:$0xff] }
  0x23   : > { %6167 = vmatprep.mubr.msk.f32.mxu1 %vm369_vm1, %v6895_v23  ;;  %v315_v54 = vld [vmem:[%s6805_s21] sm:$0xff]  ;;  %v316_v55 = vld [vmem:[%s6805_s21 + $0x8] sm:$0xff]  ;;  %v1183_v56 = vld [vmem:[%s6805_s21 + $0x190] sm:$0xff] }
  0x24   : > { %v1184_v57 = vld [vmem:[%s6805_s21 + $0x198] sm:$0xff] }
  0x25   : > { %6132 = vmatmul.mubr.msk.f32.gmra.mxu0 %vm369_vm1, %v6906_v24 }
  0x26   : > { %6168 = vmatmul.mubr.msk.f32.gmra.mxu1 %vm369_vm1, %v6909_v25  ;;  %6134 = vmatprep.mubr.msk.f32.mxu0 %vm369_vm1, %v6912_v26 }
  0x27   : > { %6170 = vmatprep.mubr.msk.f32.mxu1 %vm369_vm1, %v6915_v27 }
  0x29   : > { %6135 = vmatmul.mubr.msk.f32.gmra.mxu0 %vm369_vm1, %v6926_v28 }
  0x2a   : > { %6171 = vmatmul.mubr.msk.f32.gmra.mxu1 %vm369_vm1, %v6929_v29  ;;  %6137 = vmatprep.mubr.msk.f32.mxu0 %vm369_vm1, %v6932_v30 }
  0x2b   : > { %6173 = vmatprep.mubr.msk.f32.mxu1 %vm369_vm1, %v6935_v31 }
  0x2d   : > { %6138 = vmatmul.mubr.msk.f32.gmra.mxu0 %vm369_vm1, %v6946_v32 }
  0x2e   : > { %6174 = vmatmul.mubr.msk.f32.gmra.mxu1 %vm369_vm1, %v6949_v33  ;;  %6140 = vmatprep.mubr.msk.f32.mxu0 %vm369_vm1, %v6952_v34 }
  0x2f   : > { %6176 = vmatprep.mubr.msk.f32.mxu1 %vm369_vm1, %v6955_v35 }
  0x31   : > { %6141 = vmatmul.mubr.msk.f32.gmra.mxu0 %vm369_vm1, %v6966_v36 }
  0x32   : > { %6177 = vmatmul.mubr.msk.f32.gmra.mxu1 %vm369_vm1, %v6969_v37  ;;  %6143 = vmatprep.mubr.msk.f32.mxu0 %vm369_vm1, %v6972_v38 }
  0x33   : > { %6179 = vmatprep.mubr.msk.f32.mxu1 %vm369_vm1, %v6975_v39 }
  0x35   : > { %6144 = vmatmul.mubr.msk.f32.gmra.mxu0 %vm369_vm1, %v6986_v40 }
  0x36   : > { %6180 = vmatmul.mubr.msk.f32.gmra.mxu1 %vm369_vm1, %v6989_v41  ;;  %6146 = vmatprep.mubr.msk.f32.mxu0 %vm369_vm1, %v6992_v42 }
  0x37   : > { %6182 = vmatprep.mubr.msk.f32.mxu1 %vm369_vm1, %v6995_v43 }
  0x39   : > { %6147 = vmatmul.mubr.msk.f32.gmra.mxu0 %vm369_vm1, %v7006_v44 }
  0x3a   : > { %6183 = vmatmul.mubr.msk.f32.gmra.mxu1 %vm369_vm1, %v7009_v45  ;;  %6149 = vmatprep.mubr.msk.f32.mxu0 %vm369_vm1, %v7012_v46 }
  0x3b   : > { %6185 = vmatprep.mubr.msk.f32.mxu1 %vm369_vm1, %v7015_v47 }
  0x3d   : > { %6150 = vmatmul.mubr.msk.f32.gmra.mxu0 %vm369_vm1, %v338_v48 }
  0x3e   : > { %6186 = vmatmul.mubr.msk.f32.gmra.mxu1 %vm369_vm1, %v7027_v49  ;;  %6152 = vmatprep.mubr.msk.f32.mxu0 %vm369_vm1, %v339_v50 }
  0x3f   : > { %6188 = vmatprep.mubr.msk.f32.mxu1 %vm369_vm1, %v7031_v51 }
  0x41   : > { %6153 = vmatmul.mubr.msk.f32.gmra.mxu0 %vm369_vm1, %v340_v52 }
  0x42   : > { %6189 = vmatmul.mubr.msk.f32.gmra.mxu1 %vm369_vm1, %v7041_v53  ;;  %6271 = vmatprep.mubr.msk.f32.mxu0 %vm369_vm1, %v6824_v8 }
  0x43   : > { %6195 = vmatprep.mubr.msk.f32.mxu1 %vm369_vm1, %v315_v54 }
  0x45   : > { %6272 = vmatmul.mubr.msk.f32.vlgmr.msra.gmra.mxu0 %vm369_vm1, %v6842_v12 }
  0x46   : > { %6196 = vmatmul.mubr.msk.f32.vlgmr.msra.gmra.mxu1 %vm369_vm1, %v316_v55  ;;  %6274 = vmatprep.mubr.msk.f32.mxu0 %vm369_vm1, %v6852_v14 }
  0x47   : > { %6198 = vmatprep.mubr.msk.f32.mxu1 %vm369_vm1, %v6808_v4 }
  0x49   : > { %6275 = vmatmul.mubr.msk.f32.gmra.mxu0 %vm369_vm1, %v6866_v16 }
  0x4a   : > { %6199 = vmatmul.mubr.msk.f32.gmra.mxu1 %vm369_vm1, %v6814_v6  ;;  %6277 = vmatprep.mubr.msk.f32.mxu0 %vm369_vm1, %v6872_v18 }
  0x4b   : > { %6201 = vmatprep.mubr.msk.f32.mxu1 %vm369_vm1, %v6824_v8 }
  0x4d   : > { %6278 = vmatmul.mubr.msk.f32.gmra.mxu0 %vm369_vm1, %v6886_v20 }
  0x4e   : > { %6202 = vmatmul.mubr.msk.f32.gmra.mxu1 %vm369_vm1, %v6842_v12  ;;  %6280 = vmatprep.mubr.msk.f32.mxu0 %vm369_vm1, %v6892_v22 }
  0x4f   : > { %6204 = vmatprep.mubr.msk.f32.mxu1 %vm369_vm1, %v6852_v14 }
  0x51   : > { %6281 = vmatmul.mubr.msk.f32.gmra.mxu0 %vm369_vm1, %v6906_v24 }
  0x52   : > { %6205 = vmatmul.mubr.msk.f32.gmra.mxu1 %vm369_vm1, %v6866_v16  ;;  %6283 = vmatprep.mubr.msk.f32.mxu0 %vm369_vm1, %v6912_v26 }
  0x53   : > { %6207 = vmatprep.mubr.msk.f32.mxu1 %vm369_vm1, %v6872_v18 }
  0x55   : > { %6284 = vmatmul.mubr.msk.f32.gmra.mxu0 %vm369_vm1, %v6926_v28 }
  0x56   : > { %6208 = vmatmul.mubr.msk.f32.gmra.mxu1 %vm369_vm1, %v6886_v20  ;;  %6286 = vmatprep.mubr.msk.f32.mxu0 %vm369_vm1, %v6932_v30 }
  0x57   : > { %6210 = vmatprep.mubr.msk.f32.mxu1 %vm369_vm1, %v6892_v22 }
  0x59   : > { %6287 = vmatmul.mubr.msk.f32.gmra.mxu0 %vm369_vm1, %v6946_v32 }
  0x5a   : > { %6211 = vmatmul.mubr.msk.f32.gmra.mxu1 %vm369_vm1, %v6906_v24  ;;  %6289 = vmatprep.mubr.msk.f32.mxu0 %vm369_vm1, %v6952_v34 }
  0x5b   : > { %6213 = vmatprep.mubr.msk.f32.mxu1 %vm369_vm1, %v6912_v26 }
  0x5d   : > { %6290 = vmatmul.mubr.msk.f32.gmra.mxu0 %vm369_vm1, %v6966_v36 }
  0x5e   : > { %6214 = vmatmul.mubr.msk.f32.gmra.mxu1 %vm369_vm1, %v6926_v28  ;;  %6292 = vmatprep.mubr.msk.f32.mxu0 %vm369_vm1, %v6972_v38 }
  0x5f   : > { %6216 = vmatprep.mubr.msk.f32.mxu1 %vm369_vm1, %v6932_v30 }
  0x61   : > { %6293 = vmatmul.mubr.msk.f32.gmra.mxu0 %vm369_vm1, %v6986_v40 }
  0x62   : > { %6217 = vmatmul.mubr.msk.f32.gmra.mxu1 %vm369_vm1, %v6946_v32  ;;  %6295 = vmatprep.mubr.msk.f32.mxu0 %vm369_vm1, %v6992_v42 }
  0x63   : > { %6219 = vmatprep.mubr.msk.f32.mxu1 %vm369_vm1, %v6952_v34 }
  0x65   : > { %6296 = vmatmul.mubr.msk.f32.gmra.mxu0 %vm369_vm1, %v7006_v44 }
  0x66   : > { %6220 = vmatmul.mubr.msk.f32.gmra.mxu1 %vm369_vm1, %v6966_v36  ;;  %6298 = vmatprep.mubr.msk.f32.mxu0 %vm369_vm1, %v7012_v46 }
  0x67   : > { %6222 = vmatprep.mubr.msk.f32.mxu1 %vm369_vm1, %v6972_v38 }
  0x69   : > { %6299 = vmatmul.mubr.msk.f32.gmra.mxu0 %vm369_vm1, %v338_v48 }
  0x6a   : > { %6223 = vmatmul.mubr.msk.f32.gmra.mxu1 %vm369_vm1, %v6986_v40  ;;  %6301 = vmatprep.mubr.msk.f32.mxu0 %vm369_vm1, %v339_v50 }
  0x6b   : > { %6225 = vmatprep.mubr.msk.f32.mxu1 %vm369_vm1, %v6992_v42 }
  0x6d   : > { %6302 = vmatmul.mubr.msk.f32.gmra.mxu0 %vm369_vm1, %v340_v52 }
  0x6e   : > { %6226 = vmatmul.mubr.msk.f32.gmra.mxu1 %vm369_vm1, %v7006_v44  ;;  %6304 = vmatprep.mubr.msk.f32.mxu0 %vm369_vm1, %v6811_v5 }
  0x6f   : > { %6228 = vmatprep.mubr.msk.f32.mxu1 %vm369_vm1, %v7012_v46  ;;  %v1790_v46 = vlaneseq }
  0x71   : > { %6305 = vmatmul.mubr.msk.f32.gmra.mxu0 %vm369_vm1, %v6821_v7 }
  0x72   : > { %6229 = vmatmul.mubr.msk.f32.gmra.mxu1 %vm369_vm1, %v338_v48  ;;  %6307 = vmatprep.mubr.msk.f32.mxu0 %vm369_vm1, %v6827_v9 }
  0x73   : > { %6231 = vmatprep.mubr.msk.f32.mxu1 %vm369_vm1, %v339_v50 }
  0x75   : > { %6308 = vmatmul.mubr.msk.f32.gmra.mxu0 %vm369_vm1, %v6845_v13 }
  0x76   : > { %6232 = vmatmul.mubr.msk.f32.gmra.mxu1 %vm369_vm1, %v340_v52  ;;  %6310 = vmatprep.mubr.msk.f32.mxu0 %vm369_vm1, %v6855_v15 }
  0x77   : > { %6234 = vmatprep.mubr.msk.f32.mxu1 %vm369_vm1, %v6811_v5 }
  0x79   : > { %6311 = vmatmul.mubr.msk.f32.gmra.mxu0 %vm369_vm1, %v6869_v17 }
  0x7a   : > { %6235 = vmatmul.mubr.msk.f32.gmra.mxu1 %vm369_vm1, %v6821_v7  ;;  %6313 = vmatprep.mubr.msk.f32.mxu0 %vm369_vm1, %v6875_v19 }
  0x7b   : > { %6237 = vmatprep.mubr.msk.f32.mxu1 %vm369_vm1, %v6827_v9 }
  0x7d   : > { %6314 = vmatmul.mubr.msk.f32.gmra.mxu0 %vm369_vm1, %v6889_v21 }
  0x7e   : > { %6238 = vmatmul.mubr.msk.f32.gmra.mxu1 %vm369_vm1, %v6845_v13  ;;  %6316 = vmatprep.mubr.msk.f32.mxu0 %vm369_vm1, %v6895_v23 }
  0x7f   : > { %6240 = vmatprep.mubr.msk.f32.mxu1 %vm369_vm1, %v6855_v15 }
  0x81   : > { %6317 = vmatmul.mubr.msk.f32.gmra.mxu0 %vm369_vm1, %v6909_v25 }
  0x82   : > { %6241 = vmatmul.mubr.msk.f32.gmra.mxu1 %vm369_vm1, %v6869_v17  ;;  %6319 = vmatprep.mubr.msk.f32.mxu0 %vm369_vm1, %v6915_v27 }
  0x83   : > { %6243 = vmatprep.mubr.msk.f32.mxu1 %vm369_vm1, %v6875_v19 }
  0x85   : > { %6320 = vmatmul.mubr.msk.f32.gmra.mxu0 %vm369_vm1, %v6929_v29 }
  0x86   : > { %6244 = vmatmul.mubr.msk.f32.gmra.mxu1 %vm369_vm1, %v6889_v21  ;;  %6322 = vmatprep.mubr.msk.f32.mxu0 %vm369_vm1, %v6935_v31 }
  0x87   : > { %6246 = vmatprep.mubr.msk.f32.mxu1 %vm369_vm1, %v6895_v23 }
  0x89   : > { %6323 = vmatmul.mubr.msk.f32.gmra.mxu0 %vm369_vm1, %v6949_v33 }
  0x8a   : > { %6247 = vmatmul.mubr.msk.f32.gmra.mxu1 %vm369_vm1, %v6909_v25  ;;  %6325 = vmatprep.mubr.msk.f32.mxu0 %vm369_vm1, %v6955_v35 }
  0x8b   : > { %6249 = vmatprep.mubr.msk.f32.mxu1 %vm369_vm1, %v6915_v27 }
  0x8d   : > { %6326 = vmatmul.mubr.msk.f32.gmra.mxu0 %vm369_vm1, %v6969_v37 }
  0x8e   : > { %6250 = vmatmul.mubr.msk.f32.gmra.mxu1 %vm369_vm1, %v6929_v29  ;;  %6328 = vmatprep.mubr.msk.f32.mxu0 %vm369_vm1, %v6975_v39 }
  0x8f   : > { %6252 = vmatprep.mubr.msk.f32.mxu1 %vm369_vm1, %v6935_v31 }
  0x91   : > { %6329 = vmatmul.mubr.msk.f32.gmra.mxu0 %vm369_vm1, %v6989_v41 }
  0x92   : > { %6253 = vmatmul.mubr.msk.f32.gmra.mxu1 %vm369_vm1, %v6949_v33  ;;  %6331 = vmatprep.mubr.msk.f32.mxu0 %vm369_vm1, %v6995_v43 }
  0x93   : > { %6255 = vmatprep.mubr.msk.f32.mxu1 %vm369_vm1, %v6955_v35 }
  0x95   : > { %6332 = vmatmul.mubr.msk.f32.gmra.mxu0 %vm369_vm1, %v7009_v45 }
  0x96   : > { %6256 = vmatmul.mubr.msk.f32.gmra.mxu1 %vm369_vm1, %v6969_v37  ;;  %6334 = vmatprep.mubr.msk.f32.mxu0 %vm369_vm1, %v7015_v47 }
  0x97   : > { %6258 = vmatprep.mubr.msk.f32.mxu1 %vm369_vm1, %v6975_v39 }
  0x99   : > { %6335 = vmatmul.mubr.msk.f32.gmra.mxu0 %vm369_vm1, %v7027_v49 }
  0x9a   : > { %6259 = vmatmul.mubr.msk.f32.gmra.mxu1 %vm369_vm1, %v6989_v41  ;;  %6337 = vmatprep.mubr.msk.f32.mxu0 %vm369_vm1, %v7031_v51 }
  0x9b   : > { %6261 = vmatprep.mubr.msk.f32.mxu1 %vm369_vm1, %v6995_v43 }
  0x9d   : > { %6338 = vmatmul.mubr.msk.f32.gmra.mxu0 %vm369_vm1, %v7041_v53 }
  0x9e   : > { %6262 = vmatmul.mubr.msk.f32.gmra.mxu1 %vm369_vm1, %v7009_v45  ;;  %6340 = vmatprep.mubr.msk.f32.mxu0 %vm369_vm1, %v1183_v56  ;;  %v7323_v45 = vld [vmem:[%s8814_s2] ss:$0 sm:$0xff]  ;;  %v7326_v56 = vshrl.u32 %v1790_v46, 7 }
  0x9f   : > { %6264 = vmatprep.mubr.msk.f32.mxu1 %vm369_vm1, %v7015_v47 }
  0xa1   : > { %6341 = vmatmul.mubr.msk.f32.gmra.mxu0 %vm369_vm1, %v1184_v57 }
  0xa2   : > { %6265 = vmatmul.mubr.msk.f32.gmra.mxu1 %vm369_vm1, %v7027_v49 }
  0xd5   : > { %v6121_v58 = vpop.f32.mrf.mxu0 }
  0xd6   : > { %v7232_v59 = vpop.f32.mrf.mxu1 }
  0xd7   : > { %v584_v60 = vpop.f32.mrf.mxu0 }
  0xd8   : > { %v7234_v61 = vpop.f32.mrf.mxu1 }
  0xd9   : > { %v6124_v62 = vpop.f32.mrf.mxu0 }
  0xda   : > { %v7236_v63 = vpop.f32.mrf.mxu1 }
  0xdb   : > { %v594_v0 = vpop.f32.mrf.mxu0 }
  0xdc   : > { %v7238_v1 = vpop.f32.mrf.mxu1 }
  0xdd   : > { %v7240_v2 = vpop.f32.mrf.mxu0 }
  0xde   : > { %v7242_v3 = vpop.f32.mrf.mxu1 }
  0xdf   : > { %v7244_v4 = vpop.f32.mrf.mxu0 }
  0xe0   : > { %v7246_v5 = vpop.f32.mrf.mxu1 }
  0xe1   : > { %v7248_v6 = vpop.f32.mrf.mxu0 }
  0xe2   : > { %v7250_v7 = vpop.f32.mrf.mxu1 }
  0xe3   : > { %v7252_v8 = vpop.f32.mrf.mxu0 }
  0xe4   : > { %v7254_v9 = vpop.f32.mrf.mxu1 }
  0xe5   : > { %v7256_v10 = vpop.f32.mrf.mxu0 }
  0xe6   : > { %v7258_v11 = vpop.f32.mrf.mxu1 }
  0xe7   : > { %v7260_v12 = vpop.f32.mrf.mxu0 }
  0xe8   : > { %v7262_v13 = vpop.f32.mrf.mxu1 }
  0xe9   : > { %v7264_v14 = vpop.f32.mrf.mxu0 }
  0xea   : > { %v7266_v15 = vpop.f32.mrf.mxu1 }
  0xeb   : > { %v7268_v16 = vpop.f32.mrf.mxu0 }
  0xec   : > { %v7270_v17 = vpop.f32.mrf.mxu1 }
  0xed   : > { %v7272_v18 = vpop.f32.mrf.mxu0 }
  0xee   : > { %v7274_v19 = vpop.f32.mrf.mxu1 }
  0xef   : > { %v7276_v20 = vpop.f32.mrf.mxu0 }
  0xf0   : > { %v7278_v21 = vpop.f32.mrf.mxu1 }
  0xf1   : > { %v7280_v22 = vpop.f32.mrf.mxu0 }
  0xf2   : > { %v7282_v23 = vpop.f32.mrf.mxu1 }
  0xf3   : > { %v7284_v24 = vpop.f32.mrf.mxu0 }
  0xf4   : > { %v7286_v25 = vpop.f32.mrf.mxu1 }
  0xf5   : > { %v7288_v26 = vpop.f32.mrf.mxu0 }
  0xf6   : > { %v7290_v27 = vpop.f32.mrf.mxu1 }
  0xf7   : > { %v7292_v28 = vpop.f32.mrf.mxu0 }
  0xf8   : > { %v7294_v29 = vpop.f32.mrf.mxu1 }
  0xf9   : > { %v7296_v30 = vpop.f32.mrf.mxu0 }
  0xfa   : > { %v7298_v31 = vpop.f32.mrf.mxu1 }
  0xfb   : > { %v7300_v32 = vpop.f32.mrf.mxu0 }
  0xfc   : > { %v7302_v33 = vpop.f32.mrf.mxu1 }
  0xfd   : > { %8822 = vst [vmem:[#allocation3_spill] sm:$0xff] %v7302_v33  ;;  %v7304_v34 = vpop.f32.mrf.mxu0 }
  0xfe   : > { %v7306_v35 = vpop.f32.mrf.mxu1 }
  0xff   : > { %8823 = vst [vmem:[#allocation4_spill] sm:$0xff] %v7306_v35  ;;  %v7308_v36 = vpop.f32.mrf.mxu0 }
 0x100   : > { %v7310_v37 = vpop.f32.mrf.mxu1 }
 0x101   : > { %8824 = vst [vmem:[#allocation5_spill] sm:$0xff] %v7310_v37  ;;  %v7312_v38 = vpop.f32.mrf.mxu0 }
 0x102   : > { %v7314_v39 = vpop.f32.mrf.mxu1 }
 0x103   : > { %8825 = vst [vmem:[#allocation6_spill] sm:$0xff] %v7314_v39  ;;  %v7316_v40 = vpop.f32.mrf.mxu0 }
 0x104   : > { %v7318_v41 = vpop.f32.mrf.mxu1 }
 0x105   : > { %8826 = vst [vmem:[#allocation7_spill] sm:$0xff] %v7318_v41  ;;  %v6273_v43 = vpop.f32.mrf.mxu0 }
 0x106   : > { %v6197_v42 = vpop.f32.mrf.mxu1 }
 0x107   : > { %v904_v44 = vadd.f32 %v6197_v42, %v6121_v58  ;;  %v1400_v48 = vpop.f32.mrf.mxu0 }
 0x108   : > { %v898_v47 = vpop.f32.mrf.mxu1 }
 0x109   : > { %v1640_v49 = vadd.f32 %v6273_v43, %v904_v44  ;;  %v899_v50 = vadd.f32 %v898_v47, %v584_v60  ;;  %v6276_v52 = vpop.f32.mrf.mxu0  ;;  %v1793_v44 = vadd.s32 16, %v7326_v56 }
 0x10a   : > { %v6200_v51 = vpop.f32.mrf.mxu1 }
 0x10b   : > { %v1695_v53 = vadd.f32 %v7323_v45, %v1640_v49  ;;  %v1639_v54 = vadd.f32 %v1400_v48, %v899_v50  ;;  %v914_v55 = vadd.f32 %v6200_v51, %v6124_v62  ;;  %v1410_v58 = vpop.f32.mrf.mxu0  ;;  %v1843_v62 = vand.u32 15, %v7326_v56 }
 0x10c   : > { %v908_v57 = vpop.f32.mrf.mxu1  ;;  %v1857_v51 = vand.u32 15, %v1793_v44 }
 0x10d   : > { %v7328_v42 = vmax.f32 %v1695_v53, 0.0  ;;  %v1694_v41 = vadd.f32 %v7323_v45, %v1639_v54  ;;  %v1642_v39 = vadd.f32 %v6276_v52, %v914_v55  ;;  %v909_v37 = vadd.f32 %v908_v57, %v594_v0  ;;  %v6279_v33 = vpop.f32.mrf.mxu0 }
 0x10e   : > { %v6203_v35 = vpop.f32.mrf.mxu1  ;;  %vm2607_vm2 = vcmp.eq.s32.totalorder %v1843_v62, 0  ;;  %vm2609_vm3 = vcmp.eq.s32.totalorder %v1857_v51, 0 }
 0x10f   : > { %v1697_v60 = vadd.f32 %v7323_v45, %v1642_v39  ;;  %v1641_v43 = vadd.f32 %v1410_v58, %v909_v37  ;;  %3145 = vrot.lane.b32.xlu1 %v7328_v42, %s6712_s9  ;;  %2855 = vrot.lane.b32.xlu0 %v7328_v42, %s6713_s10  ;;  %v7338_v47 = vmax.f32 %v1694_v41, 0.0  ;;  %v924_v39 = vadd.f32 %v6203_v35, %v7240_v2  ;;  %v1420_v50 = vpop.f32.mrf.mxu0 }
 0x110   : > { %v918_v46 = vpop.f32.mrf.mxu1  ;;  %v1795_v35 = vadd.s32 32, %v7326_v56 }
 0x111   : > { %v7340_v0 = vmax.f32 %v1697_v60, 0.0  ;;  %v919_v37 = vadd.f32 %v918_v46, %v7244_v4  ;;  %v1696_v48 = vadd.f32 %v7323_v45, %v1641_v43  ;;  %v1644_v41 = vadd.f32 %v6279_v33, %v924_v39  ;;  %v6282_v2 = vpop.f32.mrf.mxu0 }
 0x112   : > { %v6206_v49 = vpop.f32.mrf.mxu1  ;;  %v2751_v4 = vsel %vm2607_vm2, 0.0, %v7338_v47  ;;  %v1871_v44 = vand.u32 15, %v1795_v35  ;;  %vm2997_vm2 = vcmask 130112  }
 0x113   : > { %2859 = vrot.lane.b32.xlu1 %v7340_v0, %s6713_s10  ;;  %2853 = vrot.lane.b32.xlu0 %v7338_v47, %s6713_s10  ;;  %v1643_v52 = vadd.f32 %v1420_v50, %v919_v37  ;;  %v7349_v53 = vmax.f32 %v1696_v48, 0.0  ;;  %v1699_v55 = vadd.f32 %v7323_v45, %v1644_v41  ;;  %v934_v57 = vadd.f32 %v6206_v49, %v7248_v6  ;;  %v1430_v43 = vpop.f32.mrf.mxu0 }
 0x114   : > { %v928_v54 = vpop.f32.mrf.mxu1  ;;  %vm2611_vm4 = vcmp.eq.s32.totalorder %v1871_v44, 0 }
 0x115   : > { %v1698_v33 = vadd.f32 %v7323_v45, %v1643_v52  ;;  %v929_v58 = vadd.f32 %v928_v54, %v7252_v8  ;;  %v2753_v62 = vsel %vm2609_vm3, 0.0, %v7349_v53  ;;  %v7364_v46 = vmax.f32 %v1699_v55, 0.0  ;;  %v6285_v49 = vpop.f32.mrf.mxu0 }
 0x116   : > { %v6209_v60 = vpop.f32.mrf.mxu1  ;;  %v1646_v37 = vadd.f32 %v6282_v2, %v934_v57  ;;  %v1797_v8 = vadd.s32 48, %v7326_v56 }
 0x117   : > { %3149 = vrot.lane.b32.xlu1 %v7340_v0, %s6712_s9  ;;  %3143 = vrot.lane.b32.xlu0 %v2751_v4, %s6712_s9  ;;  %v7366_v39 = vmax.f32 %v1698_v33, 0.0  ;;  %v1645_v6 = vadd.f32 %v1430_v43, %v929_v58  ;;  %v944_v51 = vadd.f32 %v6209_v60, %v7256_v10  ;;  %v1440_v2 = vpop.f32.mrf.mxu0 }
 0x118   : > { %v938_v48 = vpop.f32.mrf.mxu1  ;;  %v1701_v50 = vadd.f32 %v7323_v45, %v1646_v37  ;;  %v1885_v35 = vand.u32 15, %v1797_v8 }
 0x119   : > { %v1700_v41 = vadd.f32 %v7323_v45, %v1645_v6  ;;  %v939_v52 = vadd.f32 %v938_v48, %v7260_v12  ;;  %v2755_v4 = vsel %vm2611_vm4, 0.0, %v7366_v39  ;;  %v1648_v33 = vadd.f32 %v6285_v49, %v944_v51  ;;  %v6288_v60 = vpop.f32.mrf.mxu0 }
 0x11a   : > { %v6212_v54 = vpop.f32.mrf.mxu1  ;;  %v7381_v55 = vmax.f32 %v1701_v50, 0.0  ;;  %vm2613_vm5 = vcmp.eq.s32.totalorder %v1885_v35, 0  ;;  %v1799_v12 = vadd.s32 64, %v7326_v56  ;;  %vm3046_vm4 = vcmask 64512  }
 0x11b   : > { %2857 = vrot.lane.b32.xlu1 %v7349_v53, %s6713_s10  ;;  %3147 = vrot.lane.b32.xlu0 %v2753_v62, %s6712_s9  ;;  %v7383_v57 = vmax.f32 %v1700_v41, 0.0  ;;  %v1647_v10 = vadd.f32 %v1440_v2, %v939_v52  ;;  %v1703_v43 = vadd.f32 %v7323_v45, %v1648_v33  ;;  %v954_v62 = vadd.f32 %v6212_v54, %v7264_v14  ;;  %v1450_v48 = vpop.f32.mrf.mxu0 }
 0x11c   : > { %v948_v58 = vpop.f32.mrf.mxu1  ;;  %v1899_v8 = vand.u32 15, %v1799_v12 }
 0x11d   : > { %v1702_v44 = vadd.f32 %v7323_v45, %v1647_v10  ;;  %v949_v37 = vadd.f32 %v948_v58, %v7268_v16  ;;  %v2757_v49 = vsel %vm2613_vm5, 0.0, %v7383_v57  ;;  %v7398_v50 = vmax.f32 %v1703_v43, 0.0  ;;  %v6291_v54 = vpop.f32.mrf.mxu0 }
 0x11e   : > { %v6215_v6 = vpop.f32.mrf.mxu1  ;;  %v1650_v41 = vadd.f32 %v6288_v60, %v954_v62  ;;  %vm2615_vm6 = vcmp.eq.s32.totalorder %v1899_v8, 0  ;;  %v1801_v16 = vadd.s32 80, %v7326_v56  ;;  %vm3287_vm5 = vcmask 195712  }
 0x11f   : > { %2863 = vrot.lane.b32.xlu1 %v7364_v46, %s6713_s10  ;;  %2861 = vrot.lane.b32.xlu0 %v7366_v39, %s6713_s10  ;;  %v7400_v51 = vmax.f32 %v1702_v44, 0.0  ;;  %v1649_v14 = vadd.f32 %v1450_v48, %v949_v37  ;;  %v1460_v58 = vpop.f32.mrf.mxu0 }
 0x120   : > { %v958_v52 = vpop.f32.mrf.mxu1  ;;  %v1705_v2 = vadd.f32 %v7323_v45, %v1650_v41  ;;  %v1913_v12 = vand.u32 15, %v1801_v16 }
 0x121   : > { %v1704_v35 = vadd.f32 %v7323_v45, %v1649_v14  ;;  %v959_v33 = vadd.f32 %v958_v52, %v7276_v20  ;;  %v2759_v60 = vsel %vm2615_vm6, 0.0, %v7400_v51  ;;  %v1803_v20 = vadd.s32 96, %v7326_v56 }
 0x122   : > { %v6218_v10 = vpop.f32.mrf.mxu1  ;;  %v7415_v43 = vmax.f32 %v1705_v2, 0.0  ;;  %vm2617_vm7 = vcmp.eq.s32.totalorder %v1913_v12, 0 }
 0x123   : > { %3153 = vrot.lane.b32.xlu1 %v7364_v46, %s6712_s9  ;;  %3151 = vrot.lane.b32.xlu0 %v2755_v4, %s6712_s9  ;;  %v964_v4 = vadd.f32 %v6215_v6, %v7272_v18  ;;  %v7417_v62 = vmax.f32 %v1704_v35, 0.0  ;;  %v1651_v18 = vadd.f32 %v1460_v58, %v959_v33  ;;  %v6294_v6 = vpop.f32.mrf.mxu0  ;;  %v1927_v16 = vand.u32 15, %v1803_v20 }
 0x124   : > { %v968_v37 = vpop.f32.mrf.mxu1 }
 0x125   : > { %v1652_v44 = vadd.f32 %v6291_v54, %v964_v4  ;;  %v1706_v8 = vadd.f32 %v7323_v45, %v1651_v18  ;;  %v969_v41 = vadd.f32 %v968_v37, %v7284_v24  ;;  %v1470_v52 = vpop.f32.mrf.mxu0  ;;  %v2761_v54 = vsel %vm2617_vm7, 0.0, %v7417_v62 }
 0x126   : > { %v6221_v14 = vpop.f32.mrf.mxu1  ;;  %vm2619_vm8 = vcmp.eq.s32.totalorder %v1927_v16, 0  ;;  %v1805_v24 = vadd.s32 112, %v7326_v56  ;;  %vm3336_vm7 = vcmask 57344  }
 0x127   : > { %2867 = vrot.lane.b32.xlu1 %v7381_v55, %s6713_s10  ;;  %2865 = vrot.lane.b32.xlu0 %v7383_v57, %s6713_s10  ;;  %v1707_v48 = vadd.f32 %v7323_v45, %v1652_v44  ;;  %v7434_v4 = vmax.f32 %v1706_v8, 0.0 }
 0x128   : > { %v978_v33 = vpop.f32.mrf.mxu1  ;;  %v1941_v20 = vand.u32 15, %v1805_v24 }
 0x129   : > { %v7432_v2 = vmax.f32 %v1707_v48, 0.0  ;;  %v979_v44 = vadd.f32 %v978_v33, %v7292_v28  ;;  %v1807_v28 = vadd.s32 128, %v7326_v56 }
 0x12a   : > { %v6224_v18 = vpop.f32.mrf.mxu1  ;;  %vm2621_vm9 = vcmp.eq.s32.totalorder %v1941_v20, 0 }
 0x12b   : > { %3157 = vrot.lane.b32.xlu1 %v7381_v55, %s6712_s9  ;;  %3155 = vrot.lane.b32.xlu0 %v2757_v49, %s6712_s9  ;;  %v974_v49 = vadd.f32 %v6218_v10, %v7280_v22  ;;  %v1653_v22 = vadd.f32 %v1470_v52, %v969_v41  ;;  %v6297_v10 = vpop.f32.mrf.mxu0  ;;  %v1955_v24 = vand.u32 15, %v1807_v28 }
 0x12c   : > { %v988_v41 = vpop.f32.mrf.mxu1 }
 0x12d   : > { %v1654_v35 = vadd.f32 %v6294_v6, %v974_v49  ;;  %v1708_v12 = vadd.f32 %v7323_v45, %v1653_v22  ;;  %v1480_v37 = vpop.f32.mrf.mxu0  ;;  %v2763_v6 = vsel %vm2619_vm8, 0.0, %v7434_v4  ;;  %vm2623_vm10 = vcmp.eq.s32.totalorder %v1955_v24, 0 }
 0x12e   : > { %v6227_v22 = vpop.f32.mrf.mxu1 }
 0x12f   : > { %2871 = vrot.lane.b32.xlu1 %v7398_v50, %s6713_s10  ;;  %2869 = vrot.lane.b32.xlu0 %v7400_v51, %s6713_s10  ;;  %v1709_v58 = vadd.f32 %v7323_v45, %v1654_v35  ;;  %v7451_v49 = vmax.f32 %v1708_v12, 0.0  ;;  %v989_v35 = vadd.f32 %v988_v41, %v7300_v32  ;;  %v1809_v32 = vadd.s32 144, %v7326_v56 }
 0x131   : > { %v7449_v48 = vmax.f32 %v1709_v58, 0.0  ;;  %v1969_v28 = vand.u32 15, %v1809_v32 }
 0x133   : > { %3161 = vrot.lane.b32.xlu1 %v7398_v50, %s6712_s9  ;;  %3159 = vrot.lane.b32.xlu0 %v2759_v60, %s6712_s9  ;;  %v984_v60 = vadd.f32 %v6221_v14, %v7288_v26  ;;  %v1655_v26 = vadd.f32 %v1480_v37, %v979_v44  ;;  %v6300_v14 = vpop.f32.mrf.mxu0  ;;  %v998_v44 = vpop.f32.mrf.mxu1  ;;  %vm2625_vm11 = vcmp.eq.s32.totalorder %v1969_v28, 0 }
 0x135   : > { %v1656_v8 = vadd.f32 %v6297_v10, %v984_v60  ;;  %v1710_v16 = vadd.f32 %v7323_v45, %v1655_v26  ;;  %v1490_v33 = vpop.f32.mrf.mxu0  ;;  %v2765_v10 = vsel %vm2621_vm9, 0.0, %v7451_v49  ;;  %v6230_v26 = vpop.f32.mrf.mxu1 }
 0x137   : > { %2875 = vrot.lane.b32.xlu1 %v7415_v43, %s6713_s10  ;;  %2873 = vrot.lane.b32.xlu0 %v7417_v62, %s6713_s10  ;;  %v1711_v52 = vadd.f32 %v7323_v45, %v1656_v8  ;;  %v7468_v60 = vmax.f32 %v1710_v16, 0.0  ;;  %v999_v8 = vadd.f32 %v998_v44, %v7308_v36  ;;  %v1811_v36 = vadd.s32 160, %v7326_v56 }
 0x139   : > { %v7466_v58 = vmax.f32 %v1711_v52, 0.0  ;;  %v1983_v32 = vand.u32 15, %v1811_v36 }
 0x13b   : > { %3165 = vrot.lane.b32.xlu1 %v7415_v43, %s6712_s9  ;;  %3163 = vrot.lane.b32.xlu0 %v2761_v54, %s6712_s9  ;;  %v994_v54 = vadd.f32 %v6224_v18, %v7296_v30  ;;  %v1657_v30 = vadd.f32 %v1490_v33, %v989_v35  ;;  %v6303_v18 = vpop.f32.mrf.mxu0  ;;  %v1008_v35 = vpop.f32.mrf.mxu1  ;;  %vm2627_vm12 = vcmp.eq.s32.totalorder %v1983_v32, 0 }
 0x13d   : > { %v1658_v12 = vadd.f32 %v6300_v14, %v994_v54  ;;  %v1712_v20 = vadd.f32 %v7323_v45, %v1657_v30  ;;  %v1500_v41 = vpop.f32.mrf.mxu0  ;;  %v2767_v14 = vsel %vm2623_vm10, 0.0, %v7468_v60  ;;  %v6233_v30 = vpop.f32.mrf.mxu1 }
 0x13f   : > { %2879 = vrot.lane.b32.xlu1 %v7432_v2, %s6713_s10  ;;  %2877 = vrot.lane.b32.xlu0 %v7434_v4, %s6713_s10  ;;  %v1713_v37 = vadd.f32 %v7323_v45, %v1658_v12  ;;  %v7485_v54 = vmax.f32 %v1712_v20, 0.0  ;;  %v1009_v12 = vadd.f32 %v1008_v35, %v7316_v40  ;;  %v1813_v40 = vadd.s32 176, %v7326_v56 }
 0x141   : > { %v7483_v52 = vmax.f32 %v1713_v37, 0.0  ;;  %v1997_v36 = vand.u32 15, %v1813_v40 }
 0x143   : > { %3169 = vrot.lane.b32.xlu1 %v7432_v2, %s6712_s9  ;;  %3167 = vrot.lane.b32.xlu0 %v2763_v6, %s6712_s9  ;;  %v1004_v6 = vadd.f32 %v6227_v22, %v7304_v34  ;;  %v1659_v34 = vadd.f32 %v1500_v41, %v999_v8  ;;  %v6306_v22 = vpop.f32.mrf.mxu0  ;;  %v1018_v8 = vpop.f32.mrf.mxu1  ;;  %vm2629_vm13 = vcmp.eq.s32.totalorder %v1997_v36, 0 }
 0x145   : > { %v1660_v16 = vadd.f32 %v6303_v18, %v1004_v6  ;;  %v1714_v24 = vadd.f32 %v7323_v45, %v1659_v34  ;;  %v1510_v44 = vpop.f32.mrf.mxu0  ;;  %v2769_v18 = vsel %vm2625_vm11, 0.0, %v7485_v54  ;;  %v6236_v34 = vpop.f32.mrf.mxu1 }
 0x147   : > { %2883 = vrot.lane.b32.xlu1 %v7449_v48, %s6713_s10  ;;  %2881 = vrot.lane.b32.xlu0 %v7451_v49, %s6713_s10  ;;  %v1715_v33 = vadd.f32 %v7323_v45, %v1660_v16  ;;  %v7502_v6 = vmax.f32 %v1714_v24, 0.0  ;;  %v1019_v16 = vadd.f32 %v1018_v8, %v7234_v61  ;;  %v1815_v61 = vadd.s32 192, %v7326_v56 }
 0x149   : > { %v7500_v37 = vmax.f32 %v1715_v33, 0.0  ;;  %v2011_v40 = vand.u32 15, %v1815_v61 }
 0x14b   : > { %3173 = vrot.lane.b32.xlu1 %v7449_v48, %s6712_s9  ;;  %3171 = vrot.lane.b32.xlu0 %v2765_v10, %s6712_s9  ;;  %v1014_v10 = vadd.f32 %v6230_v26, %v7312_v38  ;;  %v1661_v38 = vadd.f32 %v1510_v44, %v1009_v12  ;;  %v6309_v26 = vpop.f32.mrf.mxu0  ;;  %v1028_v12 = vpop.f32.mrf.mxu1  ;;  %vm2631_vm14 = vcmp.eq.s32.totalorder %v2011_v40, 0 }
 0x14d   : > { %v1662_v20 = vadd.f32 %v6306_v22, %v1014_v10  ;;  %v1716_v28 = vadd.f32 %v7323_v45, %v1661_v38  ;;  %v1520_v35 = vpop.f32.mrf.mxu0  ;;  %v2771_v22 = vsel %vm2627_vm12, 0.0, %v7502_v6  ;;  %v6239_v38 = vpop.f32.mrf.mxu1 }
 0x14f   : > { %2887 = vrot.lane.b32.xlu1 %v7466_v58, %s6713_s10  ;;  %2885 = vrot.lane.b32.xlu0 %v7468_v60, %s6713_s10  ;;  %v1717_v41 = vadd.f32 %v7323_v45, %v1662_v20  ;;  %v7519_v10 = vmax.f32 %v1716_v28, 0.0  ;;  %v1029_v20 = vadd.f32 %v1028_v12, %v7238_v1  ;;  %v1817_v1 = vadd.s32 208, %v7326_v56 }
 0x151   : > { %v7517_v33 = vmax.f32 %v1717_v41, 0.0  ;;  %v2025_v61 = vand.u32 15, %v1817_v1 }
 0x153   : > { %3177 = vrot.lane.b32.xlu1 %v7466_v58, %s6712_s9  ;;  %3175 = vrot.lane.b32.xlu0 %v2767_v14, %s6712_s9  ;;  %v1024_v14 = vadd.f32 %v6233_v30, %v7232_v59  ;;  %v1663_v59 = vadd.f32 %v1520_v35, %v1019_v16  ;;  %v6312_v30 = vpop.f32.mrf.mxu0  ;;  %v1038_v16 = vpop.f32.mrf.mxu1  ;;  %vm2633_vm15 = vcmp.eq.s32.totalorder %v2025_v61, 0 }
 0x155   : > { %v1664_v24 = vadd.f32 %v6309_v26, %v1024_v14  ;;  %v1718_v32 = vadd.f32 %v7323_v45, %v1663_v59  ;;  %v1530_v8 = vpop.f32.mrf.mxu0  ;;  %v2773_v26 = vsel %vm2629_vm13, 0.0, %v7519_v10  ;;  %v6242_v59 = vpop.f32.mrf.mxu1 }
 0x157   : > { %2891 = vrot.lane.b32.xlu1 %v7483_v52, %s6713_s10  ;;  %2889 = vrot.lane.b32.xlu0 %v7485_v54, %s6713_s10  ;;  %v1719_v44 = vadd.f32 %v7323_v45, %v1664_v24  ;;  %v7536_v14 = vmax.f32 %v1718_v32, 0.0  ;;  %v1039_v24 = vadd.f32 %v1038_v16, %v7246_v5  ;;  %v1819_v5 = vadd.s32 224, %v7326_v56 }
 0x159   : > { %v7534_v41 = vmax.f32 %v1719_v44, 0.0  ;;  %v2039_v1 = vand.u32 15, %v1819_v5 }
 0x15b   : > { %3181 = vrot.lane.b32.xlu1 %v7483_v52, %s6712_s9  ;;  %3179 = vrot.lane.b32.xlu0 %v2769_v18, %s6712_s9  ;;  %v1034_v18 = vadd.f32 %v6236_v34, %v7236_v63  ;;  %v1665_v63 = vadd.f32 %v1530_v8, %v1029_v20  ;;  %v6315_v34 = vpop.f32.mrf.mxu0  ;;  %v1048_v20 = vpop.f32.mrf.mxu1  ;;  %vm2635_vm3 = vcmp.eq.s32.totalorder %v2039_v1, 0 }
 0x15d   : > { %v1666_v28 = vadd.f32 %v6312_v30, %v1034_v18  ;;  %v1720_v36 = vadd.f32 %v7323_v45, %v1665_v63  ;;  %v1540_v12 = vpop.f32.mrf.mxu0  ;;  %v2775_v30 = vsel %vm2631_vm14, 0.0, %v7536_v14  ;;  %v6245_v63 = vpop.f32.mrf.mxu1 }
 0x15f   : > { %2895 = vrot.lane.b32.xlu1 %v7500_v37, %s6713_s10  ;;  %2893 = vrot.lane.b32.xlu0 %v7502_v6, %s6713_s10  ;;  %v1721_v35 = vadd.f32 %v7323_v45, %v1666_v28  ;;  %v7553_v18 = vmax.f32 %v1720_v36, 0.0  ;;  %v1049_v28 = vadd.f32 %v1048_v20, %v7254_v9  ;;  %v1821_v9 = vadd.s32 240, %v7326_v56 }
 0x161   : > { %v7551_v44 = vmax.f32 %v1721_v35, 0.0 }
 0x163   : > { %3185 = vrot.lane.b32.xlu1 %v7500_v37, %s6712_s9  ;;  %3183 = vrot.lane.b32.xlu0 %v2771_v22, %s6712_s9  ;;  %v1044_v22 = vadd.f32 %v6239_v38, %v7242_v3  ;;  %v1667_v3 = vadd.f32 %v1540_v12, %v1039_v24  ;;  %v6318_v38 = vpop.f32.mrf.mxu0  ;;  %v1058_v24 = vpop.f32.mrf.mxu1 }
 0x165   : > { %v1668_v32 = vadd.f32 %v6315_v34, %v1044_v22  ;;  %v1722_v40 = vadd.f32 %v7323_v45, %v1667_v3  ;;  %v1550_v16 = vpop.f32.mrf.mxu0  ;;  %v2777_v34 = vsel %vm2633_vm15, 0.0, %v7553_v18  ;;  %v6248_v5 = vpop.f32.mrf.mxu1 }
 0x167   : > { %2899 = vrot.lane.b32.xlu1 %v7517_v33, %s6713_s10  ;;  %2897 = vrot.lane.b32.xlu0 %v7519_v10, %s6713_s10  ;;  %v1723_v8 = vadd.f32 %v7323_v45, %v1668_v32  ;;  %v7570_v22 = vmax.f32 %v1722_v40, 0.0  ;;  %v1059_v32 = vadd.f32 %v1058_v24, %v7262_v13  ;;  %v1794_v24 = vadd.s32 24, %v7326_v56 }
 0x169   : > { %v7568_v35 = vmax.f32 %v1723_v8, 0.0 }
 0x16b   : > { %3189 = vrot.lane.b32.xlu1 %v7517_v33, %s6712_s9  ;;  %3187 = vrot.lane.b32.xlu0 %v2773_v26, %s6712_s9  ;;  %v1054_v26 = vadd.f32 %v6242_v59, %v7250_v7  ;;  %v1669_v7 = vadd.f32 %v1550_v16, %v1049_v28  ;;  %v6321_v59 = vpop.f32.mrf.mxu0 }
 0x16d   : > { %v1670_v36 = vadd.f32 %v6318_v38, %v1054_v26  ;;  %v1724_v61 = vadd.f32 %v7323_v45, %v1669_v7  ;;  %v1792_v38 = vadd.s32 8, %v7326_v56  ;;  %v1560_v8 = vpop.f32.mrf.mxu0  ;;  %v2779_v26 = vsel %vm2635_vm3, 0.0, %v7570_v22 }
 0x16f   : > { %2903 = vrot.lane.b32.xlu1 %v7534_v41, %s6713_s10  ;;  %2901 = vrot.lane.b32.xlu0 %v7536_v14, %s6713_s10  ;;  %v1725_v12 = vadd.f32 %v7323_v45, %v1670_v36  ;;  %v7591_v13 = vmax.f32 %v1724_v61, 0.0  ;;  %v1850_v1 = vand.u32 15, %v1792_v38  ;;  %v1068_v36 = vpop.f32.mrf.mxu1  ;;  %v6324_v7 = vpop.f32.mrf.mxu0 }
 0x170   : > { %v1069_v61 = vadd.f32 %v1068_v36, %v7270_v17 }
 0x171   : > { %v7589_v40 = vmax.f32 %v1725_v12, 0.0  ;;  %v6251_v38 = vpop.f32.mrf.mxu1  ;;  %vm7615_vm8 = vcmp.eq.s32.totalorder %v1850_v1, 15 }
 0x173   : > { %3193 = vrot.lane.b32.xlu1 %v7534_v41, %s6712_s9  ;;  %3191 = vrot.lane.b32.xlu0 %v2775_v30, %s6712_s9  ;;  %v1064_v30 = vadd.f32 %v6245_v63, %v7258_v11  ;;  %v2053_v11 = vand.u32 15, %v1821_v9  ;;  %v1671_v63 = vadd.f32 %v1560_v8, %v1059_v32  ;;  %v1823_v9 = vadd.s32 256, %v7326_v56  ;;  %v1570_v8 = vpop.f32.mrf.mxu0 }
 0x175   : > { %v1672_v28 = vadd.f32 %v6321_v59, %v1064_v30  ;;  %vm7602_vm6 = vcmp.eq.s32.totalorder %v2053_v11, 0  ;;  %v1074_v30 = vadd.f32 %v6248_v5, %v7266_v15  ;;  %v8820_v15 = vmov 0.0   ;;  %v1078_v59 = vpop.f32.mrf.mxu1 }
 0x176   : > { %v2067_v17 = vand.u32 15, %v1823_v9  ;;  %v1796_v9 = vadd.s32 40, %v7326_v56 }
 0x177   : > { %2907 = vrot.lane.b32.xlu1 %v7551_v44, %s6713_s10  ;;  %2905 = vrot.lane.b32.xlu0 %v7553_v18, %s6713_s10  ;;  %v1727_v12 = vadd.f32 %v7323_v45, %v1672_v28  ;;  %v1864_v28 = vand.u32 15, %v1794_v24  ;;  %v2560_v24 = vsel %vm7615_vm8, 0.0, %v7328_v42  ;;  %v6254_v11 = vpop.f32.mrf.mxu1  ;;  %vm2799_vm8 = vcmask 195584  }
 0x178   : > { %vm7643_vm10 = vcmp.eq.s32.totalorder %v2067_v17, 0 }
 0x179   : > { %v7623_v5 = vmax.f32 %v1727_v12, 0.0  ;;  %vm7631_vm9 = vcmp.eq.s32.totalorder %v1864_v28, 15 }
 0x17b   : > { %3197 = vrot.lane.b32.xlu1 %v7551_v44, %s6712_s9  ;;  %3195 = vrot.lane.b32.xlu0 %v2777_v34, %s6712_s9 }
 0x17f   : > { %2911 = vrot.lane.b32.xlu1 %v7568_v35, %s6713_s10  ;;  %2909 = vrot.lane.b32.xlu0 %v7570_v22, %s6713_s10 }
 0x181   : > { %v7581_v3 = vpop.permute.xlu1 %3145  ;;  %v2856_v20 = vpop.permute.xlu0 %2855 }
 0x182   : > { %2999 = vst.msk [vmem:[#allocation2 + $0x9] sm:$0xff] %vm2997_vm2, %v2856_v20 }
 0x183   : > { %3201 = vrot.lane.b32.xlu1 %v7568_v35, %s6712_s9  ;;  %3199 = vrot.lane.b32.xlu0 %v2779_v26, %s6712_s9  ;;  %v2781_v26 = vsel %vm7602_vm6, 0.0, %v7591_v13 }
 0x185   : > { %v2860_v16 = vpop.permute.xlu1 %2859  ;;  %v2854_v34 = vpop.permute.xlu0 %2853 }
 0x186   : > { %3001 = vst.msk [vmem:[#allocation2 + $0x19] sm:$0xff] %vm2997_vm2, %v2860_v16  ;;  %2998 = vst.msk [vmem:[#allocation2 + $0x1] sm:$0xff] %vm2997_vm2, %v2854_v34  ;;  %v1674_v16 = vadd.f32 %v6324_v7, %v1074_v30  ;;  %v1673_v34 = vadd.f32 %v1570_v8, %v1069_v61  ;;  %v1825_v7 = vadd.s32 272, %v7326_v56 }
 0x187   : > { %3047 = vst.msk [vmem:[#allocation2 + $0x2] sm:$0xff] %vm3046_vm4, %v7338_v47  ;;  %2915 = vrot.lane.b32.xlu1 %v7589_v40, %s6713_s10  ;;  %2913 = vrot.lane.b32.xlu0 %v7591_v13, %s6713_s10  ;;  %v1726_v47 = vadd.f32 %v7323_v45, %v1671_v63 }
 0x188   : > { %v1729_v12 = vadd.f32 %v7323_v45, %v1674_v16  ;;  %v1728_v30 = vadd.f32 %v7323_v45, %v1673_v34 }
 0x189   : > { %v3150_v32 = vpop.permute.xlu1 %3149  ;;  %v3144_v20 = vpop.permute.xlu0 %3143  ;;  %v7625_v63 = vmax.f32 %v1726_v47, 0.0  ;;  %v1079_v47 = vadd.f32 %v1078_v59, %v7278_v21  ;;  %v2081_v21 = vand.u32 15, %v1825_v7  ;;  %v1827_v59 = vadd.s32 288, %v7326_v56 }
 0x18a   : > { %3288 = vst.msk [vmem:[#allocation2] sm:$0xff] %vm3287_vm5, %v3144_v20  ;;  %v6327_v20 = vpop.f32.mrf.mxu0 }
 0x18b   : > { %3337 = vst.msk [vmem:[#allocation2 + $0x1] sm:$0x1] %vm3336_vm7, %v8820_v15  ;;  %3205 = vrot.lane.b32.xlu1 %v7589_v40, %s6712_s9  ;;  %3203 = vrot.lane.b32.xlu0 %v2781_v26, %s6712_s9  ;;  %v2562_v26 = vsel %vm7631_vm9, 0.0, %v7340_v0  ;;  %v7670_v0 = vmax.f32 %v1729_v12, 0.0  ;;  %vm7684_vm12 = vcmp.eq.s32.totalorder %v2081_v21, 0 }
 0x18c   : > { %v1580_v28 = vpop.f32.mrf.mxu0 }
 0x18d   : > { %v2858_v1 = vpop.permute.xlu1 %2857  ;;  %v3148_v36 = vpop.permute.xlu0 %3147  ;;  %v1675_v17 = vadd.f32 %v1580_v28, %v1079_v47 }
 0x18e   : > { %3000 = vst.msk [vmem:[#allocation2 + $0x11] sm:$0xff] %vm2997_vm2, %v2858_v1  ;;  %v1088_v1 = vpop.f32.mrf.mxu1 }
 0x18f   : > { %3048 = vst.msk [vmem:[#allocation2 + $0xa] sm:$0xff] %vm3046_vm4, %v2560_v24  ;;  %3049 = vst.msk [vmem:[#allocation2 + $0x12] sm:$0xff] %vm3046_vm4, %v7349_v53  ;;  %2919 = vrot.lane.b32.xlu1 %v7623_v5, %s6713_s10  ;;  %2917 = vrot.lane.b32.xlu0 %v7625_v63, %s6713_s10  ;;  %v1084_v53 = vadd.f32 %v6251_v38, %v7274_v19  ;;  %v2783_v19 = vsel %vm7643_vm10, 0.0, %v7625_v63  ;;  %v7672_v38 = vmax.f32 %v1728_v30, 0.0  ;;  %v1798_v24 = vadd.s32 56, %v7326_v56 }
 0x190   : > { %3289 = vst.msk [vmem:[#allocation2 + $0x8] sm:$0xff] %vm3287_vm5, %v7581_v3  ;;  %3290 = vst.msk [vmem:[#allocation2 + $0x10] sm:$0xff] %vm3287_vm5, %v3148_v36  ;;  %v1878_v3 = vand.u32 15, %v1796_v9  ;;  %v6330_v36 = vpop.f32.mrf.mxu0  ;;  %v1094_v9 = vadd.f32 %v6254_v11, %v7282_v23  ;;  %v1730_v42 = vadd.f32 %v7323_v45, %v1675_v17  ;;  %v1089_v7 = vadd.f32 %v1088_v1, %v7286_v25  ;;  %v6257_v47 = vpop.f32.mrf.mxu1 }
 0x191   : > { %v2864_v61 = vpop.permute.xlu1 %2863  ;;  %v2862_v8 = vpop.permute.xlu0 %2861  ;;  %v1676_v15 = vadd.f32 %v6327_v20, %v1084_v53  ;;  %v2785_v23 = vsel %vm7684_vm12, 0.0, %v7672_v38  ;;  %v2095_v25 = vand.u32 15, %v1827_v59  ;;  %v1800_v17 = vadd.s32 72, %v7326_v56 }
 0x192   : > { %3003 = vst.msk [vmem:[#allocation2 + $0x29] sm:$0xff] %vm2997_vm2, %v2864_v61  ;;  %3002 = vst.msk [vmem:[#allocation2 + $0x21] sm:$0xff] %vm2997_vm2, %v2862_v8  ;;  %vm7675_vm11 = vcmp.eq.s32.totalorder %v1878_v3, 15  ;;  %v1590_v61 = vpop.f32.mrf.mxu0  ;;  %v1892_v8 = vand.u32 15, %v1798_v24  ;;  %v1678_v11 = vadd.f32 %v6330_v36, %v1094_v9  ;;  %v1098_v21 = vpop.f32.mrf.mxu1  ;;  %v1104_v36 = vadd.f32 %v6257_v47, %v7290_v27 }
 0x193   : > { %3050 = vst.msk [vmem:[#allocation2 + $0x1a] sm:$0xff] %vm3046_vm4, %v2562_v26  ;;  %3051 = vst.msk [vmem:[#allocation2 + $0x22] sm:$0xff] %vm3046_vm4, %v7366_v39  ;;  %3209 = vrot.lane.b32.xlu1 %v7623_v5, %s6712_s9  ;;  %3207 = vrot.lane.b32.xlu0 %v2783_v19, %s6712_s9  ;;  %v1731_v20 = vadd.f32 %v7323_v45, %v1676_v15  ;;  %v2564_v30 = vsel %vm7675_vm11, 0.0, %v7364_v46  ;;  %v7710_v26 = vmax.f32 %v1730_v42, 0.0  ;;  %vm7722_vm14 = vcmp.eq.s32.totalorder %v2095_v25, 0 }
 0x194   : > { %3291 = vst.msk [vmem:[#allocation2 + $0x18] sm:$0xff] %vm3287_vm5, %v3150_v32  ;;  %v1677_v28 = vadd.f32 %v1590_v61, %v1089_v7  ;;  %v6333_v15 = vpop.f32.mrf.mxu0  ;;  %vm7713_vm13 = vcmp.eq.s32.totalorder %v1892_v8, 15  ;;  %v1733_v1 = vadd.f32 %v7323_v45, %v1678_v11  ;;  %v1099_v24 = vadd.f32 %v1098_v21, %v7294_v29  ;;  %v6260_v9 = vpop.f32.mrf.mxu1 }
 0x195   : > { %v3154_v16 = vpop.permute.xlu1 %3153  ;;  %v3152_v34 = vpop.permute.xlu0 %3151  ;;  %v7708_v46 = vmax.f32 %v1731_v20, 0.0  ;;  %v2566_v20 = vsel %vm7713_vm13, 0.0, %v7381_v55  ;;  %v2787_v27 = vsel %vm7722_vm14, 0.0, %v7710_v26  ;;  %v1906_v7 = vand.u32 15, %v1800_v17 }
 0x196   : > { %3292 = vst.msk [vmem:[#allocation2 + $0x20] sm:$0xff] %vm3287_vm5, %v3152_v34  ;;  %v1829_v34 = vadd.s32 304, %v7326_v56  ;;  %v1732_v39 = vadd.f32 %v7323_v45, %v1677_v28  ;;  %v1600_v42 = vpop.f32.mrf.mxu0  ;;  %v7746_v55 = vmax.f32 %v1733_v1, 0.0  ;;  %v1802_v25 = vadd.s32 88, %v7326_v56 }
 0x197   : > { %2923 = vrot.lane.b32.xlu1 %v7670_v0, %s6713_s10  ;;  %2921 = vrot.lane.b32.xlu0 %v7672_v38, %s6713_s10  ;;  %vm7751_vm15 = vcmp.eq.s32.totalorder %v1906_v7, 15  ;;  %v1831_v28 = vadd.s32 320, %v7326_v56  ;;  %v1804_v7 = vadd.s32 104, %v7326_v56 }
 0x198   : > { %v2109_v29 = vand.u32 15, %v1829_v34  ;;  %v6336_v8 = vpop.f32.mrf.mxu0  ;;  %v2568_v34 = vsel %vm7751_vm15, 0.0, %v7398_v50 }
 0x199   : > { %v2868_v12 = vpop.permute.xlu1 %2867  ;;  %v2866_v53 = vpop.permute.xlu0 %2865 }
 0x19a   : > { %3005 = vst.msk [vmem:[#allocation2 + $0x39] sm:$0xff] %vm2997_vm2, %v2868_v12  ;;  %3004 = vst.msk [vmem:[#allocation2 + $0x31] sm:$0xff] %vm2997_vm2, %v2866_v53  ;;  %v7748_v12 = vmax.f32 %v1732_v39, 0.0  ;;  %v1680_v53 = vadd.f32 %v6333_v15, %v1104_v36  ;;  %vm7760_vm3 = vcmp.eq.s32.totalorder %v2109_v29, 0  ;;  %v8847_v15 = vld [vmem:[#allocation3_spill] sm:$0xff]  ;;  %v1610_v36 = vpop.f32.mrf.mxu0  ;;  %v1920_v39 = vand.u32 15, %v1802_v25 }
 0x19b   : > { %3052 = vst.msk [vmem:[#allocation2 + $0x2a] sm:$0xff] %vm3046_vm4, %v2564_v30  ;;  %3053 = vst.msk [vmem:[#allocation2 + $0x32] sm:$0xff] %vm3046_vm4, %v7383_v57  ;;  %3213 = vrot.lane.b32.xlu1 %v7670_v0, %s6712_s9  ;;  %3211 = vrot.lane.b32.xlu0 %v2785_v23, %s6712_s9  ;;  %v1679_v30 = vadd.f32 %v1600_v42, %v1099_v24  ;;  %v1108_v23 = vpop.f32.mrf.mxu1  ;;  %v8860_v29 = vld [vmem:[#allocation7_spill] sm:$0xff] }
 0x19c   : > { %3293 = vst.msk [vmem:[#allocation2 + $0x28] sm:$0xff] %vm3287_vm5, %v3154_v16  ;;  %v1109_v57 = vadd.f32 %v1108_v23, %v8847_v15  ;;  %vm7789_vm6 = vcmp.eq.s32.totalorder %v1920_v39, 15 }
 0x19d   : > { %v3158_v19 = vpop.permute.xlu1 %3157  ;;  %v3156_v3 = vpop.permute.xlu0 %3155  ;;  %v1734_v21 = vadd.f32 %v7323_v45, %v1679_v30  ;;  %v7806_v30 = vld [vmem:[%s8814_s2] ss:$0 sm:$0xff] }
 0x19e   : > { %3294 = vst.msk [vmem:[#allocation2 + $0x30] sm:$0xff] %vm3287_vm5, %v3156_v3  ;;  %v1114_v3 = vadd.f32 %v6260_v9, %v7298_v31  ;;  %v6263_v1 = vpop.f32.mrf.mxu1  ;;  %v2789_v31 = vsel %vm7760_vm3, 0.0, %v7748_v12 }
 0x19f   : > { %2927 = vrot.lane.b32.xlu1 %v7708_v46, %s6713_s10  ;;  %2925 = vrot.lane.b32.xlu0 %v7710_v26, %s6713_s10  ;;  %v7786_v24 = vmax.f32 %v1734_v21, 0.0 }
 0x1a0   : > { %v1118_v42 = vpop.f32.mrf.mxu1 }
 0x1a1   : > { %v2872_v32 = vpop.permute.xlu1 %2871  ;;  %v2870_v59 = vpop.permute.xlu0 %2869 }
 0x1a2   : > { %3007 = vst.msk [vmem:[#allocation2 + $0x49] sm:$0xff] %vm2997_vm2, %v2872_v32  ;;  %3006 = vst.msk [vmem:[#allocation2 + $0x41] sm:$0xff] %vm2997_vm2, %v2870_v59  ;;  %v1682_v32 = vadd.f32 %v6336_v8, %v1114_v3  ;;  %v1681_v59 = vadd.f32 %v1610_v36, %v1109_v57  ;;  %v6266_v3 = vpop.f32.mrf.mxu1  ;;  %v1934_v57 = vand.u32 15, %v1804_v7 }
 0x1a3   : > { %3054 = vst.msk [vmem:[#allocation2 + $0x3a] sm:$0xff] %vm3046_vm4, %v2566_v20  ;;  %3055 = vst.msk [vmem:[#allocation2 + $0x42] sm:$0xff] %vm3046_vm4, %v7400_v51  ;;  %3217 = vrot.lane.b32.xlu1 %v7708_v46, %s6712_s9  ;;  %3215 = vrot.lane.b32.xlu0 %v2787_v27, %s6712_s9  ;;  %v6339_v27 = vpop.f32.mrf.mxu0  ;;  %v8853_v51 = vld [vmem:[#allocation5_spill] sm:$0xff] }
 0x1a4   : > { %3295 = vst.msk [vmem:[#allocation2 + $0x38] sm:$0xff] %vm3287_vm5, %v3158_v19  ;;  %v1735_v19 = vadd.f32 %v7323_v45, %v1680_v53  ;;  %v2123_v45 = vand.u32 15, %v1831_v28  ;;  %v1833_v53 = vadd.s32 336, %v7326_v56  ;;  %v1736_v8 = vadd.f32 %v7806_v30, %v1681_v59  ;;  %v1128_v39 = vpop.f32.mrf.mxu1 }
 0x1a5   : > { %v3162_v47 = vpop.permute.xlu1 %3161  ;;  %v3160_v61 = vpop.permute.xlu0 %3159  ;;  %v1119_v25 = vadd.f32 %v1118_v42, %v8853_v51  ;;  %vm7832_vm9 = vcmp.eq.s32.totalorder %v1934_v57, 15  ;;  %v1808_v57 = vadd.s32 136, %v7326_v56 }
 0x1a6   : > { %3296 = vst.msk [vmem:[#allocation2 + $0x40] sm:$0xff] %vm3287_vm5, %v3160_v61  ;;  %v7784_v50 = vmax.f32 %v1735_v19, 0.0  ;;  %vm7798_vm7 = vcmp.eq.s32.totalorder %v2123_v45, 0  ;;  %v8852_v61 = vld [vmem:[#allocation4_spill] sm:$0xff]  ;;  %v2570_v19 = vsel %vm7789_vm6, 0.0, %v7415_v43  ;;  %v1620_v21 = vpop.f32.mrf.mxu0  ;;  %v2137_v43 = vand.u32 15, %v1833_v53 }
 0x1a7   : > { %2931 = vrot.lane.b32.xlu1 %v7746_v55, %s6713_s10  ;;  %2929 = vrot.lane.b32.xlu0 %v7748_v12, %s6713_s10  ;;  %v1124_v23 = vadd.f32 %v6263_v1, %v8852_v61  ;;  %v2791_v15 = vsel %vm7798_vm7, 0.0, %v7786_v24  ;;  %v1683_v1 = vadd.f32 %v1620_v21, %v1119_v25  ;;  %v1129_v53 = vadd.f32 %v1128_v39, %v8860_v29 }
 0x1a8   : > { %v6342_v45 = vpop.f32.mrf.mxu0  ;;  %vm7841_vm10 = vcmp.eq.s32.totalorder %v2137_v43, 0  ;;  %v1837_v43 = vadd.s32 368, %v7326_v56 }
 0x1a9   : > { %v2876_v17 = vpop.permute.xlu1 %2875  ;;  %v2874_v16 = vpop.permute.xlu0 %2873  ;;  %v1738_v7 = vadd.f32 %v7806_v30, %v1683_v1 }
 0x1aa   : > { %3009 = vst.msk [vmem:[#allocation2 + $0x59] sm:$0xff] %vm2997_vm2, %v2876_v17  ;;  %3008 = vst.msk [vmem:[#allocation2 + $0x51] sm:$0xff] %vm2997_vm2, %v2874_v16  ;;  %v7829_v16 = vmax.f32 %v1736_v8, 0.0  ;;  %v1630_v8 = vpop.f32.mrf.mxu0 }
 0x1ab   : > { %3056 = vst.msk [vmem:[#allocation2 + $0x4a] sm:$0xff] %vm3046_vm4, %v2568_v34  ;;  %3057 = vst.msk [vmem:[#allocation2 + $0x52] sm:$0xff] %vm3046_vm4, %v7417_v62  ;;  %3221 = vrot.lane.b32.xlu1 %v7746_v55, %s6712_s9  ;;  %3219 = vrot.lane.b32.xlu0 %v2789_v31, %s6712_s9  ;;  %v1684_v34 = vadd.f32 %v6339_v27, %v1124_v23  ;;  %v8859_v27 = vld [vmem:[#allocation6_spill] sm:$0xff]  ;;  %v2572_v23 = vsel %vm7832_vm9, 0.0, %v7432_v2 }
 0x1ac   : > { %3297 = vst.msk [vmem:[#allocation2 + $0x48] sm:$0xff] %vm3287_vm5, %v3162_v47  ;;  %v1737_v47 = vadd.f32 %v7806_v30, %v1682_v32  ;;  %v1806_v32 = vadd.s32 120, %v7326_v56  ;;  %v1134_v62 = vadd.f32 %v6266_v3, %v8859_v27  ;;  %v2793_v51 = vsel %vm7841_vm10, 0.0, %v7829_v16 }
 0x1ad   : > { %v3166_v20 = vpop.permute.xlu1 %3165  ;;  %v3164_v9 = vpop.permute.xlu0 %3163  ;;  %v1739_v42 = vadd.f32 %v7806_v30, %v1684_v34  ;;  %v1685_v3 = vadd.f32 %v1630_v8, %v1129_v53  ;;  %v1812_v53 = vadd.s32 168, %v7326_v56 }
 0x1ae   : > { %3298 = vst.msk [vmem:[#allocation2 + $0x50] sm:$0xff] %vm3287_vm5, %v3164_v9  ;;  %v7827_v17 = vmax.f32 %v1737_v47, 0.0  ;;  %v8858_v9 = vmov 0.0   ;;  %v1948_v25 = vand.u32 15, %v1806_v32 }
 0x1af   : > { %2935 = vrot.lane.b32.xlu1 %v7784_v50, %s6713_s10  ;;  %2933 = vrot.lane.b32.xlu0 %v7786_v24, %s6713_s10  ;;  %2800 = vst.msk [vmem:[#allocation2 + $0x180] sm:$0xff] %vm2799_vm8, %v8858_v9  ;;  %2801 = vst.msk [vmem:[#allocation2 + $0x188] sm:$0xff] %vm2799_vm8, %v8858_v9  ;;  %v1740_v1 = vadd.f32 %v7806_v30, %v1685_v3 }
 0x1b0   : > { %2802 = vst.msk [vmem:[#allocation2 + $0x190] sm:$0xff] %vm2799_vm8, %v8858_v9  ;;  %2803 = vst.msk [vmem:[#allocation2 + $0x198] sm:$0xff] %vm2799_vm8, %v8858_v9  ;;  %vm7880_vm11 = vcmp.eq.s32.totalorder %v1948_v25, 15  ;;  %v1814_v25 = vadd.s32 184, %v7326_v56 }
 0x1b1   : > { %v2880_v11 = vpop.permute.xlu1 %2879  ;;  %v2878_v28 = vpop.permute.xlu0 %2877  ;;  %2804 = vst.msk [vmem:[#allocation2 + $0x1a0] sm:$0xff] %vm2799_vm8, %v8858_v9  ;;  %v2574_v39 = vsel %vm7880_vm11, 0.0, %v7449_v48  ;;  %v7907_v32 = vmax.f32 %v1740_v1, 0.0  ;;  %v1810_v9 = vadd.s32 152, %v7326_v56  ;;  %v1818_v1 = vadd.s32 216, %v7326_v56 }
 0x1b2   : > { %3011 = vst.msk [vmem:[#allocation2 + $0x69] sm:$0xff] %vm2997_vm2, %v2880_v11  ;;  %3010 = vst.msk [vmem:[#allocation2 + $0x61] sm:$0xff] %vm2997_vm2, %v2878_v28  ;;  %v7875_v11 = vmax.f32 %v1739_v42, 0.0  ;;  %v7877_v28 = vmax.f32 %v1738_v7, 0.0  ;;  %v2004_v3 = vand.u32 15, %v1814_v25 }
 0x1b3   : > { %3058 = vst.msk [vmem:[#allocation2 + $0x5a] sm:$0xff] %vm3046_vm4, %v2570_v19  ;;  %3059 = vst.msk [vmem:[#allocation2 + $0x62] sm:$0xff] %vm3046_vm4, %v7434_v4  ;;  %3225 = vrot.lane.b32.xlu1 %v7784_v50, %s6712_s9  ;;  %3223 = vrot.lane.b32.xlu0 %v2791_v15, %s6712_s9  ;;  %v1686_v19 = vadd.f32 %v6342_v45, %v1134_v62  ;;  %v1962_v4 = vand.u32 15, %v1808_v57  ;;  %v1976_v7 = vand.u32 15, %v1810_v9 }
 0x1b4   : > { %3299 = vst.msk [vmem:[#allocation2 + $0x58] sm:$0xff] %vm3287_vm5, %v3166_v20  ;;  %v1835_v20 = vadd.s32 352, %v7326_v56  ;;  %vm2438_vm6 = vcmp.eq.s32.totalorder %v2004_v3, 15 }
 0x1b5   : > { %v3170_v36 = vpop.permute.xlu1 %3169  ;;  %v3168_v31 = vpop.permute.xlu0 %3167  ;;  %v1741_v34 = vadd.f32 %v7806_v30, %v1686_v19  ;;  %v2165_v30 = vand.u32 15, %v1837_v43  ;;  %vm2432_vm13 = vcmp.eq.s32.totalorder %v1962_v4, 15  ;;  %vm2434_vm15 = vcmp.eq.s32.totalorder %v1976_v7, 15 }
 0x1b6   : > { %3300 = vst.msk [vmem:[#allocation2 + $0x60] sm:$0xff] %vm3287_vm5, %v3168_v31  ;;  %v2151_v2 = vand.u32 15, %v1835_v20  ;;  %v2576_v27 = vsel %vm2432_vm13, 0.0, %v7466_v58  ;;  %v2582_v57 = vsel %vm2438_vm6, 0.0, %v7517_v33  ;;  %v1820_v4 = vadd.s32 232, %v7326_v56 }
 0x1b7   : > { %2939 = vrot.lane.b32.xlu1 %v7827_v17, %s6713_s10  ;;  %2937 = vrot.lane.b32.xlu0 %v7829_v16, %s6713_s10  ;;  %v7905_v48 = vmax.f32 %v1741_v34, 0.0  ;;  %vm2653_vm14 = vcmp.eq.s32.totalorder %v2165_v30, 0 }
 0x1b8   : > { %vm2651_vm12 = vcmp.eq.s32.totalorder %v2151_v2, 0  ;;  %v2797_v62 = vsel %vm2653_vm14, 0.0, %v7907_v32 }
 0x1b9   : > { %v2884_v47 = vpop.permute.xlu1 %2883  ;;  %v2882_v61 = vpop.permute.xlu0 %2881  ;;  %v2795_v45 = vsel %vm2651_vm12, 0.0, %v7877_v28 }
 0x1ba   : > { %3013 = vst.msk [vmem:[#allocation2 + $0x79] sm:$0xff] %vm2997_vm2, %v2884_v47  ;;  %3012 = vst.msk [vmem:[#allocation2 + $0x71] sm:$0xff] %vm2997_vm2, %v2882_v61 }
 0x1bb   : > { %3060 = vst.msk [vmem:[#allocation2 + $0x6a] sm:$0xff] %vm3046_vm4, %v2572_v23  ;;  %3061 = vst.msk [vmem:[#allocation2 + $0x72] sm:$0xff] %vm3046_vm4, %v7451_v49  ;;  %3229 = vrot.lane.b32.xlu1 %v7827_v17, %s6712_s9  ;;  %3227 = vrot.lane.b32.xlu0 %v2793_v51, %s6712_s9  ;;  %v2578_v23 = vsel %vm2434_vm15, 0.0, %v7483_v52 }
 0x1bc   : > { %3301 = vst.msk [vmem:[#allocation2 + $0x68] sm:$0xff] %vm3287_vm5, %v3170_v36 }
 0x1bd   : > { %v3174_v21 = vpop.permute.xlu1 %3173  ;;  %v3172_v15 = vpop.permute.xlu0 %3171 }
 0x1be   : > { %3302 = vst.msk [vmem:[#allocation2 + $0x70] sm:$0xff] %vm3287_vm5, %v3172_v15  ;;  %v1816_v15 = vadd.s32 200, %v7326_v56 }
 0x1bf   : > { %2943 = vrot.lane.b32.xlu1 %v7875_v11, %s6713_s10  ;;  %2941 = vrot.lane.b32.xlu0 %v7877_v28, %s6713_s10 }
 0x1c0   : > { %v2018_v43 = vand.u32 15, %v1816_v15 }
 0x1c1   : > { %v2888_v36 = vpop.permute.xlu1 %2887  ;;  %v2886_v31 = vpop.permute.xlu0 %2885 }
 0x1c2   : > { %3015 = vst.msk [vmem:[#allocation2 + $0x89] sm:$0xff] %vm2997_vm2, %v2888_v36  ;;  %3014 = vst.msk [vmem:[#allocation2 + $0x81] sm:$0xff] %vm2997_vm2, %v2886_v31  ;;  %vm2440_vm7 = vcmp.eq.s32.totalorder %v2018_v43, 15  ;;  %v1832_v43 = vadd.s32 328, %v7326_v56 }
 0x1c3   : > { %3062 = vst.msk [vmem:[#allocation2 + $0x7a] sm:$0xff] %vm3046_vm4, %v2574_v39  ;;  %3063 = vst.msk [vmem:[#allocation2 + $0x82] sm:$0xff] %vm3046_vm4, %v7468_v60  ;;  %3233 = vrot.lane.b32.xlu1 %v7875_v11, %s6712_s9  ;;  %3231 = vrot.lane.b32.xlu0 %v2795_v45, %s6712_s9  ;;  %v2584_v31 = vsel %vm2440_vm7, 0.0, %v7534_v41  ;;  %v2032_v39 = vand.u32 15, %v1818_v1 }
 0x1c4   : > { %3303 = vst.msk [vmem:[#allocation2 + $0x78] sm:$0xff] %vm3287_vm5, %v3174_v21  ;;  %v2130_v1 = vand.u32 15, %v1832_v43 }
 0x1c5   : > { %v3178_v59 = vpop.permute.xlu1 %3177  ;;  %v3176_v20 = vpop.permute.xlu0 %3175  ;;  %vm2442_vm9 = vcmp.eq.s32.totalorder %v2032_v39, 15 }
 0x1c6   : > { %3304 = vst.msk [vmem:[#allocation2 + $0x80] sm:$0xff] %vm3287_vm5, %v3176_v20  ;;  %v2046_v20 = vand.u32 15, %v1820_v4  ;;  %v1836_v4 = vadd.s32 360, %v7326_v56 }
 0x1c7   : > { %2947 = vrot.lane.b32.xlu1 %v7905_v48, %s6713_s10  ;;  %2945 = vrot.lane.b32.xlu0 %v7907_v32, %s6713_s10 }
 0x1c8   : > { %vm2444_vm10 = vcmp.eq.s32.totalorder %v2046_v20, 15 }
 0x1c9   : > { %v2892_v60 = vpop.permute.xlu1 %2891  ;;  %v2890_v42 = vpop.permute.xlu0 %2889 }
 0x1ca   : > { %3017 = vst.msk [vmem:[#allocation2 + $0x99] sm:$0xff] %vm2997_vm2, %v2892_v60  ;;  %3016 = vst.msk [vmem:[#allocation2 + $0x91] sm:$0xff] %vm2997_vm2, %v2890_v42  ;;  %v1822_v60 = vadd.s32 248, %v7326_v56 }
 0x1cb   : > { %3064 = vst.msk [vmem:[#allocation2 + $0x8a] sm:$0xff] %vm3046_vm4, %v2576_v27  ;;  %3065 = vst.msk [vmem:[#allocation2 + $0x92] sm:$0xff] %vm3046_vm4, %v7485_v54  ;;  %3237 = vrot.lane.b32.xlu1 %v7905_v48, %s6712_s9  ;;  %3235 = vrot.lane.b32.xlu0 %v2797_v62, %s6712_s9  ;;  %v1990_v54 = vand.u32 15, %v1812_v53  ;;  %v2588_v27 = vsel %vm2444_vm10, 0.0, %v7568_v35 }
 0x1cc   : > { %3305 = vst.msk [vmem:[#allocation2 + $0x88] sm:$0xff] %vm3287_vm5, %v3178_v59  ;;  %v2586_v59 = vsel %vm2442_vm9, 0.0, %v7551_v44  ;;  %v2060_v62 = vand.u32 15, %v1822_v60 }
 0x1cd   : > { %v3182_v58 = vpop.permute.xlu1 %3181  ;;  %v3180_v29 = vpop.permute.xlu0 %3179  ;;  %vm2436_vm3 = vcmp.eq.s32.totalorder %v1990_v54, 15 }
 0x1ce   : > { %3306 = vst.msk [vmem:[#allocation2 + $0x90] sm:$0xff] %vm3287_vm5, %v3180_v29  ;;  %v2580_v19 = vsel %vm2436_vm3, 0.0, %v7500_v37  ;;  %vm2446_vm11 = vcmp.eq.s32.totalorder %v2060_v62, 15  ;;  %vm2456_vm3 = vcmp.eq.s32.totalorder %v2130_v1, 15 }
 0x1cf   : > { %v2590_v53 = vsel %vm2446_vm11, 0.0, %v7589_v40  ;;  %v2600_v39 = vsel %vm2456_vm3, 0.0, %v7784_v50  ;;  %v1838_v50 = vadd.s32 376, %v7326_v56 }
 0x1d1   : > { %v2896_v47 = vpop.permute.xlu1 %2895  ;;  %v2894_v61 = vpop.permute.xlu0 %2893  ;;  %v2172_v20 = vand.u32 15, %v1838_v50 }
 0x1d2   : > { %3019 = vst.msk [vmem:[#allocation2 + $0xa9] sm:$0xff] %vm2997_vm2, %v2896_v47  ;;  %3018 = vst.msk [vmem:[#allocation2 + $0xa1] sm:$0xff] %vm2997_vm2, %v2894_v61 }
 0x1d3   : > { %3066 = vst.msk [vmem:[#allocation2 + $0x9a] sm:$0xff] %vm3046_vm4, %v2578_v23  ;;  %3067 = vst.msk [vmem:[#allocation2 + $0xa2] sm:$0xff] %vm3046_vm4, %v7502_v6  ;;  %v1826_v23 = vadd.s32 280, %v7326_v56  ;;  %vm2462_vm9 = vcmp.eq.s32.totalorder %v2172_v20, 15 }
 0x1d4   : > { %3307 = vst.msk [vmem:[#allocation2 + $0x98] sm:$0xff] %vm3287_vm5, %v3182_v58  ;;  %v1824_v58 = vadd.s32 264, %v7326_v56 }
 0x1d5   : > { %v3186_v8 = vpop.permute.xlu1 %3185  ;;  %v3184_v51 = vpop.permute.xlu0 %3183 }
 0x1d6   : > { %3308 = vst.msk [vmem:[#allocation2 + $0xa0] sm:$0xff] %vm3287_vm5, %v3184_v51  ;;  %v2074_v47 = vand.u32 15, %v1824_v58  ;;  %v2088_v51 = vand.u32 15, %v1826_v23 }
 0x1d8   : > { %vm2448_vm12 = vcmp.eq.s32.totalorder %v2074_v47, 15  ;;  %vm2450_vm13 = vcmp.eq.s32.totalorder %v2088_v51, 15 }
 0x1d9   : > { %v2900_v52 = vpop.permute.xlu1 %2899  ;;  %v2898_v2 = vpop.permute.xlu0 %2897 }
 0x1da   : > { %3021 = vst.msk [vmem:[#allocation2 + $0xb9] sm:$0xff] %vm2997_vm2, %v2900_v52  ;;  %3020 = vst.msk [vmem:[#allocation2 + $0xb1] sm:$0xff] %vm2997_vm2, %v2898_v2  ;;  %v1828_v52 = vadd.s32 296, %v7326_v56 }
 0x1db   : > { %3068 = vst.msk [vmem:[#allocation2 + $0xaa] sm:$0xff] %vm3046_vm4, %v2580_v19  ;;  %3069 = vst.msk [vmem:[#allocation2 + $0xb2] sm:$0xff] %vm3046_vm4, %v7519_v10  ;;  %v2594_v19 = vsel %vm2450_vm13, 0.0, %v7670_v0 }
 0x1dc   : > { %3309 = vst.msk [vmem:[#allocation2 + $0xa8] sm:$0xff] %vm3287_vm5, %v3186_v8  ;;  %v2592_v8 = vsel %vm2448_vm12, 0.0, %v7623_v5  ;;  %v2102_v3 = vand.u32 15, %v1828_v52 }
 0x1dd   : > { %v3190_v6 = vpop.permute.xlu1 %3189  ;;  %v3188_v21 = vpop.permute.xlu0 %3187 }
 0x1de   : > { %3310 = vst.msk [vmem:[#allocation2 + $0xb0] sm:$0xff] %vm3287_vm5, %v3188_v21  ;;  %vm2452_vm14 = vcmp.eq.s32.totalorder %v2102_v3, 15  ;;  %v1830_v21 = vadd.s32 312, %v7326_v56 }
 0x1e1   : > { %v2904_v37 = vpop.permute.xlu1 %2903  ;;  %v2902_v49 = vpop.permute.xlu0 %2901 }
 0x1e2   : > { %3023 = vst.msk [vmem:[#allocation2 + $0xc9] sm:$0xff] %vm2997_vm2, %v2904_v37  ;;  %3022 = vst.msk [vmem:[#allocation2 + $0xc1] sm:$0xff] %vm2997_vm2, %v2902_v49  ;;  %v2596_v37 = vsel %vm2452_vm14, 0.0, %v7708_v46  ;;  %v2116_v49 = vand.u32 15, %v1830_v21 }
 0x1e3   : > { %3070 = vst.msk [vmem:[#allocation2 + $0xba] sm:$0xff] %vm3046_vm4, %v2582_v57  ;;  %3071 = vst.msk [vmem:[#allocation2 + $0xc2] sm:$0xff] %vm3046_vm4, %v7536_v14 }
 0x1e4   : > { %3311 = vst.msk [vmem:[#allocation2 + $0xb8] sm:$0xff] %vm3287_vm5, %v3190_v6  ;;  %vm2454_vm15 = vcmp.eq.s32.totalorder %v2116_v49, 15 }
 0x1e5   : > { %v3194_v10 = vpop.permute.xlu1 %3193  ;;  %v3192_v34 = vpop.permute.xlu0 %3191 }
 0x1e6   : > { %3312 = vst.msk [vmem:[#allocation2 + $0xc0] sm:$0xff] %vm3287_vm5, %v3192_v34  ;;  %v2598_v34 = vsel %vm2454_vm15, 0.0, %v7746_v55 }
 0x1e9   : > { %v2908_v33 = vpop.permute.xlu1 %2907  ;;  %v2906_v36 = vpop.permute.xlu0 %2905 }
 0x1ea   : > { %3025 = vst.msk [vmem:[#allocation2 + $0xd9] sm:$0xff] %vm2997_vm2, %v2908_v33  ;;  %3024 = vst.msk [vmem:[#allocation2 + $0xd1] sm:$0xff] %vm2997_vm2, %v2906_v36  ;;  %v1834_v36 = vadd.s32 344, %v7326_v56 }
 0x1eb   : > { %3072 = vst.msk [vmem:[#allocation2 + $0xca] sm:$0xff] %vm3046_vm4, %v2584_v31  ;;  %3073 = vst.msk [vmem:[#allocation2 + $0xd2] sm:$0xff] %vm3046_vm4, %v7553_v18 }
 0x1ec   : > { %3313 = vst.msk [vmem:[#allocation2 + $0xc8] sm:$0xff] %vm3287_vm5, %v3194_v10 }
 0x1ed   : > { %v3198_v14 = vpop.permute.xlu1 %3197  ;;  %v3196_v45 = vpop.permute.xlu0 %3195 }
 0x1ee   : > { %3314 = vst.msk [vmem:[#allocation2 + $0xd0] sm:$0xff] %vm3287_vm5, %v3196_v45 }
 0x1f1   : > { %v2912_v41 = vpop.permute.xlu1 %2911  ;;  %v2910_v30 = vpop.permute.xlu0 %2909 }
 0x1f2   : > { %3027 = vst.msk [vmem:[#allocation2 + $0xe9] sm:$0xff] %vm2997_vm2, %v2912_v41  ;;  %3026 = vst.msk [vmem:[#allocation2 + $0xe1] sm:$0xff] %vm2997_vm2, %v2910_v30 }
 0x1f3   : > { %3074 = vst.msk [vmem:[#allocation2 + $0xda] sm:$0xff] %vm3046_vm4, %v2586_v59  ;;  %3075 = vst.msk [vmem:[#allocation2 + $0xe2] sm:$0xff] %vm3046_vm4, %v7570_v22 }
 0x1f4   : > { %3315 = vst.msk [vmem:[#allocation2 + $0xd8] sm:$0xff] %vm3287_vm5, %v3198_v14  ;;  %v2144_v14 = vand.u32 15, %v1834_v36 }
 0x1f5   : > { %v3202_v18 = vpop.permute.xlu1 %3201  ;;  %v3200_v9 = vpop.permute.xlu0 %3199 }
 0x1f6   : > { %3316 = vst.msk [vmem:[#allocation2 + $0xe0] sm:$0xff] %vm3287_vm5, %v3200_v9  ;;  %vm2458_vm6 = vcmp.eq.s32.totalorder %v2144_v14, 15 }
 0x1f7   : > { %v2602_v59 = vsel %vm2458_vm6, 0.0, %v7827_v17 }
 0x1f9   : > { %v2916_v44 = vpop.permute.xlu1 %2915  ;;  %v2914_v42 = vpop.permute.xlu0 %2913 }
 0x1fa   : > { %3029 = vst.msk [vmem:[#allocation2 + $0xf9] sm:$0xff] %vm2997_vm2, %v2916_v44  ;;  %3028 = vst.msk [vmem:[#allocation2 + $0xf1] sm:$0xff] %vm2997_vm2, %v2914_v42  ;;  %v2606_v44 = vsel %vm2462_vm9, 0.0, %v7905_v48 }
 0x1fb   : > { %3076 = vst.msk [vmem:[#allocation2 + $0xea] sm:$0xff] %vm3046_vm4, %v2588_v27  ;;  %3077 = vst.msk [vmem:[#allocation2 + $0xf2] sm:$0xff] %vm3046_vm4, %v7591_v13 }
 0x1fc   : > { %3317 = vst.msk [vmem:[#allocation2 + $0xe8] sm:$0xff] %vm3287_vm5, %v3202_v18 }
 0x1fd   : > { %v3206_v22 = vpop.permute.xlu1 %3205  ;;  %v3204_v7 = vpop.permute.xlu0 %3203 }
 0x1fe   : > { %3318 = vst.msk [vmem:[#allocation2 + $0xf0] sm:$0xff] %vm3287_vm5, %v3204_v7 }
 0x201   : > { %v2920_v35 = vpop.permute.xlu1 %2919  ;;  %v2918_v29 = vpop.permute.xlu0 %2917 }
 0x202   : > { %3031 = vst.msk [vmem:[#allocation2 + $0x109] sm:$0xff] %vm2997_vm2, %v2920_v35  ;;  %3030 = vst.msk [vmem:[#allocation2 + $0x101] sm:$0xff] %vm2997_vm2, %v2918_v29 }
 0x203   : > { %3078 = vst.msk [vmem:[#allocation2 + $0xfa] sm:$0xff] %vm3046_vm4, %v2590_v53  ;;  %3079 = vst.msk [vmem:[#allocation2 + $0x102] sm:$0xff] %vm3046_vm4, %v7625_v63 }
 0x204   : > { %3319 = vst.msk [vmem:[#allocation2 + $0xf8] sm:$0xff] %vm3287_vm5, %v3206_v22 }
 0x205   : > { %v3210_v13 = vpop.permute.xlu1 %3209  ;;  %v3208_v61 = vpop.permute.xlu0 %3207 }
 0x206   : > { %3320 = vst.msk [vmem:[#allocation2 + $0x100] sm:$0xff] %vm3287_vm5, %v3208_v61 }
 0x209   : > { %v2924_v40 = vpop.permute.xlu1 %2923  ;;  %v2922_v54 = vpop.permute.xlu0 %2921 }
 0x20a   : > { %3033 = vst.msk [vmem:[#allocation2 + $0x119] sm:$0xff] %vm2997_vm2, %v2924_v40  ;;  %3032 = vst.msk [vmem:[#allocation2 + $0x111] sm:$0xff] %vm2997_vm2, %v2922_v54 }
 0x20b   : > { %3080 = vst.msk [vmem:[#allocation2 + $0x10a] sm:$0xff] %vm3046_vm4, %v2592_v8  ;;  %3081 = vst.msk [vmem:[#allocation2 + $0x112] sm:$0xff] %vm3046_vm4, %v7672_v38 }
 0x20c   : > { %3321 = vst.msk [vmem:[#allocation2 + $0x108] sm:$0xff] %vm3287_vm5, %v3210_v13 }
 0x20d   : > { %v3214_v63 = vpop.permute.xlu1 %3213  ;;  %v3212_v25 = vpop.permute.xlu0 %3211 }
 0x20e   : > { %3322 = vst.msk [vmem:[#allocation2 + $0x110] sm:$0xff] %vm3287_vm5, %v3212_v25 }
 0x211   : > { %v2928_v5 = vpop.permute.xlu1 %2927  ;;  %v2926_v2 = vpop.permute.xlu0 %2925 }
 0x212   : > { %3035 = vst.msk [vmem:[#allocation2 + $0x129] sm:$0xff] %vm2997_vm2, %v2928_v5  ;;  %3034 = vst.msk [vmem:[#allocation2 + $0x121] sm:$0xff] %vm2997_vm2, %v2926_v2 }
 0x213   : > { %3082 = vst.msk [vmem:[#allocation2 + $0x11a] sm:$0xff] %vm3046_vm4, %v2594_v19  ;;  %3083 = vst.msk [vmem:[#allocation2 + $0x122] sm:$0xff] %vm3046_vm4, %v7710_v26 }
 0x214   : > { %3323 = vst.msk [vmem:[#allocation2 + $0x118] sm:$0xff] %vm3287_vm5, %v3214_v63 }
 0x215   : > { %v3218_v38 = vpop.permute.xlu1 %3217  ;;  %v3216_v6 = vpop.permute.xlu0 %3215 }
 0x216   : > { %3324 = vst.msk [vmem:[#allocation2 + $0x120] sm:$0xff] %vm3287_vm5, %v3216_v6 }
 0x219   : > { %v2932_v0 = vpop.permute.xlu1 %2931  ;;  %v2930_v15 = vpop.permute.xlu0 %2929 }
 0x21a   : > { %3037 = vst.msk [vmem:[#allocation2 + $0x139] sm:$0xff] %vm2997_vm2, %v2932_v0  ;;  %3036 = vst.msk [vmem:[#allocation2 + $0x131] sm:$0xff] %vm2997_vm2, %v2930_v15 }
 0x21b   : > { %3084 = vst.msk [vmem:[#allocation2 + $0x12a] sm:$0xff] %vm3046_vm4, %v2596_v37  ;;  %3085 = vst.msk [vmem:[#allocation2 + $0x132] sm:$0xff] %vm3046_vm4, %v7748_v12 }
 0x21c   : > { %3325 = vst.msk [vmem:[#allocation2 + $0x128] sm:$0xff] %vm3287_vm5, %v3218_v38 }
 0x21d   : > { %v3222_v26 = vpop.permute.xlu1 %3221  ;;  %v3220_v57 = vpop.permute.xlu0 %3219 }
 0x21e   : > { %3326 = vst.msk [vmem:[#allocation2 + $0x130] sm:$0xff] %vm3287_vm5, %v3220_v57 }
 0x221   : > { %v2936_v46 = vpop.permute.xlu1 %2935  ;;  %v2934_v10 = vpop.permute.xlu0 %2933 }
 0x222   : > { %3039 = vst.msk [vmem:[#allocation2 + $0x149] sm:$0xff] %vm2997_vm2, %v2936_v46  ;;  %3038 = vst.msk [vmem:[#allocation2 + $0x141] sm:$0xff] %vm2997_vm2, %v2934_v10 }
 0x223   : > { %3086 = vst.msk [vmem:[#allocation2 + $0x13a] sm:$0xff] %vm3046_vm4, %v2598_v34  ;;  %3087 = vst.msk [vmem:[#allocation2 + $0x142] sm:$0xff] %vm3046_vm4, %v7786_v24 }
 0x224   : > { %3327 = vst.msk [vmem:[#allocation2 + $0x138] sm:$0xff] %vm3287_vm5, %v3222_v26 }
 0x225   : > { %v3226_v12 = vpop.permute.xlu1 %3225  ;;  %v3224_v33 = vpop.permute.xlu0 %3223 }
 0x226   : > { %3328 = vst.msk [vmem:[#allocation2 + $0x140] sm:$0xff] %vm3287_vm5, %v3224_v33 }
 0x229   : > { %v2940_v55 = vpop.permute.xlu1 %2939  ;;  %v2938_v31 = vpop.permute.xlu0 %2937 }
 0x22a   : > { %3041 = vst.msk [vmem:[#allocation2 + $0x159] sm:$0xff] %vm2997_vm2, %v2940_v55  ;;  %3040 = vst.msk [vmem:[#allocation2 + $0x151] sm:$0xff] %vm2997_vm2, %v2938_v31 }
 0x22b   : > { %3088 = vst.msk [vmem:[#allocation2 + $0x14a] sm:$0xff] %vm3046_vm4, %v2600_v39  ;;  %3089 = vst.msk [vmem:[#allocation2 + $0x152] sm:$0xff] %vm3046_vm4, %v7829_v16  ;;  %v2158_v16 = vand.u32 15, %v1836_v4 }
 0x22c   : > { %3329 = vst.msk [vmem:[#allocation2 + $0x148] sm:$0xff] %vm3287_vm5, %v3226_v12 }
 0x22d   : > { %v3230_v24 = vpop.permute.xlu1 %3229  ;;  %v3228_v45 = vpop.permute.xlu0 %3227  ;;  %vm2460_vm7 = vcmp.eq.s32.totalorder %v2158_v16, 15 }
 0x22e   : > { %3330 = vst.msk [vmem:[#allocation2 + $0x150] sm:$0xff] %vm3287_vm5, %v3228_v45  ;;  %v2604_v60 = vsel %vm2460_vm7, 0.0, %v7875_v11 }
 0x231   : > { %v2944_v41 = vpop.permute.xlu1 %2943  ;;  %v2942_v30 = vpop.permute.xlu0 %2941 }
 0x232   : > { %3043 = vst.msk [vmem:[#allocation2 + $0x169] sm:$0xff] %vm2997_vm2, %v2944_v41  ;;  %3042 = vst.msk [vmem:[#allocation2 + $0x161] sm:$0xff] %vm2997_vm2, %v2942_v30 }
 0x233   : > { %3090 = vst.msk [vmem:[#allocation2 + $0x15a] sm:$0xff] %vm3046_vm4, %v2602_v59  ;;  %3091 = vst.msk [vmem:[#allocation2 + $0x162] sm:$0xff] %vm3046_vm4, %v7877_v28 }
 0x234   : > { %3331 = vst.msk [vmem:[#allocation2 + $0x158] sm:$0xff] %vm3287_vm5, %v3230_v24 }
 0x235   : > { %v3234_v18 = vpop.permute.xlu1 %3233  ;;  %v3232_v9 = vpop.permute.xlu0 %3231 }
 0x236   : > { %3332 = vst.msk [vmem:[#allocation2 + $0x160] sm:$0xff] %vm3287_vm5, %v3232_v9 }
 0x239   : > { %v2948_v56 = vpop.permute.xlu1 %2947  ;;  %v2946_v17 = vpop.permute.xlu0 %2945 }
 0x23a   : > { %3045 = vst.msk [vmem:[#allocation2 + $0x179] sm:$0xff] %vm2997_vm2, %v2948_v56  ;;  %3044 = vst.msk [vmem:[#allocation2 + $0x171] sm:$0xff] %vm2997_vm2, %v2946_v17  ;;  %3341 = sbr.rel (%p5562_p5) target bundleno = 578 (0x242), region = 52 }
 0x23b   : > { %3094 = vst.msk [vmem:[#allocation2 + $0x17a] sm:$0xff] %vm3046_vm4, %v2606_v44  ;;  %3092 = vst.msk [vmem:[#allocation2 + $0x16a] sm:$0xff] %vm3046_vm4, %v2604_v60 }
 0x23c   : > { %3093 = vst.msk [vmem:[#allocation2 + $0x172] sm:$0xff] %vm3046_vm4, %v7907_v32 }
 0x23d   : > { %3333 = vst.msk [vmem:[#allocation2 + $0x168] sm:$0xff] %vm3287_vm5, %v3234_v18  ;;  %v3238_v28 = vpop.permute.xlu1 %3237  ;;  %v3236_v42 = vpop.permute.xlu0 %3235 }
 0x23e   : > { %3335 = vst.msk [vmem:[#allocation2 + $0x178] sm:$0xff] %vm3287_vm5, %v3238_v28  ;;  %3334 = vst.msk [vmem:[#allocation2 + $0x170] sm:$0xff] %vm3287_vm5, %v3236_v42 }
 0x23f   : > { %v6715_v11 = vmov 0.0  }
 0x240   : > { %3342 = vst.msk [vmem:[#allocation2 + $0x1] sm:$0xff] %vm2799_vm8, %v6715_v11  ;;  %3343 = vst.msk [vmem:[#allocation2 + $0x9] sm:$0xff] %vm2799_vm8, %v6715_v11 }
 0x241   : > { %3344 = vst.msk [vmem:[#allocation2 + $0xc1] sm:$0xff] %vm2799_vm8, %v6715_v11  ;;  %3345 = vst.msk [vmem:[#allocation2 + $0xc9] sm:$0xff] %vm2799_vm8, %v6715_v11 }
 0x242 PF: > { %p5563_p6 = scmp.ne.s32.totalorder %s6702_s24, 1 }
 0x244   : > { %3349 = sbr.rel (%p5563_p6) target bundleno = 588 (0x24c), region = 56 }
 0x249   : > { %v6716_v48 = vmov 0.0  }
 0x24a   : > { %3350 = vst.msk [vmem:[#allocation2 + $0x91] sm:$0xff] %vm2799_vm8, %v6716_v48  ;;  %3351 = vst.msk [vmem:[#allocation2 + $0x99] sm:$0xff] %vm2799_vm8, %v6716_v48 }
 0x24b   : > { %3352 = vst.msk [vmem:[#allocation2 + $0x151] sm:$0xff] %vm2799_vm8, %v6716_v48  ;;  %3353 = vst.msk [vmem:[#allocation2 + $0x159] sm:$0xff] %vm2799_vm8, %v6716_v48 }
 0x24c PF: > { %v3409_v32 = vld [vmem:[%s8815_s3 + $0x28] sm:$0xff]  ;;  %v3404_v27 = vld [vmem:[%s8815_s3 + $0x10] sm:$0xff]  ;;  %v3408_v62 = vld [vmem:[%s8815_s3 + $0x20] sm:$0xff] }
 0x24d   : > { %6343 = vmatprep.subr.mxu1 %v3409_v32  ;;  %6421 = vmatprep.subr.mxu0 %v3404_v27  ;;  %v3403_v22 = vld [vmem:[%s8815_s3 + $0x8] sm:$0xff]  ;;  %v3407_v7 = vld [vmem:[%s8815_s3 + $0x18] sm:$0xff]  ;;  %v3402_v58 = vld [vmem:[%s8815_s3] sm:$0xff] }
 0x24e   : > { %6344 = vmatpush3.msra.mxu1 %v3409_v32  ;;  %6422 = vmatpush3.msra.mxu0 %v3404_v27  ;;  %v3356_v35 = vld [vmem:[#allocation2 + $0x11] sm:$0xff]  ;;  %v3354_v29 = vld [vmem:[#allocation2 + $0x1] sm:$0xff]  ;;  %v3357_v53 = vld [vmem:[#allocation2 + $0x19] sm:$0xff] }
 0x24f   : > { %6345 = vmatprep.subr.mxu1 %v3408_v62  ;;  %6423 = vmatprep.subr.mxu0 %v3403_v22  ;;  %v3355_v47 = vld [vmem:[#allocation2 + $0x9] sm:$0xff]  ;;  %v4188_v13 = vld [vmem:[%s8815_s3 + $0x40] sm:$0xff]  ;;  %v8100_v54 = vld [vmem:[#allocation2 + $0x31] sm:$0xff] }
 0x250   : > { %6346 = vmatpush3.msra.mxu1 %v3408_v62  ;;  %6424 = vmatpush3.msra.mxu0 %v3403_v22  ;;  %v4703_v61 = vld [vmem:[%s8817_s5 + $0x8] sm:$0xf]  ;;  %v4187_v8 = vld [vmem:[%s8815_s3 + $0x38] sm:$0xff]  ;;  %v4702_v51 = vld [vmem:[%s8817_s5] sm:$0xff] }
 0x251   : > { %6347 = vmatprep.subr.mxu1 %v3407_v7  ;;  %6425 = vmatprep.subr.mxu0 %v3402_v58  ;;  %v8094_v23 = vld [vmem:[#allocation2 + $0x21] sm:$0xff]  ;;  %v8097_v40 = vld [vmem:[#allocation2 + $0x29] sm:$0xff]  ;;  %v8118_v63 = vld [vmem:[#allocation2 + $0x39] sm:$0xff] }
 0x252   : > { %6348 = vmatpush3.msra.mxu1 %v3407_v7  ;;  %6349 = vmatprep.mubr.msk.f32.mxu1 %vm2799_vm8, %v3356_v35  ;;  %v8120_v25 = vld [vmem:[#allocation2 + $0x41] sm:$0xff]  ;;  %v4186_v52 = vld [vmem:[%s8815_s3 + $0x30] sm:$0xff]  ;;  %v8145_v19 = vld [vmem:[#allocation2 + $0x59] sm:$0xff] }
 0x253   : > { %6426 = vmatpush3.msra.mxu0 %v3402_v58  ;;  %6427 = vmatprep.mubr.msk.f32.mxu0 %vm2799_vm8, %v3354_v29  ;;  %v8133_v5 = vld [vmem:[#allocation2 + $0x49] sm:$0xff]  ;;  %v8135_v2 = vld [vmem:[#allocation2 + $0x51] sm:$0xff]  ;;  %v8147_v3 = vld [vmem:[#allocation2 + $0x61] sm:$0xff] }
 0x254   : > { %6350 = vmatmul.mubr.msk.f32.vlgmr.msra.gmra.mxu1 %vm2799_vm8, %v3357_v53  ;;  %6428 = vmatmul.mubr.msk.f32.vlgmr.msra.gmra.mxu0 %vm2799_vm8, %v3355_v47  ;;  %v8157_v38 = vld [vmem:[#allocation2 + $0x69] sm:$0xff]  ;;  %v8159_v6 = vld [vmem:[#allocation2 + $0x71] sm:$0xff]  ;;  %v8169_v21 = vld [vmem:[#allocation2 + $0x79] sm:$0xff] }
 0x255   : > { %6499 = vmatprep.subr.mxu1 %v4188_v13  ;;  %6577 = vmatprep.subr.msk.mxu0 %vm514_vm0, %v4703_v61  ;;  %v8171_v0 = vld [vmem:[#allocation2 + $0x81] sm:$0xff]  ;;  %v8181_v15 = vld [vmem:[#allocation2 + $0x89] sm:$0xff]  ;;  %v8183_v37 = vld [vmem:[#allocation2 + $0x91] sm:$0xff] }
 0x256   : > { %6500 = vmatpush3.msra.mxu1 %v4188_v13  ;;  %6578 = vmatpush3.msk.msra.mxu0 %vm514_vm0, %v4703_v61  ;;  %v8193_v49 = vld [vmem:[#allocation2 + $0x99] sm:$0xff]  ;;  %v8195_v26 = vld [vmem:[#allocation2 + $0xa1] sm:$0xff]  ;;  %v8205_v57 = vld [vmem:[#allocation2 + $0xa9] sm:$0xff] }
 0x257   : > { %6352 = vmatprep.mubr.msk.f32.mxu1 %vm2799_vm8, %v8094_v23  ;;  %6430 = vmatprep.mubr.msk.f32.mxu0 %vm2799_vm8, %v3356_v35  ;;  %v8207_v43 = vld [vmem:[#allocation2 + $0xb1] sm:$0xff]  ;;  %v8217_v46 = vld [vmem:[#allocation2 + $0xb9] sm:$0xff]  ;;  %v8219_v10 = vld [vmem:[#allocation2 + $0xc1] sm:$0xff] }
 0x258   : > { %6353 = vmatmul.mubr.msk.f32.gmra.mxu1 %vm2799_vm8, %v8097_v40  ;;  %6431 = vmatmul.mubr.msk.f32.gmra.mxu0 %vm2799_vm8, %v3357_v53  ;;  %v8229_v34 = vld [vmem:[#allocation2 + $0xc9] sm:$0xff]  ;;  %v8231_v1 = vld [vmem:[#allocation2 + $0xd1] sm:$0xff]  ;;  %v8241_v12 = vld [vmem:[#allocation2 + $0xd9] sm:$0xff] }
 0x259   : > { %6355 = vmatprep.mubr.msk.f32.mxu1 %vm2799_vm8, %v8100_v54  ;;  %6433 = vmatprep.mubr.msk.f32.mxu0 %vm2799_vm8, %v8094_v23  ;;  %v8243_v33 = vld [vmem:[#allocation2 + $0xe1] sm:$0xff]  ;;  %v8253_v36 = vld [vmem:[#allocation2 + $0xe9] sm:$0xff]  ;;  %v8255_v55 = vld [vmem:[#allocation2 + $0xf1] sm:$0xff] }
 0x25a   : > { %6501 = vmatprep.subr.mxu1 %v4187_v8  ;;  %6579 = vmatprep.subr.mxu0 %v4702_v51  ;;  %v8265_v31 = vld [vmem:[#allocation2 + $0xf9] sm:$0xff]  ;;  %v8267_v39 = vld [vmem:[#allocation2 + $0x101] sm:$0xff]  ;;  %v8277_v14 = vld [vmem:[#allocation2 + $0x109] sm:$0xff] }
 0x25b   : > { %6502 = vmatpush3.msra.mxu1 %v4187_v8  ;;  %6580 = vmatpush3.msra.mxu0 %v4702_v51  ;;  %v8279_v24 = vld [vmem:[#allocation2 + $0x111] sm:$0xff]  ;;  %v8289_v45 = vld [vmem:[#allocation2 + $0x119] sm:$0xff]  ;;  %v8291_v4 = vld [vmem:[#allocation2 + $0x121] sm:$0xff] }
 0x25c   : > { %6356 = vmatmul.mubr.msk.f32.gmra.mxu1 %vm2799_vm8, %v8118_v63  ;;  %6434 = vmatmul.mubr.msk.f32.gmra.mxu0 %vm2799_vm8, %v8097_v40  ;;  %v8301_v50 = vld [vmem:[#allocation2 + $0x129] sm:$0xff]  ;;  %v8303_v41 = vld [vmem:[#allocation2 + $0x131] sm:$0xff]  ;;  %v8313_v30 = vld [vmem:[#allocation2 + $0x139] sm:$0xff] }
 0x25d   : > { %6358 = vmatprep.mubr.msk.f32.mxu1 %vm2799_vm8, %v8120_v25  ;;  %6436 = vmatprep.mubr.msk.f32.mxu0 %vm2799_vm8, %v8100_v54  ;;  %v8315_v59 = vld [vmem:[#allocation2 + $0x141] sm:$0xff]  ;;  %v8325_v16 = vld [vmem:[#allocation2 + $0x149] sm:$0xff]  ;;  %v8327_v20 = vld [vmem:[#allocation2 + $0x151] sm:$0xff] }
 0x25e   : > { %6503 = vmatprep.subr.mxu1 %v4186_v52  ;;  %v8337_v18 = vld [vmem:[#allocation2 + $0x159] sm:$0xff]  ;;  %v8339_v9 = vld [vmem:[#allocation2 + $0x161] sm:$0xff]  ;;  %v8349_v56 = vld [vmem:[#allocation2 + $0x169] sm:$0xff] }
 0x25f   : > { %6504 = vmatpush3.msra.mxu1 %v4186_v52  ;;  %v8351_v17 = vld [vmem:[#allocation2 + $0x171] sm:$0xff]  ;;  %v8361_v60 = vld [vmem:[#allocation2 + $0x179] sm:$0xff]  ;;  %v8363_v44 = vld [vmem:[#allocation2 + $0x181] sm:$0xff] }
 0x260   : > { %6359 = vmatmul.mubr.msk.f32.gmra.mxu1 %vm2799_vm8, %v8133_v5  ;;  %6437 = vmatmul.mubr.msk.f32.gmra.mxu0 %vm2799_vm8, %v8118_v63  ;;  %v8373_v28 = vld [vmem:[#allocation2 + $0x189] sm:$0xff]  ;;  %v4654_v42 = vld [vmem:[%s6805_s21 + $0x20] sm:$0xff]  ;;  %v4657_v32 = vld [vmem:[%s6805_s21 + $0x38] sm:$0xff] }
 0x261   : > { %6361 = vmatprep.mubr.msk.f32.mxu1 %vm2799_vm8, %v8135_v2  ;;  %6439 = vmatprep.mubr.msk.f32.mxu0 %vm2799_vm8, %v8120_v25  ;;  %v4655_v11 = vld [vmem:[%s6805_s21 + $0x28] sm:$0xff]  ;;  %v4656_v48 = vld [vmem:[%s6805_s21 + $0x30] sm:$0xff]  ;;  %v4658_v27 = vld [vmem:[%s6805_s21 + $0x40] sm:$0xff] }
 0x262   : > { %v4659_v62 = vld [vmem:[%s6805_s21 + $0x48] sm:$0xff]  ;;  %v4660_v22 = vld [vmem:[%s6805_s21 + $0x50] sm:$0xff]  ;;  %v4661_v7 = vld [vmem:[%s6805_s21 + $0x58] sm:$0xff] }
 0x263   : > { %v4662_v58 = vld [vmem:[%s6805_s21 + $0x60] sm:$0xff]  ;;  %v4663_v35 = vld [vmem:[%s6805_s21 + $0x68] sm:$0xff]  ;;  %v4664_v29 = vld [vmem:[%s6805_s21 + $0x70] sm:$0xff] }
 0x264   : > { %6362 = vmatmul.mubr.msk.f32.gmra.mxu1 %vm2799_vm8, %v8145_v19  ;;  %6440 = vmatmul.mubr.msk.f32.gmra.mxu0 %vm2799_vm8, %v8133_v5  ;;  %v4665_v53 = vld [vmem:[%s6805_s21 + $0x78] sm:$0xff]  ;;  %v4666_v47 = vld [vmem:[%s6805_s21 + $0x80] sm:$0xff]  ;;  %v4667_v13 = vld [vmem:[%s6805_s21 + $0x88] sm:$0xff] }
 0x265   : > { %6364 = vmatprep.mubr.msk.f32.mxu1 %vm2799_vm8, %v8147_v3  ;;  %6442 = vmatprep.mubr.msk.f32.mxu0 %vm2799_vm8, %v8135_v2  ;;  %v4668_v61 = vld [vmem:[%s6805_s21 + $0x90] sm:$0xff]  ;;  %v4673_v51 = vld [vmem:[%s6805_s21 + $0xb8] sm:$0xff] }
 0x266   : > { %v4672_v8 = vld [vmem:[%s6805_s21 + $0xb0] sm:$0xff] }
 0x267   : > { %v4676_v52 = vld [vmem:[%s6805_s21 + $0xd0] sm:$0xff] }
 0x268   : > { %6365 = vmatmul.mubr.msk.f32.gmra.mxu1 %vm2799_vm8, %v8157_v38  ;;  %6443 = vmatmul.mubr.msk.f32.gmra.mxu0 %vm2799_vm8, %v8145_v19 }
 0x269   : > { %6367 = vmatprep.mubr.msk.f32.mxu1 %vm2799_vm8, %v8159_v6  ;;  %6445 = vmatprep.mubr.msk.f32.mxu0 %vm2799_vm8, %v8147_v3 }
 0x26c   : > { %6368 = vmatmul.mubr.msk.f32.gmra.mxu1 %vm2799_vm8, %v8169_v21  ;;  %6446 = vmatmul.mubr.msk.f32.gmra.mxu0 %vm2799_vm8, %v8157_v38 }
 0x26d   : > { %6370 = vmatprep.mubr.msk.f32.mxu1 %vm2799_vm8, %v8171_v0  ;;  %6448 = vmatprep.mubr.msk.f32.mxu0 %vm2799_vm8, %v8159_v6 }
 0x270   : > { %6371 = vmatmul.mubr.msk.f32.gmra.mxu1 %vm2799_vm8, %v8181_v15  ;;  %6449 = vmatmul.mubr.msk.f32.gmra.mxu0 %vm2799_vm8, %v8169_v21 }
 0x271   : > { %6373 = vmatprep.mubr.msk.f32.mxu1 %vm2799_vm8, %v8183_v37  ;;  %6451 = vmatprep.mubr.msk.f32.mxu0 %vm2799_vm8, %v8171_v0 }
 0x274   : > { %6374 = vmatmul.mubr.msk.f32.gmra.mxu1 %vm2799_vm8, %v8193_v49  ;;  %6452 = vmatmul.mubr.msk.f32.gmra.mxu0 %vm2799_vm8, %v8181_v15 }
 0x275   : > { %6376 = vmatprep.mubr.msk.f32.mxu1 %vm2799_vm8, %v8195_v26  ;;  %6454 = vmatprep.mubr.msk.f32.mxu0 %vm2799_vm8, %v8183_v37 }
 0x278   : > { %6377 = vmatmul.mubr.msk.f32.gmra.mxu1 %vm2799_vm8, %v8205_v57  ;;  %6455 = vmatmul.mubr.msk.f32.gmra.mxu0 %vm2799_vm8, %v8193_v49 }
 0x279   : > { %6379 = vmatprep.mubr.msk.f32.mxu1 %vm2799_vm8, %v8207_v43  ;;  %6457 = vmatprep.mubr.msk.f32.mxu0 %vm2799_vm8, %v8195_v26 }
 0x27c   : > { %6380 = vmatmul.mubr.msk.f32.gmra.mxu1 %vm2799_vm8, %v8217_v46  ;;  %6458 = vmatmul.mubr.msk.f32.gmra.mxu0 %vm2799_vm8, %v8205_v57 }
 0x27d   : > { %6382 = vmatprep.mubr.msk.f32.mxu1 %vm2799_vm8, %v8219_v10  ;;  %6460 = vmatprep.mubr.msk.f32.mxu0 %vm2799_vm8, %v8207_v43 }
 0x280   : > { %6383 = vmatmul.mubr.msk.f32.gmra.mxu1 %vm2799_vm8, %v8229_v34  ;;  %6461 = vmatmul.mubr.msk.f32.gmra.mxu0 %vm2799_vm8, %v8217_v46 }
 0x281   : > { %6385 = vmatprep.mubr.msk.f32.mxu1 %vm2799_vm8, %v8231_v1  ;;  %6463 = vmatprep.mubr.msk.f32.mxu0 %vm2799_vm8, %v8219_v10 }
 0x284   : > { %6386 = vmatmul.mubr.msk.f32.gmra.mxu1 %vm2799_vm8, %v8241_v12  ;;  %6464 = vmatmul.mubr.msk.f32.gmra.mxu0 %vm2799_vm8, %v8229_v34 }
 0x285   : > { %6388 = vmatprep.mubr.msk.f32.mxu1 %vm2799_vm8, %v8243_v33  ;;  %6466 = vmatprep.mubr.msk.f32.mxu0 %vm2799_vm8, %v8231_v1 }
 0x288   : > { %6389 = vmatmul.mubr.msk.f32.gmra.mxu1 %vm2799_vm8, %v8253_v36  ;;  %6467 = vmatmul.mubr.msk.f32.gmra.mxu0 %vm2799_vm8, %v8241_v12 }
 0x289   : > { %6391 = vmatprep.mubr.msk.f32.mxu1 %vm2799_vm8, %v8255_v55  ;;  %6469 = vmatprep.mubr.msk.f32.mxu0 %vm2799_vm8, %v8243_v33 }
 0x28c   : > { %6392 = vmatmul.mubr.msk.f32.gmra.mxu1 %vm2799_vm8, %v8265_v31  ;;  %6470 = vmatmul.mubr.msk.f32.gmra.mxu0 %vm2799_vm8, %v8253_v36 }
 0x28d   : > { %6394 = vmatprep.mubr.msk.f32.mxu1 %vm2799_vm8, %v8267_v39  ;;  %6472 = vmatprep.mubr.msk.f32.mxu0 %vm2799_vm8, %v8255_v55 }
 0x290   : > { %6395 = vmatmul.mubr.msk.f32.gmra.mxu1 %vm2799_vm8, %v8277_v14  ;;  %6473 = vmatmul.mubr.msk.f32.gmra.mxu0 %vm2799_vm8, %v8265_v31 }
 0x291   : > { %6397 = vmatprep.mubr.msk.f32.mxu1 %vm2799_vm8, %v8279_v24  ;;  %6475 = vmatprep.mubr.msk.f32.mxu0 %vm2799_vm8, %v8267_v39 }
 0x294   : > { %6398 = vmatmul.mubr.msk.f32.gmra.mxu1 %vm2799_vm8, %v8289_v45  ;;  %6476 = vmatmul.mubr.msk.f32.gmra.mxu0 %vm2799_vm8, %v8277_v14 }
 0x295   : > { %6400 = vmatprep.mubr.msk.f32.mxu1 %vm2799_vm8, %v8291_v4  ;;  %6478 = vmatprep.mubr.msk.f32.mxu0 %vm2799_vm8, %v8279_v24 }
 0x298   : > { %6401 = vmatmul.mubr.msk.f32.gmra.mxu1 %vm2799_vm8, %v8301_v50  ;;  %6479 = vmatmul.mubr.msk.f32.gmra.mxu0 %vm2799_vm8, %v8289_v45 }
 0x299   : > { %6403 = vmatprep.mubr.msk.f32.mxu1 %vm2799_vm8, %v8303_v41  ;;  %6481 = vmatprep.mubr.msk.f32.mxu0 %vm2799_vm8, %v8291_v4 }
 0x29c   : > { %6404 = vmatmul.mubr.msk.f32.gmra.mxu1 %vm2799_vm8, %v8313_v30  ;;  %6482 = vmatmul.mubr.msk.f32.gmra.mxu0 %vm2799_vm8, %v8301_v50 }
 0x29d   : > { %6406 = vmatprep.mubr.msk.f32.mxu1 %vm2799_vm8, %v8315_v59  ;;  %6484 = vmatprep.mubr.msk.f32.mxu0 %vm2799_vm8, %v8303_v41 }
 0x2a0   : > { %6407 = vmatmul.mubr.msk.f32.gmra.mxu1 %vm2799_vm8, %v8325_v16  ;;  %6485 = vmatmul.mubr.msk.f32.gmra.mxu0 %vm2799_vm8, %v8313_v30 }
 0x2a1   : > { %6409 = vmatprep.mubr.msk.f32.mxu1 %vm2799_vm8, %v8327_v20  ;;  %6487 = vmatprep.mubr.msk.f32.mxu0 %vm2799_vm8, %v8315_v59 }
 0x2a4   : > { %6410 = vmatmul.mubr.msk.f32.gmra.mxu1 %vm2799_vm8, %v8337_v18  ;;  %6488 = vmatmul.mubr.msk.f32.gmra.mxu0 %vm2799_vm8, %v8325_v16 }
 0x2a5   : > { %6412 = vmatprep.mubr.msk.f32.mxu1 %vm2799_vm8, %v8339_v9  ;;  %6490 = vmatprep.mubr.msk.f32.mxu0 %vm2799_vm8, %v8327_v20 }
 0x2a8   : > { %6413 = vmatmul.mubr.msk.f32.gmra.mxu1 %vm2799_vm8, %v8349_v56  ;;  %6491 = vmatmul.mubr.msk.f32.gmra.mxu0 %vm2799_vm8, %v8337_v18 }
 0x2a9   : > { %6415 = vmatprep.mubr.msk.f32.mxu1 %vm2799_vm8, %v8351_v17  ;;  %6493 = vmatprep.mubr.msk.f32.mxu0 %vm2799_vm8, %v8339_v9 }
 0x2ac   : > { %6416 = vmatmul.mubr.msk.f32.gmra.mxu1 %vm2799_vm8, %v8361_v60  ;;  %6494 = vmatmul.mubr.msk.f32.gmra.mxu0 %vm2799_vm8, %v8349_v56 }
 0x2ad   : > { %6418 = vmatprep.mubr.msk.f32.mxu1 %vm2799_vm8, %v8363_v44  ;;  %6496 = vmatprep.mubr.msk.f32.mxu0 %vm2799_vm8, %v8351_v17 }
 0x2b0   : > { %6419 = vmatmul.mubr.msk.f32.gmra.mxu1 %vm2799_vm8, %v8373_v28  ;;  %6497 = vmatmul.mubr.msk.f32.gmra.mxu0 %vm2799_vm8, %v8361_v60 }
 0x2b1   : > { %6505 = vmatprep.mubr.msk.f32.mxu1 %vm2799_vm8, %v8094_v23  ;;  %6581 = vmatprep.mubr.msk.f32.mxu0 %vm369_vm1, %v4654_v42  ;;  %v4669_v23 = vld [vmem:[%s6805_s21 + $0x98] sm:$0xff] }
 0x2b4   : > { %6506 = vmatmul.mubr.msk.f32.vlgmr.msra.gmra.mxu1 %vm2799_vm8, %v8097_v40  ;;  %6582 = vmatmul.mubr.msk.f32.vlgmr.msra.gmra.mxu0 %vm369_vm1, %v4655_v11  ;;  %v4670_v40 = vld [vmem:[%s6805_s21 + $0xa0] sm:$0xff] }
 0x2b5   : > { %6508 = vmatprep.mubr.msk.f32.mxu1 %vm2799_vm8, %v8100_v54  ;;  %6584 = vmatprep.mubr.msk.f32.mxu0 %vm369_vm1, %v4656_v48  ;;  %v4671_v54 = vld [vmem:[%s6805_s21 + $0xa8] sm:$0xff] }
 0x2b8   : > { %6509 = vmatmul.mubr.msk.f32.gmra.mxu1 %vm2799_vm8, %v8118_v63  ;;  %6585 = vmatmul.mubr.msk.f32.gmra.mxu0 %vm369_vm1, %v4657_v32  ;;  %v4674_v63 = vld [vmem:[%s6805_s21 + $0xc0] sm:$0xff] }
 0x2b9   : > { %6511 = vmatprep.mubr.msk.f32.mxu1 %vm2799_vm8, %v8120_v25  ;;  %6587 = vmatprep.mubr.msk.f32.mxu0 %vm369_vm1, %v4658_v27  ;;  %v4675_v25 = vld [vmem:[%s6805_s21 + $0xc8] sm:$0xff] }
 0x2bc   : > { %6512 = vmatmul.mubr.msk.f32.gmra.mxu1 %vm2799_vm8, %v8133_v5  ;;  %6588 = vmatmul.mubr.msk.f32.gmra.mxu0 %vm369_vm1, %v4659_v62  ;;  %v4677_v5 = vld [vmem:[%s6805_s21 + $0xd8] sm:$0xff] }
 0x2bd   : > { %6514 = vmatprep.mubr.msk.f32.mxu1 %vm2799_vm8, %v8135_v2  ;;  %6590 = vmatprep.mubr.msk.f32.mxu0 %vm369_vm1, %v4660_v22  ;;  %v4678_v2 = vld [vmem:[%s6805_s21 + $0xe0] sm:$0xff] }
 0x2c0   : > { %6515 = vmatmul.mubr.msk.f32.gmra.mxu1 %vm2799_vm8, %v8145_v19  ;;  %6591 = vmatmul.mubr.msk.f32.gmra.mxu0 %vm369_vm1, %v4661_v7  ;;  %v4679_v19 = vld [vmem:[%s6805_s21 + $0xe8] sm:$0xff] }
 0x2c1   : > { %6517 = vmatprep.mubr.msk.f32.mxu1 %vm2799_vm8, %v8147_v3  ;;  %6593 = vmatprep.mubr.msk.f32.mxu0 %vm369_vm1, %v4662_v58  ;;  %v4680_v3 = vld [vmem:[%s6805_s21 + $0xf0] sm:$0xff] }
 0x2c4   : > { %6518 = vmatmul.mubr.msk.f32.gmra.mxu1 %vm2799_vm8, %v8157_v38  ;;  %6594 = vmatmul.mubr.msk.f32.gmra.mxu0 %vm369_vm1, %v4663_v35  ;;  %v4681_v38 = vld [vmem:[%s6805_s21 + $0xf8] sm:$0xff] }
 0x2c5   : > { %6520 = vmatprep.mubr.msk.f32.mxu1 %vm2799_vm8, %v8159_v6  ;;  %6596 = vmatprep.mubr.msk.f32.mxu0 %vm369_vm1, %v4664_v29  ;;  %v4682_v6 = vld [vmem:[%s6805_s21 + $0x100] sm:$0xff] }
 0x2c8   : > { %6521 = vmatmul.mubr.msk.f32.gmra.mxu1 %vm2799_vm8, %v8169_v21  ;;  %6597 = vmatmul.mubr.msk.f32.gmra.mxu0 %vm369_vm1, %v4665_v53  ;;  %v4683_v21 = vld [vmem:[%s6805_s21 + $0x108] sm:$0xff] }
 0x2c9   : > { %6523 = vmatprep.mubr.msk.f32.mxu1 %vm2799_vm8, %v8171_v0  ;;  %6599 = vmatprep.mubr.msk.f32.mxu0 %vm369_vm1, %v4666_v47  ;;  %v4684_v0 = vld [vmem:[%s6805_s21 + $0x110] sm:$0xff] }
 0x2cc   : > { %6524 = vmatmul.mubr.msk.f32.gmra.mxu1 %vm2799_vm8, %v8181_v15  ;;  %6600 = vmatmul.mubr.msk.f32.gmra.mxu0 %vm369_vm1, %v4667_v13  ;;  %v4685_v15 = vld [vmem:[%s6805_s21 + $0x118] sm:$0xff] }
 0x2cd   : > { %6526 = vmatprep.mubr.msk.f32.mxu1 %vm2799_vm8, %v8183_v37  ;;  %6602 = vmatprep.mubr.msk.f32.mxu0 %vm369_vm1, %v4668_v61  ;;  %v4686_v37 = vld [vmem:[%s6805_s21 + $0x120] sm:$0xff] }
 0x2d0   : > { %6527 = vmatmul.mubr.msk.f32.gmra.mxu1 %vm2799_vm8, %v8193_v49  ;;  %6603 = vmatmul.mubr.msk.f32.gmra.mxu0 %vm369_vm1, %v4669_v23  ;;  %v4687_v49 = vld [vmem:[%s6805_s21 + $0x128] sm:$0xff] }
 0x2d1   : > { %6529 = vmatprep.mubr.msk.f32.mxu1 %vm2799_vm8, %v8195_v26  ;;  %6605 = vmatprep.mubr.msk.f32.mxu0 %vm369_vm1, %v4670_v40  ;;  %v4688_v26 = vld [vmem:[%s6805_s21 + $0x130] sm:$0xff] }
 0x2d4   : > { %6530 = vmatmul.mubr.msk.f32.gmra.mxu1 %vm2799_vm8, %v8205_v57  ;;  %6606 = vmatmul.mubr.msk.f32.gmra.mxu0 %vm369_vm1, %v4671_v54  ;;  %v4689_v57 = vld [vmem:[%s6805_s21 + $0x138] sm:$0xff] }
 0x2d5   : > { %6532 = vmatprep.mubr.msk.f32.mxu1 %vm2799_vm8, %v8207_v43  ;;  %6608 = vmatprep.mubr.msk.f32.mxu0 %vm369_vm1, %v4672_v8  ;;  %v4690_v43 = vld [vmem:[%s6805_s21 + $0x140] sm:$0xff] }
 0x2d8   : > { %6533 = vmatmul.mubr.msk.f32.gmra.mxu1 %vm2799_vm8, %v8217_v46  ;;  %6609 = vmatmul.mubr.msk.f32.gmra.mxu0 %vm369_vm1, %v4673_v51  ;;  %v4691_v46 = vld [vmem:[%s6805_s21 + $0x148] sm:$0xff] }
 0x2d9   : > { %6535 = vmatprep.mubr.msk.f32.mxu1 %vm2799_vm8, %v8219_v10  ;;  %6611 = vmatprep.mubr.msk.f32.mxu0 %vm369_vm1, %v4674_v63  ;;  %v4692_v10 = vld [vmem:[%s6805_s21 + $0x150] sm:$0xff] }
 0x2dc   : > { %6536 = vmatmul.mubr.msk.f32.gmra.mxu1 %vm2799_vm8, %v8229_v34  ;;  %6612 = vmatmul.mubr.msk.f32.gmra.mxu0 %vm369_vm1, %v4675_v25  ;;  %v4693_v34 = vld [vmem:[%s6805_s21 + $0x158] sm:$0xff] }
 0x2dd   : > { %6538 = vmatprep.mubr.msk.f32.mxu1 %vm2799_vm8, %v8231_v1  ;;  %6614 = vmatprep.mubr.msk.f32.mxu0 %vm369_vm1, %v4676_v52  ;;  %v4694_v1 = vld [vmem:[%s6805_s21 + $0x160] sm:$0xff] }
 0x2e0   : > { %6539 = vmatmul.mubr.msk.f32.gmra.mxu1 %vm2799_vm8, %v8241_v12  ;;  %6615 = vmatmul.mubr.msk.f32.gmra.mxu0 %vm369_vm1, %v4677_v5  ;;  %v4695_v12 = vld [vmem:[%s6805_s21 + $0x168] sm:$0xff] }
 0x2e1   : > { %6541 = vmatprep.mubr.msk.f32.mxu1 %vm2799_vm8, %v8243_v33  ;;  %6617 = vmatprep.mubr.msk.f32.mxu0 %vm369_vm1, %v4678_v2  ;;  %v4696_v33 = vld [vmem:[%s6805_s21 + $0x170] sm:$0xff] }
 0x2e4   : > { %6542 = vmatmul.mubr.msk.f32.gmra.mxu1 %vm2799_vm8, %v8253_v36  ;;  %6618 = vmatmul.mubr.msk.f32.gmra.mxu0 %vm369_vm1, %v4679_v19  ;;  %v4697_v36 = vld [vmem:[%s6805_s21 + $0x178] sm:$0xff] }
 0x2e5   : > { %6544 = vmatprep.mubr.msk.f32.mxu1 %vm2799_vm8, %v8255_v55  ;;  %6620 = vmatprep.mubr.msk.f32.mxu0 %vm369_vm1, %v4680_v3  ;;  %v4698_v55 = vld [vmem:[%s6805_s21 + $0x180] sm:$0xff] }
 0x2e8   : > { %6545 = vmatmul.mubr.msk.f32.gmra.mxu1 %vm2799_vm8, %v8265_v31  ;;  %6621 = vmatmul.mubr.msk.f32.gmra.mxu0 %vm369_vm1, %v4681_v38  ;;  %v4699_v31 = vld [vmem:[%s6805_s21 + $0x188] sm:$0xff] }
 0x2e9   : > { %6547 = vmatprep.mubr.msk.f32.mxu1 %vm2799_vm8, %v8267_v39  ;;  %6623 = vmatprep.mubr.msk.f32.mxu0 %vm369_vm1, %v4682_v6  ;;  %v4184_v39 = vld [vmem:[#allocation2 + $0x191] sm:$0xff] }
 0x2ec   : > { %6548 = vmatmul.mubr.msk.f32.gmra.mxu1 %vm2799_vm8, %v8277_v14  ;;  %6624 = vmatmul.mubr.msk.f32.gmra.mxu0 %vm369_vm1, %v4683_v21  ;;  %v4700_v14 = vld [vmem:[%s6805_s21 + $0x190] sm:$0xff] }
 0x2ed   : > { %6550 = vmatprep.mubr.msk.f32.mxu1 %vm2799_vm8, %v8279_v24  ;;  %6626 = vmatprep.mubr.msk.f32.mxu0 %vm369_vm1, %v4684_v0  ;;  %v4185_v24 = vld [vmem:[#allocation2 + $0x199] sm:$0xff] }
 0x2f0   : > { %6551 = vmatmul.mubr.msk.f32.gmra.mxu1 %vm2799_vm8, %v8289_v45  ;;  %6627 = vmatmul.mubr.msk.f32.gmra.mxu0 %vm369_vm1, %v4685_v15  ;;  %v4701_v45 = vld [vmem:[%s6805_s21 + $0x198] sm:$0xff] }
 0x2f1   : > { %6553 = vmatprep.mubr.msk.f32.mxu1 %vm2799_vm8, %v8291_v4  ;;  %6629 = vmatprep.mubr.msk.f32.mxu0 %vm369_vm1, %v4686_v37 }
 0x2f4   : > { %6554 = vmatmul.mubr.msk.f32.gmra.mxu1 %vm2799_vm8, %v8301_v50  ;;  %6630 = vmatmul.mubr.msk.f32.gmra.mxu0 %vm369_vm1, %v4687_v49 }
 0x2f5   : > { %6556 = vmatprep.mubr.msk.f32.mxu1 %vm2799_vm8, %v8303_v41  ;;  %6632 = vmatprep.mubr.msk.f32.mxu0 %vm369_vm1, %v4688_v26 }
 0x2f8   : > { %6557 = vmatmul.mubr.msk.f32.gmra.mxu1 %vm2799_vm8, %v8313_v30  ;;  %6633 = vmatmul.mubr.msk.f32.gmra.mxu0 %vm369_vm1, %v4689_v57 }
 0x2f9   : > { %6559 = vmatprep.mubr.msk.f32.mxu1 %vm2799_vm8, %v8315_v59  ;;  %6635 = vmatprep.mubr.msk.f32.mxu0 %vm369_vm1, %v4690_v43 }
 0x2fc   : > { %6560 = vmatmul.mubr.msk.f32.gmra.mxu1 %vm2799_vm8, %v8325_v16  ;;  %6636 = vmatmul.mubr.msk.f32.gmra.mxu0 %vm369_vm1, %v4691_v46 }
 0x2fd   : > { %6562 = vmatprep.mubr.msk.f32.mxu1 %vm2799_vm8, %v8327_v20  ;;  %6638 = vmatprep.mubr.msk.f32.mxu0 %vm369_vm1, %v4692_v10 }
 0x300   : > { %6563 = vmatmul.mubr.msk.f32.gmra.mxu1 %vm2799_vm8, %v8337_v18  ;;  %6639 = vmatmul.mubr.msk.f32.gmra.mxu0 %vm369_vm1, %v4693_v34 }
 0x301   : > { %6565 = vmatprep.mubr.msk.f32.mxu1 %vm2799_vm8, %v8339_v9  ;;  %6641 = vmatprep.mubr.msk.f32.mxu0 %vm369_vm1, %v4694_v1 }
 0x304   : > { %6566 = vmatmul.mubr.msk.f32.gmra.mxu1 %vm2799_vm8, %v8349_v56  ;;  %6642 = vmatmul.mubr.msk.f32.gmra.mxu0 %vm369_vm1, %v4695_v12 }
 0x305   : > { %6568 = vmatprep.mubr.msk.f32.mxu1 %vm2799_vm8, %v8351_v17  ;;  %6644 = vmatprep.mubr.msk.f32.mxu0 %vm369_vm1, %v4696_v33 }
 0x308   : > { %6569 = vmatmul.mubr.msk.f32.gmra.mxu1 %vm2799_vm8, %v8361_v60  ;;  %6645 = vmatmul.mubr.msk.f32.gmra.mxu0 %vm369_vm1, %v4697_v36 }
 0x309   : > { %6571 = vmatprep.mubr.msk.f32.mxu1 %vm2799_vm8, %v8363_v44  ;;  %6647 = vmatprep.mubr.msk.f32.mxu0 %vm369_vm1, %v4698_v55 }
 0x30c   : > { %6572 = vmatmul.mubr.msk.f32.gmra.mxu1 %vm2799_vm8, %v8373_v28  ;;  %6648 = vmatmul.mubr.msk.f32.gmra.mxu0 %vm369_vm1, %v4699_v31 }
 0x30d   : > { %6574 = vmatprep.mubr.msk.f32.mxu1 %vm2799_vm8, %v4184_v39  ;;  %6650 = vmatprep.mubr.msk.f32.mxu0 %vm369_vm1, %v4700_v14 }
 0x310   : > { %6575 = vmatmul.mubr.msk.f32.gmra.mxu1 %vm2799_vm8, %v4185_v24  ;;  %6651 = vmatmul.mubr.msk.f32.gmra.mxu0 %vm369_vm1, %v4701_v45 }
 0x314   : > { %v6351_v4 = vpop.f32.mrf.mxu1  ;;  %v6429_v50 = vpop.f32.mrf.mxu0 }
 0x315   : > { %v8569_v41 = vadd.f32 %v6429_v50, %v6351_v4 }
 0x316   : > { %v3620_v30 = vpop.f32.mrf.mxu1  ;;  %v3915_v59 = vpop.f32.mrf.mxu0 }
 0x317   : > { %v8571_v16 = vadd.f32 %v3915_v59, %v3620_v30 }
 0x318   : > { %v6354_v20 = vpop.f32.mrf.mxu1  ;;  %v6432_v18 = vpop.f32.mrf.mxu0 }
 0x319   : > { %v8573_v9 = vadd.f32 %v6432_v18, %v6354_v20 }
 0x31a   : > { %v3630_v56 = vpop.f32.mrf.mxu1  ;;  %v3925_v17 = vpop.f32.mrf.mxu0 }
 0x31b   : > { %v8575_v60 = vadd.f32 %v3925_v17, %v3630_v56 }
 0x31c   : > { %v6357_v44 = vpop.f32.mrf.mxu1  ;;  %v6435_v28 = vpop.f32.mrf.mxu0 }
 0x31d   : > { %v8577_v42 = vadd.f32 %v6435_v28, %v6357_v44 }
 0x31e   : > { %v3640_v11 = vpop.f32.mrf.mxu1  ;;  %v3935_v48 = vpop.f32.mrf.mxu0 }
 0x31f   : > { %v8579_v32 = vadd.f32 %v3935_v48, %v3640_v11 }
 0x320   : > { %v6360_v27 = vpop.f32.mrf.mxu1  ;;  %v6438_v62 = vpop.f32.mrf.mxu0 }
 0x321   : > { %v8581_v22 = vadd.f32 %v6438_v62, %v6360_v27 }
 0x322   : > { %v3650_v7 = vpop.f32.mrf.mxu1  ;;  %v3945_v58 = vpop.f32.mrf.mxu0 }
 0x323   : > { %v8583_v35 = vadd.f32 %v3945_v58, %v3650_v7 }
 0x324   : > { %v6363_v29 = vpop.f32.mrf.mxu1  ;;  %v6441_v53 = vpop.f32.mrf.mxu0 }
 0x325   : > { %v8585_v47 = vadd.f32 %v6441_v53, %v6363_v29 }
 0x326   : > { %v3660_v13 = vpop.f32.mrf.mxu1  ;;  %v3955_v61 = vpop.f32.mrf.mxu0 }
 0x327   : > { %v8587_v23 = vadd.f32 %v3955_v61, %v3660_v13 }
 0x328   : > { %v6366_v40 = vpop.f32.mrf.mxu1  ;;  %v6444_v54 = vpop.f32.mrf.mxu0 }
 0x329   : > { %v8589_v8 = vadd.f32 %v6444_v54, %v6366_v40 }
 0x32a   : > { %v3670_v51 = vpop.f32.mrf.mxu1  ;;  %v3965_v63 = vpop.f32.mrf.mxu0 }
 0x32b   : > { %v8591_v25 = vadd.f32 %v3965_v63, %v3670_v51 }
 0x32c   : > { %v6369_v52 = vpop.f32.mrf.mxu1  ;;  %v6447_v5 = vpop.f32.mrf.mxu0 }
 0x32d   : > { %v8593_v2 = vadd.f32 %v6447_v5, %v6369_v52 }
 0x32e   : > { %v3680_v19 = vpop.f32.mrf.mxu1  ;;  %v3975_v3 = vpop.f32.mrf.mxu0 }
 0x32f   : > { %v8595_v38 = vadd.f32 %v3975_v3, %v3680_v19 }
 0x330   : > { %v6372_v6 = vpop.f32.mrf.mxu1  ;;  %v6450_v21 = vpop.f32.mrf.mxu0 }
 0x331   : > { %v8597_v0 = vadd.f32 %v6450_v21, %v6372_v6 }
 0x332   : > { %v3690_v15 = vpop.f32.mrf.mxu1  ;;  %v3985_v37 = vpop.f32.mrf.mxu0 }
 0x333   : > { %v8599_v49 = vadd.f32 %v3985_v37, %v3690_v15 }
 0x334   : > { %v6375_v26 = vpop.f32.mrf.mxu1  ;;  %v6453_v57 = vpop.f32.mrf.mxu0 }
 0x336   : > { %v3700_v43 = vpop.f32.mrf.mxu1  ;;  %v3995_v46 = vpop.f32.mrf.mxu0 }
 0x338   : > { %v6378_v10 = vpop.f32.mrf.mxu1  ;;  %v6456_v34 = vpop.f32.mrf.mxu0 }
 0x33a   : > { %v3708_v1 = vpop.f32.mrf.mxu1  ;;  %v4003_v12 = vpop.f32.mrf.mxu0 }
 0x33c   : > { %v6381_v33 = vpop.f32.mrf.mxu1  ;;  %v6459_v36 = vpop.f32.mrf.mxu0 }
 0x33e   : > { %v3716_v55 = vpop.f32.mrf.mxu1  ;;  %v4011_v31 = vpop.f32.mrf.mxu0 }
 0x340   : > { %v6384_v39 = vpop.f32.mrf.mxu1  ;;  %v6462_v14 = vpop.f32.mrf.mxu0 }
 0x342   : > { %v3724_v24 = vpop.f32.mrf.mxu1  ;;  %v4019_v45 = vpop.f32.mrf.mxu0 }
 0x344   : > { %v6387_v4 = vpop.f32.mrf.mxu1  ;;  %v6465_v50 = vpop.f32.mrf.mxu0 }
 0x345   : > { %v8601_v30 = vadd.f32 %v6465_v50, %v6387_v4 }
 0x346   : > { %v3732_v59 = vpop.f32.mrf.mxu1  ;;  %v4027_v20 = vpop.f32.mrf.mxu0 }
 0x347   : > { %v8603_v18 = vadd.f32 %v4027_v20, %v3732_v59 }
 0x348   : > { %v6390_v56 = vpop.f32.mrf.mxu1  ;;  %v6468_v17 = vpop.f32.mrf.mxu0 }
 0x349   : > { %v8605_v44 = vadd.f32 %v6468_v17, %v6390_v56 }
 0x34a   : > { %v3742_v28 = vpop.f32.mrf.mxu1  ;;  %v4037_v11 = vpop.f32.mrf.mxu0 }
 0x34b   : > { %v8607_v48 = vadd.f32 %v4037_v11, %v3742_v28 }
 0x34c   : > { %v6393_v27 = vpop.f32.mrf.mxu1  ;;  %v6471_v62 = vpop.f32.mrf.mxu0 }
 0x34d   : > { %v8609_v7 = vadd.f32 %v6471_v62, %v6393_v27 }
 0x34e   : > { %v3752_v58 = vpop.f32.mrf.mxu1  ;;  %v4047_v29 = vpop.f32.mrf.mxu0 }
 0x34f   : > { %v8611_v53 = vadd.f32 %v4047_v29, %v3752_v58 }
 0x350   : > { %v6396_v13 = vpop.f32.mrf.mxu1  ;;  %v6474_v61 = vpop.f32.mrf.mxu0 }
 0x351   : > { %v8613_v40 = vadd.f32 %v6474_v61, %v6396_v13 }
 0x352   : > { %v3762_v54 = vpop.f32.mrf.mxu1  ;;  %v4057_v51 = vpop.f32.mrf.mxu0 }
 0x353   : > { %v8615_v63 = vadd.f32 %v4057_v51, %v3762_v54 }
 0x354   : > { %v6399_v52 = vpop.f32.mrf.mxu1  ;;  %v6477_v5 = vpop.f32.mrf.mxu0 }
 0x355   : > { %v8617_v19 = vadd.f32 %v6477_v5, %v6399_v52 }
 0x356   : > { %v3772_v3 = vpop.f32.mrf.mxu1  ;;  %v4067_v6 = vpop.f32.mrf.mxu0 }
 0x357   : > { %v8619_v21 = vadd.f32 %v4067_v6, %v3772_v3  ;;  %v8636_v3 = vld [vmem:[%s8816_s4] ss:$0 sm:$0xff] }
 0x358   : > { %v6402_v15 = vpop.f32.mrf.mxu1  ;;  %v6480_v37 = vpop.f32.mrf.mxu0 }
 0x359   : > { %v8621_v26 = vadd.f32 %v6480_v37, %v6402_v15 }
 0x35a   : > { %v3782_v57 = vpop.f32.mrf.mxu1  ;;  %v4077_v43 = vpop.f32.mrf.mxu0 }
 0x35b   : > { %v8623_v46 = vadd.f32 %v4077_v43, %v3782_v57 }
 0x35c   : > { %v6405_v10 = vpop.f32.mrf.mxu1  ;;  %v6483_v34 = vpop.f32.mrf.mxu0 }
 0x35d   : > { %v8625_v1 = vadd.f32 %v6483_v34, %v6405_v10  ;;  %v8644_v10 = vld [vmem:[%s8818_s6] ss:$0 sm:$0xff] }
 0x35e   : > { %v3792_v12 = vpop.f32.mrf.mxu1  ;;  %v4087_v33 = vpop.f32.mrf.mxu0 }
 0x35f   : > { %v8627_v36 = vadd.f32 %v4087_v33, %v3792_v12 }
 0x360   : > { %v6408_v55 = vpop.f32.mrf.mxu1  ;;  %v6486_v31 = vpop.f32.mrf.mxu0 }
 0x361   : > { %v8629_v39 = vadd.f32 %v6486_v31, %v6408_v55 }
 0x362   : > { %v3802_v14 = vpop.f32.mrf.mxu1  ;;  %v4097_v24 = vpop.f32.mrf.mxu0 }
 0x363   : > { %v8631_v45 = vadd.f32 %v4097_v24, %v3802_v14 }
 0x364   : > { %v6411_v4 = vpop.f32.mrf.mxu1  ;;  %v6489_v50 = vpop.f32.mrf.mxu0 }
 0x366   : > { %v3812_v59 = vpop.f32.mrf.mxu1  ;;  %v4107_v20 = vpop.f32.mrf.mxu0 }
 0x368   : > { %v6414_v56 = vpop.f32.mrf.mxu1  ;;  %v6492_v17 = vpop.f32.mrf.mxu0 }
 0x36a   : > { %v3820_v28 = vpop.f32.mrf.mxu1  ;;  %v4115_v11 = vpop.f32.mrf.mxu0 }
 0x36c   : > { %v6417_v27 = vpop.f32.mrf.mxu1  ;;  %v6495_v62 = vpop.f32.mrf.mxu0 }
 0x36e   : > { %v3828_v58 = vpop.f32.mrf.mxu1  ;;  %v4123_v29 = vpop.f32.mrf.mxu0 }
 0x370   : > { %v6420_v13 = vpop.f32.mrf.mxu1  ;;  %v6498_v61 = vpop.f32.mrf.mxu0 }
 0x372   : > { %v3836_v54 = vpop.f32.mrf.mxu1  ;;  %v4131_v51 = vpop.f32.mrf.mxu0 }
 0x374   : > { %v6507_v52 = vpop.f32.mrf.mxu1  ;;  %v6583_v5 = vpop.f32.mrf.mxu0 }
 0x375   : > { %v4623_v6 = vadd.f32 %v6507_v52, %v8569_v41 }
 0x376   : > { %v4399_v15 = vpop.f32.mrf.mxu1  ;;  %v4917_v37 = vpop.f32.mrf.mxu0 }
 0x377   : > { %v5148_v57 = vadd.f32 %v8636_v3, %v4623_v6  ;;  %v4622_v43 = vadd.f32 %v4399_v15, %v8571_v16 }
 0x378   : > { %v6510_v34 = vpop.f32.mrf.mxu1  ;;  %v6586_v12 = vpop.f32.mrf.mxu0 }
 0x379   : > { %v5180_v33 = vadd.f32 %v6583_v5, %v5148_v57  ;;  %v5147_v55 = vadd.f32 %v8636_v3, %v4622_v43  ;;  %v4625_v31 = vadd.f32 %v6510_v34, %v8573_v9 }
 0x37a   : > { %v4409_v41 = vpop.f32.mrf.mxu1  ;;  %v4927_v14 = vpop.f32.mrf.mxu0 }
 0x37b   : > { %v5219_v24 = vadd.f32 %v8644_v10, %v5180_v33  ;;  %v5179_v4 = vadd.f32 %v5147_v55, %v4917_v37  ;;  %v5150_v16 = vadd.f32 %v8636_v3, %v4625_v31  ;;  %v4624_v50 = vadd.f32 %v4409_v41, %v8575_v60 }
 0x37c   : > { %v6513_v59 = vpop.f32.mrf.mxu1  ;;  %v6589_v20 = vpop.f32.mrf.mxu0 }
 0x37d   : > { %v5251_v56 = vmax.f32 %v5219_v24, 0.0  ;;  %v5218_v17 = vadd.f32 %v8644_v10, %v5179_v4  ;;  %v5182_v28 = vadd.f32 %v6586_v12, %v5150_v16  ;;  %v5149_v11 = vadd.f32 %v8636_v3, %v4624_v50 }
 0x37e   : > { %v4627_v9 = vadd.f32 %v6513_v59, %v8577_v42  ;;  %v4419_v27 = vpop.f32.mrf.mxu1  ;;  %v4937_v62 = vpop.f32.mrf.mxu0 }
 0x37f   : > { %5283 = vst.msk [vmem:[%s6798_s18 + $0x8] sm:$0xff] %vm3046_vm4, %v5251_v56  ;;  %v5250_v58 = vmax.f32 %v5218_v17, 0.0  ;;  %v5221_v29 = vadd.f32 %v8644_v10, %v5182_v28  ;;  %v5181_v60 = vadd.f32 %v5149_v11, %v4927_v14  ;;  %v4626_v13 = vadd.f32 %v4419_v27, %v8579_v32 }
 0x380   : > { %v5152_v61 = vadd.f32 %v8636_v3, %v4627_v9  ;;  %v6516_v54 = vpop.f32.mrf.mxu1  ;;  %v6592_v51 = vpop.f32.mrf.mxu0 }
 0x381   : > { %5282 = vst.msk [vmem:[%s6798_s18] sm:$0xff] %vm3046_vm4, %v5250_v58  ;;  %v5253_v52 = vmax.f32 %v5221_v29, 0.0  ;;  %v5220_v42 = vadd.f32 %v8644_v10, %v5181_v60  ;;  %v5151_v5 = vadd.f32 %v8636_v3, %v4626_v13  ;;  %v4629_v6 = vadd.f32 %v6516_v54, %v8581_v22 }
 0x382   : > { %v5184_v15 = vadd.f32 %v6589_v20, %v5152_v61  ;;  %v4429_v37 = vpop.f32.mrf.mxu1  ;;  %v4947_v57 = vpop.f32.mrf.mxu0 }
 0x383   : > { %5285 = vst.msk [vmem:[%s6798_s18 + $0x18] sm:$0xff] %vm3046_vm4, %v5253_v52  ;;  %v5252_v32 = vmax.f32 %v5220_v42, 0.0  ;;  %v5183_v43 = vadd.f32 %v5151_v5, %v4937_v62  ;;  %v5154_v34 = vadd.f32 %v8636_v3, %v4629_v6  ;;  %v4628_v12 = vadd.f32 %v4429_v37, %v8583_v35 }
 0x384   : > { %v5223_v33 = vadd.f32 %v8644_v10, %v5184_v15  ;;  %v6519_v55 = vpop.f32.mrf.mxu1  ;;  %v6595_v31 = vpop.f32.mrf.mxu0 }
 0x385   : > { %5284 = vst.msk [vmem:[%s6798_s18 + $0x10] sm:$0xff] %vm3046_vm4, %v5252_v32  ;;  %v5222_v22 = vadd.f32 %v8644_v10, %v5183_v43  ;;  %v5186_v41 = vadd.f32 %v6592_v51, %v5154_v34  ;;  %v5153_v14 = vadd.f32 %v8636_v3, %v4628_v12  ;;  %v4631_v24 = vadd.f32 %v6519_v55, %v8585_v47 }
 0x386   : > { %v5255_v4 = vmax.f32 %v5223_v33, 0.0  ;;  %v4439_v16 = vpop.f32.mrf.mxu1  ;;  %v4957_v50 = vpop.f32.mrf.mxu0 }
 0x387   : > { %v5254_v59 = vmax.f32 %v5222_v22, 0.0  ;;  %v5225_v35 = vadd.f32 %v8644_v10, %v5186_v41  ;;  %v5185_v20 = vadd.f32 %v5153_v14, %v4947_v57  ;;  %v5156_v56 = vadd.f32 %v8636_v3, %v4631_v24 }
 0x388   : > { %5287 = vst.msk [vmem:[%s6798_s18 + $0x28] sm:$0xff] %vm3046_vm4, %v5255_v4  ;;  %v4630_v17 = vadd.f32 %v4439_v16, %v8587_v23  ;;  %v6522_v28 = vpop.f32.mrf.mxu1  ;;  %v6598_v11 = vpop.f32.mrf.mxu0 }
 0x389   : > { %5286 = vst.msk [vmem:[%s6798_s18 + $0x20] sm:$0xff] %vm3046_vm4, %v5254_v59  ;;  %v5257_v47 = vmax.f32 %v5225_v35, 0.0  ;;  %v5224_v9 = vadd.f32 %v8644_v10, %v5185_v20  ;;  %v5188_v27 = vadd.f32 %v6595_v31, %v5156_v56  ;;  %v4633_v62 = vadd.f32 %v6522_v28, %v8589_v8 }
 0x38a   : > { %v5155_v58 = vadd.f32 %v8636_v3, %v4630_v17  ;;  %v4449_v29 = vpop.f32.mrf.mxu1  ;;  %v4967_v60 = vpop.f32.mrf.mxu0 }
 0x38b   : > { %5289 = vst.msk [vmem:[%s6798_s18 + $0x38] sm:$0xff] %vm3046_vm4, %v5257_v47  ;;  %v5256_v13 = vmax.f32 %v5224_v9, 0.0  ;;  %v5227_v23 = vadd.f32 %v8644_v10, %v5188_v27  ;;  %v5158_v61 = vadd.f32 %v8636_v3, %v4633_v62  ;;  %v4632_v54 = vadd.f32 %v4449_v29, %v8591_v25 }
 0x38c   : > { %v5187_v51 = vadd.f32 %v5155_v58, %v4957_v50  ;;  %v6525_v52 = vpop.f32.mrf.mxu1  ;;  %v6601_v42 = vpop.f32.mrf.mxu0 }
 0x38d   : > { %5288 = vst.msk [vmem:[%s6798_s18 + $0x30] sm:$0xff] %vm3046_vm4, %v5256_v13  ;;  %v5259_v8 = vmax.f32 %v5227_v23, 0.0  ;;  %v5190_v5 = vadd.f32 %v6598_v11, %v5158_v61  ;;  %v5157_v6 = vadd.f32 %v8636_v3, %v4632_v54  ;;  %v4635_v15 = vadd.f32 %v6525_v52, %v8593_v2 }
 0x38e   : > { %v5226_v37 = vadd.f32 %v8644_v10, %v5187_v51  ;;  %v4459_v57 = vpop.f32.mrf.mxu1  ;;  %v4977_v32 = vpop.f32.mrf.mxu0 }
 0x38f   : > { %5291 = vst.msk [vmem:[%s6798_s18 + $0x48] sm:$0xff] %vm3046_vm4, %v5259_v8  ;;  %v5229_v25 = vadd.f32 %v8644_v10, %v5190_v5  ;;  %v5189_v43 = vadd.f32 %v5157_v6, %v4967_v60  ;;  %v5160_v34 = vadd.f32 %v8636_v3, %v4635_v15  ;;  %v4634_v12 = vadd.f32 %v4459_v57, %v8595_v38 }
 0x390   : > { %v5258_v33 = vmax.f32 %v5226_v37, 0.0  ;;  %v6528_v55 = vpop.f32.mrf.mxu1  ;;  %v6604_v31 = vpop.f32.mrf.mxu0 }
 0x391   : > { %v5261_v22 = vmax.f32 %v5229_v25, 0.0  ;;  %v5228_v2 = vadd.f32 %v8644_v10, %v5189_v43  ;;  %v5192_v41 = vadd.f32 %v6601_v42, %v5160_v34  ;;  %v5159_v14 = vadd.f32 %v8636_v3, %v4634_v12 }
 0x392   : > { %5290 = vst.msk [vmem:[%s6798_s18 + $0x40] sm:$0xff] %vm3046_vm4, %v5258_v33  ;;  %v4637_v24 = vadd.f32 %v6528_v55, %v8597_v0  ;;  %v4469_v4 = vpop.f32.mrf.mxu1  ;;  %v4987_v16 = vpop.f32.mrf.mxu0 }
 0x393   : > { %5293 = vst.msk [vmem:[%s6798_s18 + $0x58] sm:$0xff] %vm3046_vm4, %v5261_v22  ;;  %v5260_v38 = vmax.f32 %v5228_v2, 0.0  ;;  %v5231_v50 = vadd.f32 %v8644_v10, %v5192_v41  ;;  %v5191_v59 = vadd.f32 %v5159_v14, %v4977_v32  ;;  %v4636_v35 = vadd.f32 %v4469_v4, %v8599_v49 }
 0x394   : > { %v5162_v20 = vadd.f32 %v8636_v3, %v4637_v24  ;;  %v6531_v56 = vpop.f32.mrf.mxu1  ;;  %v6607_v17 = vpop.f32.mrf.mxu0 }
 0x395   : > { %5292 = vst.msk [vmem:[%s6798_s18 + $0x50] sm:$0xff] %vm3046_vm4, %v5260_v38  ;;  %v5263_v28 = vmax.f32 %v5231_v50, 0.0  ;;  %v5230_v0 = vadd.f32 %v8644_v10, %v5191_v59  ;;  %v5161_v11 = vadd.f32 %v8636_v3, %v4636_v35 }
 0x396   : > { %v5194_v47 = vadd.f32 %v6604_v31, %v5162_v20  ;;  %v4479_v9 = vpop.f32.mrf.mxu1  ;;  %v4997_v27 = vpop.f32.mrf.mxu0 }
 0x397   : > { %5295 = vst.msk [vmem:[%s6798_s18 + $0x68] sm:$0xff] %vm3046_vm4, %v5263_v28  ;;  %v5262_v49 = vmax.f32 %v5230_v0, 0.0  ;;  %v5193_v62 = vadd.f32 %v5161_v11, %v4987_v16 }
 0x398   : > { %v5233_v58 = vadd.f32 %v8644_v10, %v5194_v47  ;;  %v6534_v29 = vpop.f32.mrf.mxu1  ;;  %v6610_v60 = vpop.f32.mrf.mxu0 }
 0x399   : > { %5294 = vst.msk [vmem:[%s6798_s18 + $0x60] sm:$0xff] %vm3046_vm4, %v5262_v49  ;;  %v5232_v13 = vadd.f32 %v8644_v10, %v5193_v62 }
 0x39a   : > { %v5265_v23 = vmax.f32 %v5233_v58, 0.0  ;;  %v4487_v61 = vpop.f32.mrf.mxu1  ;;  %v5005_v54 = vpop.f32.mrf.mxu0 }
 0x39b   : > { %v5264_v51 = vmax.f32 %v5232_v13, 0.0 }
 0x39c   : > { %5297 = vst.msk [vmem:[%s6798_s18 + $0x78] sm:$0xff] %vm3046_vm4, %v5265_v23  ;;  %v6537_v52 = vpop.f32.mrf.mxu1  ;;  %v6613_v42 = vpop.f32.mrf.mxu0 }
 0x39d   : > { %5296 = vst.msk [vmem:[%s6798_s18 + $0x70] sm:$0xff] %vm3046_vm4, %v5264_v51 }
 0x39e   : > { %v4495_v8 = vpop.f32.mrf.mxu1  ;;  %v5013_v5 = vpop.f32.mrf.mxu0 }
 0x3a0   : > { %v6540_v6 = vpop.f32.mrf.mxu1  ;;  %v6616_v15 = vpop.f32.mrf.mxu0 }
 0x3a2   : > { %v4503_v37 = vpop.f32.mrf.mxu1  ;;  %v5021_v57 = vpop.f32.mrf.mxu0 }
 0x3a4   : > { %v6543_v32 = vpop.f32.mrf.mxu1  ;;  %v6619_v25 = vpop.f32.mrf.mxu0 }
 0x3a5   : > { %v4639_v43 = vadd.f32 %v6543_v32, %v8601_v30 }
 0x3a6   : > { %v4511_v34 = vpop.f32.mrf.mxu1  ;;  %v5029_v12 = vpop.f32.mrf.mxu0 }
 0x3a7   : > { %v5164_v33 = vadd.f32 %v8636_v3, %v4639_v43  ;;  %v4638_v55 = vadd.f32 %v4511_v34, %v8603_v18 }
 0x3a8   : > { %v6546_v31 = vpop.f32.mrf.mxu1  ;;  %v6622_v22 = vpop.f32.mrf.mxu0 }
 0x3a9   : > { %v5196_v2 = vadd.f32 %v6619_v25, %v5164_v33  ;;  %v5163_v41 = vadd.f32 %v8636_v3, %v4638_v55  ;;  %v4641_v14 = vadd.f32 %v6546_v31, %v8605_v44 }
 0x3aa   : > { %v4521_v24 = vpop.f32.mrf.mxu1  ;;  %v5039_v4 = vpop.f32.mrf.mxu0 }
 0x3ab   : > { %v5235_v16 = vadd.f32 %v8644_v10, %v5196_v2  ;;  %v5195_v38 = vadd.f32 %v5163_v41, %v5029_v12  ;;  %v5166_v30 = vadd.f32 %v8636_v3, %v4641_v14  ;;  %v4640_v50 = vadd.f32 %v4521_v24, %v8607_v48 }
 0x3ac   : > { %v6549_v59 = vpop.f32.mrf.mxu1  ;;  %v6625_v35 = vpop.f32.mrf.mxu0 }
 0x3ad   : > { %v5267_v18 = vmax.f32 %v5235_v16, 0.0  ;;  %v5234_v20 = vadd.f32 %v8644_v10, %v5195_v38  ;;  %v5198_v56 = vadd.f32 %v6622_v22, %v5166_v30  ;;  %v5165_v17 = vadd.f32 %v8636_v3, %v4640_v50 }
 0x3ae   : > { %v4643_v44 = vadd.f32 %v6549_v59, %v8609_v7  ;;  %v4531_v28 = vpop.f32.mrf.mxu1  ;;  %v5049_v0 = vpop.f32.mrf.mxu0 }
 0x3af   : > { %5299 = vst.msk [vmem:[%s6798_s18 + $0x88] sm:$0xff] %vm3046_vm4, %v5267_v18  ;;  %v5266_v11 = vmax.f32 %v5234_v20, 0.0  ;;  %v5237_v47 = vadd.f32 %v8644_v10, %v5198_v56  ;;  %v5197_v48 = vadd.f32 %v5165_v17, %v5039_v4  ;;  %v4642_v9 = vadd.f32 %v4531_v28, %v8611_v53 }
 0x3b0   : > { %v5168_v27 = vadd.f32 %v8636_v3, %v4643_v44  ;;  %v6552_v49 = vpop.f32.mrf.mxu1  ;;  %v6628_v62 = vpop.f32.mrf.mxu0 }
 0x3b1   : > { %5298 = vst.msk [vmem:[%s6798_s18 + $0x80] sm:$0xff] %vm3046_vm4, %v5266_v11  ;;  %v5269_v58 = vmax.f32 %v5237_v47, 0.0  ;;  %v5236_v7 = vadd.f32 %v8644_v10, %v5197_v48  ;;  %v5167_v29 = vadd.f32 %v8636_v3, %v4642_v9  ;;  %v4645_v60 = vadd.f32 %v6552_v49, %v8613_v40 }
 0x3b2   : > { %v5200_v13 = vadd.f32 %v6625_v35, %v5168_v27  ;;  %v4541_v23 = vpop.f32.mrf.mxu1  ;;  %v5059_v61 = vpop.f32.mrf.mxu0 }
 0x3b3   : > { %5301 = vst.msk [vmem:[%s6798_s18 + $0x98] sm:$0xff] %vm3046_vm4, %v5269_v58  ;;  %v5268_v53 = vmax.f32 %v5236_v7, 0.0  ;;  %v5199_v54 = vadd.f32 %v5167_v29, %v5049_v0  ;;  %v5170_v51 = vadd.f32 %v8636_v3, %v4645_v60  ;;  %v4644_v52 = vadd.f32 %v4541_v23, %v8615_v63 }
 0x3b4   : > { %v5239_v42 = vadd.f32 %v8644_v10, %v5200_v13  ;;  %v6555_v8 = vpop.f32.mrf.mxu1  ;;  %v6631_v5 = vpop.f32.mrf.mxu0 }
 0x3b5   : > { %5300 = vst.msk [vmem:[%s6798_s18 + $0x90] sm:$0xff] %vm3046_vm4, %v5268_v53  ;;  %v5238_v40 = vadd.f32 %v8644_v10, %v5199_v54  ;;  %v5202_v6 = vadd.f32 %v6628_v62, %v5170_v51  ;;  %v5169_v15 = vadd.f32 %v8636_v3, %v4644_v52  ;;  %v4647_v37 = vadd.f32 %v6555_v8, %v8617_v19 }
 0x3b6   : > { %v5271_v57 = vmax.f32 %v5239_v42, 0.0  ;;  %v4551_v32 = vpop.f32.mrf.mxu1  ;;  %v5069_v25 = vpop.f32.mrf.mxu0 }
 0x3b7   : > { %v5270_v43 = vmax.f32 %v5238_v40, 0.0  ;;  %v5241_v63 = vadd.f32 %v8644_v10, %v5202_v6  ;;  %v5201_v34 = vadd.f32 %v5169_v15, %v5059_v61  ;;  %v5172_v12 = vadd.f32 %v8636_v3, %v4647_v37 }
 0x3b8   : > { %5303 = vst.msk [vmem:[%s6798_s18 + $0xa8] sm:$0xff] %vm3046_vm4, %v5271_v57  ;;  %v4646_v33 = vadd.f32 %v4551_v32, %v8619_v21  ;;  %v6558_v55 = vpop.f32.mrf.mxu1  ;;  %v6634_v31 = vpop.f32.mrf.mxu0 }
 0x3b9   : > { %5302 = vst.msk [vmem:[%s6798_s18 + $0xa0] sm:$0xff] %vm3046_vm4, %v5270_v43  ;;  %v5273_v19 = vmax.f32 %v5241_v63, 0.0  ;;  %v5240_v22 = vadd.f32 %v8644_v10, %v5201_v34  ;;  %v5204_v2 = vadd.f32 %v6631_v5, %v5172_v12  ;;  %v4649_v41 = vadd.f32 %v6558_v55, %v8621_v26 }
 0x3ba   : > { %v5171_v14 = vadd.f32 %v8636_v3, %v4646_v33  ;;  %v4561_v24 = vpop.f32.mrf.mxu1  ;;  %v5079_v4 = vpop.f32.mrf.mxu0 }
 0x3bb   : > { %5305 = vst.msk [vmem:[%s6798_s18 + $0xb8] sm:$0xff] %vm3046_vm4, %v5273_v19  ;;  %v5272_v16 = vmax.f32 %v5240_v22, 0.0  ;;  %v5243_v21 = vadd.f32 %v8644_v10, %v5204_v2  ;;  %v5174_v38 = vadd.f32 %v8636_v3, %v4649_v41  ;;  %v4648_v30 = vadd.f32 %v4561_v24, %v8623_v46 }
 0x3bc   : > { %v5203_v50 = vadd.f32 %v5171_v14, %v5069_v25  ;;  %v6561_v59 = vpop.f32.mrf.mxu1  ;;  %v6637_v35 = vpop.f32.mrf.mxu0 }
 0x3bd   : > { %5304 = vst.msk [vmem:[%s6798_s18 + $0xb0] sm:$0xff] %vm3046_vm4, %v5272_v16  ;;  %v5275_v26 = vmax.f32 %v5243_v21, 0.0  ;;  %v5206_v18 = vadd.f32 %v6634_v31, %v5174_v38  ;;  %v5173_v20 = vadd.f32 %v8636_v3, %v4648_v30  ;;  %v4651_v56 = vadd.f32 %v6561_v59, %v8625_v1 }
 0x3be   : > { %v5242_v17 = vadd.f32 %v8644_v10, %v5203_v50  ;;  %v4571_v44 = vpop.f32.mrf.mxu1  ;;  %v5089_v28 = vpop.f32.mrf.mxu0 }
 0x3bf   : > { %5307 = vst.msk [vmem:[%s6798_s18 + $0xc8] sm:$0xff] %vm3046_vm4, %v5275_v26  ;;  %v5245_v46 = vadd.f32 %v8644_v10, %v5206_v18  ;;  %v5205_v0 = vadd.f32 %v5173_v20, %v5079_v4  ;;  %v5176_v11 = vadd.f32 %v8636_v3, %v4651_v56  ;;  %v4650_v47 = vadd.f32 %v4571_v44, %v8627_v36 }
 0x3c0   : > { %v5274_v48 = vmax.f32 %v5242_v17, 0.0  ;;  %v6564_v9 = vpop.f32.mrf.mxu1  ;;  %v6640_v27 = vpop.f32.mrf.mxu0 }
 0x3c1   : > { %v5277_v49 = vmax.f32 %v5245_v46, 0.0  ;;  %v5244_v1 = vadd.f32 %v8644_v10, %v5205_v0  ;;  %v5208_v62 = vadd.f32 %v6637_v35, %v5176_v11  ;;  %v5175_v58 = vadd.f32 %v8636_v3, %v4650_v47 }
 0x3c2   : > { %5306 = vst.msk [vmem:[%s6798_s18 + $0xc0] sm:$0xff] %vm3046_vm4, %v5274_v48  ;;  %v4653_v7 = vadd.f32 %v6564_v9, %v8629_v39  ;;  %v4581_v29 = vpop.f32.mrf.mxu1  ;;  %v5099_v60 = vpop.f32.mrf.mxu0 }
 0x3c3   : > { %5309 = vst.msk [vmem:[%s6798_s18 + $0xd8] sm:$0xff] %vm3046_vm4, %v5277_v49  ;;  %v5276_v36 = vmax.f32 %v5244_v1, 0.0  ;;  %v5247_v13 = vadd.f32 %v8644_v10, %v5208_v62  ;;  %v5207_v23 = vadd.f32 %v5175_v58, %v5089_v28  ;;  %v4652_v61 = vadd.f32 %v4581_v29, %v8631_v45 }
 0x3c4   : > { %v5178_v53 = vadd.f32 %v8636_v3, %v4653_v7  ;;  %v6567_v54 = vpop.f32.mrf.mxu1  ;;  %v6643_v51 = vpop.f32.mrf.mxu0 }
 0x3c5   : > { %5308 = vst.msk [vmem:[%s6798_s18 + $0xd0] sm:$0xff] %vm3046_vm4, %v5276_v36  ;;  %v5279_v52 = vmax.f32 %v5247_v13, 0.0  ;;  %v5246_v39 = vadd.f32 %v8644_v10, %v5207_v23  ;;  %v5177_v42 = vadd.f32 %v8636_v3, %v4652_v61 }
 0x3c6   : > { %v5210_v8 = vadd.f32 %v6640_v27, %v5178_v53  ;;  %v4591_v5 = vpop.f32.mrf.mxu1  ;;  %v5109_v40 = vpop.f32.mrf.mxu0 }
 0x3c7   : > { %5311 = vst.msk [vmem:[%s6798_s18 + $0xe8] sm:$0xff] %vm3046_vm4, %v5279_v52  ;;  %v5278_v45 = vmax.f32 %v5246_v39, 0.0  ;;  %v5209_v6 = vadd.f32 %v5177_v42, %v5099_v60 }
 0x3c8   : > { %v5249_v15 = vadd.f32 %v8644_v10, %v5210_v8  ;;  %v6570_v37 = vpop.f32.mrf.mxu1  ;;  %v6646_v57 = vpop.f32.mrf.mxu0 }
 0x3c9   : > { %5310 = vst.msk [vmem:[%s6798_s18 + $0xe0] sm:$0xff] %vm3046_vm4, %v5278_v45  ;;  %v5248_v32 = vadd.f32 %v8644_v10, %v5209_v6 }
 0x3ca   : > { %v5281_v25 = vmax.f32 %v5249_v15, 0.0  ;;  %v4599_v43 = vpop.f32.mrf.mxu1  ;;  %v5117_v3 = vpop.f32.mrf.mxu0 }
 0x3cb   : > { %v5280_v63 = vmax.f32 %v5248_v32, 0.0 }
 0x3cc   : > { %5313 = vst.msk [vmem:[%s6798_s18 + $0xf8] sm:$0xff] %vm3046_vm4, %v5281_v25  ;;  %v6573_v34 = vpop.f32.mrf.mxu1  ;;  %v6649_v12 = vpop.f32.mrf.mxu0 }
 0x3cd   : > { %5312 = vst.msk [vmem:[%s6798_s18 + $0xf0] sm:$0xff] %vm3046_vm4, %v5280_v63 }
 0x3ce   : > { %v4607_v33 = vpop.f32.mrf.mxu1  ;;  %v5125_v55 = vpop.f32.mrf.mxu0 }
 0x3d0   : > { %v6576_v31 = vpop.f32.mrf.mxu1  ;;  %v6652_v19 = vpop.f32.mrf.mxu0 }
 0x3d2   : > { %v4615_v22 = vpop.f32.mrf.mxu1  ;;  %v5133_v2 = vpop.f32.mrf.mxu0 }
 0x3d3 PF: > { %s17_s26 = sadd.s32 1, %s6710_s26   ;;  %s8863_s24 = smov %s6706_s25 }
 0x3d4   : > { %p14_p7 = scmp.ge.s32.totalorder %s17_s26, 4   ;;  %s8864_s25 = smov %s8866_s27 }
 0x3d6   :  { %16 = sbr.rel (!%p14_p7) target bundleno = 2 (0x2), region = 86 }

</bundles_post_ra>
